<compile_context>
chip_gen: v7x
topology: tpu7x:2x2x1
jax: 0.10.0
libtpu: 0.0.40
codegen_flags: <defaults>
</compile_context>

<pallas_src>
import functools

import jax
import jax.numpy as jnp
import numpy as np
from jax import lax
from jax.experimental import pallas as pl
from jax.experimental.pallas import tpu as pltpu

EPS = 1e-5
LANES = 128  # pad the channel / matmul-N dimension to a full lane width


# ----------------------------- glue helpers ----------------------------------
def _round_up(x, m):
    return (x + m - 1) // m * m


def im2col(x, kh, kw, padding, stride, extra=None):
    """x: (N,H,W,C) -> patches (N*Ho*Wo, kh*kw*C [+ Ce]), feature order (kh,kw,C).

    `extra` (N,Ho,Wo,Ce), if given, is appended as trailing features so a second
    matmul operand (here: the 1x1-shortcut input) rides the same patch tensor.
    """
    n, h, w, c = x.shape
    xp = jnp.pad(x, ((0, 0), (padding, padding), (padding, padding), (0, 0)))
    ho = (h + 2 * padding - kh) // stride + 1
    wo = (w + 2 * padding - kw) // stride + 1
    cols = []
    for i in range(kh):
        for j in range(kw):
            cols.append(xp[:, i:i + ho * stride:stride, j:j + wo * stride:stride, :])
    if extra is not None:
        assert extra.shape[:3] == (n, ho, wo), (extra.shape, (n, ho, wo))
        cols.append(extra)
    patches = jnp.concatenate(cols, axis=-1)
    return patches.reshape(n * ho * wo, -1), ho, wo


def _pad_lanes(a, col_offset=0):
    """Place `a`'s columns at [col_offset, col_offset + a.shape[-1]) of LANES."""
    left = col_offset
    right = LANES - col_offset - a.shape[-1]
    if left == 0 and right == 0:
        return a
    return jnp.pad(a, ((0, 0), (left, right)))


def _row_tiling(p_rows, want):
    """Row tile (multiple of 16), padded row count and grid size."""
    tm = min(want, _round_up(p_rows, 16))
    tm = max(16, (tm // 16) * 16)
    p_pad = _round_up(p_rows, tm)
    return tm, p_pad, p_pad // tm


def _ew_tile(p_pad, tm, cap=1024):
    """Largest multiple of tm (<= cap) dividing p_pad, for element-wise passes."""
    t = tm
    while t * 2 <= cap and p_pad % (t * 2) == 0:
        t *= 2
    return t


def _cparams():
    return pltpu.CompilerParams(dimension_semantics=("parallel",),
                                vmem_limit_bytes=32 * 1024 * 1024)


# ----------------------------- Pallas kernels ---------------------------------
def conv_partial_stats_kernel(p_ref, w_ref, y_ref, st_ref):
    """One row tile of (patches @ weights) on the MXU (bf16 x bf16 -> f32).

    Stores the tile in bf16 and emits this tile's per-channel partial
    [sum; sum-of-squares] (taken from the f32 MXU result) as its own
    (1, 2, LANES) block.  No cross-tile dependence -> the grid axis is
    'parallel' (both TensorCores usable on v7x)."""
    y = jnp.dot(p_ref[...], w_ref[...], preferred_element_type=jnp.float32)
    y_ref[...] = y.astype(y_ref.dtype)
    s = jnp.sum(y, axis=0, keepdims=True)
    q = jnp.sum(y * y, axis=0, keepdims=True)
    st_ref[...] = jnp.concatenate([s, q], axis=0).reshape(1, 2, LANES)


def _scale_shift(st, gb, inv_count):
    """Fold partial stats + (gamma, beta) rows into per-lane (scale, shift)."""
    tot = jnp.sum(st, axis=0)                      # (2, LANES)
    mean = tot[0:1, :] * inv_count
    var = tot[1:2, :] * inv_count - mean * mean
    scale = gb[0:1, :] * lax.rsqrt(var + EPS)      # rsqrt -> EUP slot
    shift = gb[1:2, :] - mean * scale
    return scale, shift


def bn_relu_kernel(y_ref, st_ref, gb_ref, o_ref, *, inv_count):
    """out1 tile = relu(scale * y + shift), lane-dense bf16 store."""
    scale, shift = _scale_shift(st_ref[...], gb_ref[...], inv_count)
    z = y_ref[...].astype(jnp.float32) * scale + shift
    o_ref[...] = jnp.maximum(z, 0.0).astype(o_ref.dtype)


def bn_add_relu_kernel(y_ref, st_ref, gb_ref, m_ref, o_ref, *, inv_count):
    """Main path (lanes [0,cout)) and shortcut (lanes [cout,2cout)) share the
    fused tile y.  Both BN affines are applied at their native lanes in one FMA
    (gamma/beta are lane-placed in glue), then the residual add folds the
    shortcut lanes onto the main lanes through a static 0/1 combine matrix on
    the MXU, followed by ReLU.  Padded lanes come out exactly 0."""
    scale, shift = _scale_shift(st_ref[...], gb_ref[...], inv_count)
    z = y_ref[...].astype(jnp.float32) * scale + shift
    comb = jnp.dot(z, m_ref[...], preferred_element_type=jnp.float32)
    o_ref[...] = jnp.maximum(comb, 0.0)


# ----------------------------- BasicBlock forward ------------------------------
@functools.partial(jax.jit,
                   static_argnames=("kernel_size", "padding", "stride", "row_tile"))
def basic_block_forward(x_nchw, params, kernel_size, padding, stride, row_tile=512):
    k = kernel_size
    f32, bf16 = jnp.float32, jnp.bfloat16

    # NCHW (PyTorch) -> NHWC; activations enter the matmuls as bf16.
    x = jnp.transpose(x_nchw, (0, 2, 3, 1)).astype(bf16)
    n, h, w, cin = x.shape
    cout = params["w1"].shape[-1]
    assert 2 * cout <= LANES, "fused main+shortcut lane groups must fit in 128 lanes"

    # conv weights -> lane-dense (K, 128) matmul operands
    w1 = _pad_lanes(params["w1"].reshape(k * k * cin, cout).astype(bf16))
    w2 = _pad_lanes(params["w2"].reshape(k * k * cout, cout).astype(bf16))
    ws = _pad_lanes(params["ws"].reshape(cin, cout).astype(bf16), col_offset=cout)
    w_fused = jnp.concatenate([w2, ws], axis=0)               # (k*k*cout + cin, 128)

    # per-channel BN params, lane-placed (padded lanes -> scale=shift=0 -> output 0)
    gb1 = jnp.concatenate([_pad_lanes(params["g1"].astype(f32)),
                           _pad_lanes(params["b1"].astype(f32))], axis=0)   # (2,128)
    g_comb = _pad_lanes(jnp.concatenate([params["g2"], params["gs"]], -1).astype(f32))
    b_comb = _pad_lanes(jnp.concatenate([params["b2"], params["bs"]], -1).astype(f32))
    gb2 = jnp.concatenate([g_comb, b_comb], axis=0)                          # (2,128)

    # static residual-combine matrix: output lane c (< cout) = lane c + lane cout+c
    m_np = np.zeros((LANES, LANES), np.float32)
    m_np[np.arange(cout), np.arange(cout)] = 1.0
    m_np[cout + np.arange(cout), np.arange(cout)] = 1.0
    m_comb = jnp.asarray(m_np)

    # ============ stage 1: conv1 (MXU) + partial BN1 statistics ================
    p1, ho, wo = im2col(x, k, k, padding, stride)             # (P1, k*k*cin) bf16
    p1_rows = n * ho * wo
    tm1, p1_pad, grid1 = _row_tiling(p1_rows, row_tile)
    p1 = jnp.pad(p1, ((0, p1_pad - p1_rows), (0, 0)))         # zero rows: 0 in stats
    kdim1 = k * k * cin

    y1, st1 = pl.pallas_call(
        conv_partial_stats_kernel,
        out_shape=[jax.ShapeDtypeStruct((p1_pad, LANES), bf16),
                   jax.ShapeDtypeStruct((grid1, 2, LANES), f32)],
        grid=(grid1,),
        in_specs=[pl.BlockSpec((tm1, kdim1), lambda i: (i, 0)),     # patches (tiled)
                  pl.BlockSpec((kdim1, LANES), lambda i: (0, 0))],  # weights (resident)
        out_specs=[pl.BlockSpec((tm1, LANES), lambda i: (i, 0)),    # y1 bf16 (tiled)
                   pl.BlockSpec((1, 2, LANES), lambda i: (i, 0, 0))],  # partial stats
        compiler_params=_cparams(),
    )(p1, w1)

    # ============ stage 2: BN1 affine + ReLU (element-wise, parallel) ==========
    te1 = _ew_tile(p1_pad, tm1)
    out1 = pl.pallas_call(
        functools.partial(bn_relu_kernel, inv_count=1.0 / p1_rows),
        out_shape=jax.ShapeDtypeStruct((p1_pad, LANES), bf16),
        grid=(p1_pad // te1,),
        in_specs=[pl.BlockSpec((te1, LANES), lambda i: (i, 0)),
                  pl.BlockSpec((grid1, 2, LANES), lambda i: (0, 0, 0)),  # resident
                  pl.BlockSpec((2, LANES), lambda i: (0, 0))],
        out_specs=pl.BlockSpec((te1, LANES), lambda i: (i, 0)),
        compiler_params=_cparams(),
    )(y1, st1, gb1)

    # ==== stage 3: conv2 fused with the 1x1 shortcut (one MXU matmul) + stats ==
    out1_nhwc = out1[:p1_rows, :cout].reshape(n, ho, wo, cout)
    # NOTE: the PyTorch module applies `stride` to conv2 as well (its quirk),
    # while the shortcut subsamples x once; like the module, only stride=1 keeps
    # the two spatial grids equal (the im2col assert catches a mismatch).
    x_sub = x[:, ::stride, ::stride, :]
    p2, ho2, wo2 = im2col(out1_nhwc, k, k, padding, stride, extra=x_sub)
    p2_rows = n * ho2 * wo2
    tm2, p2_pad, grid2 = _row_tiling(p2_rows, row_tile)
    p2 = jnp.pad(p2, ((0, p2_pad - p2_rows), (0, 0)))
    kdim2 = k * k * cout + cin

    y2, st2 = pl.pallas_call(
        conv_partial_stats_kernel,
        out_shape=[jax.ShapeDtypeStruct((p2_pad, LANES), bf16),
                   jax.ShapeDtypeStruct((grid2, 2, LANES), f32)],
        grid=(grid2,),
        in_specs=[pl.BlockSpec((tm2, kdim2), lambda i: (i, 0)),
                  pl.BlockSpec((kdim2, LANES), lambda i: (0, 0))],
        out_specs=[pl.BlockSpec((tm2, LANES), lambda i: (i, 0)),
                   pl.BlockSpec((1, 2, LANES), lambda i: (i, 0, 0))],
        compiler_params=_cparams(),
    )(p2, w_fused)

    # ==== stage 4: BN2 + BN_s affine + residual add (combine matmul) + ReLU ====
    te2 = _ew_tile(p2_pad, tm2)
    outp = pl.pallas_call(
        functools.partial(bn_add_relu_kernel, inv_count=1.0 / p2_rows),
        out_shape=jax.ShapeDtypeStruct((p2_pad, LANES), f32),
        grid=(p2_pad // te2,),
        in_specs=[pl.BlockSpec((te2, LANES), lambda i: (i, 0)),
                  pl.BlockSpec((grid2, 2, LANES), lambda i: (0, 0, 0)),  # resident
                  pl.BlockSpec((2, LANES), lambda i: (0, 0)),
                  pl.BlockSpec((LANES, LANES), lambda i: (0, 0))],
        out_specs=pl.BlockSpec((te2, LANES), lambda i: (i, 0)),
        compiler_params=_cparams(),
    )(y2, st2, gb2, m_comb)

    out_nhwc = outp[:p2_rows, :cout].reshape(n, ho2, wo2, cout)
    return jnp.transpose(out_nhwc, (0, 3, 1, 2))              # back to NCHW


# ----------------------------- pure-JAX reference ------------------------------
def reference_forward(x_nchw, params, kernel_size, padding, stride):
    """Pure-JAX reference of the PyTorch module (training-mode BatchNorm).
    It mirrors the kernel path's quantization points (bf16 conv operands and
    bf16-stored conv outputs) so the comparison checks the kernel logic rather
    than bf16 rounding; BN statistics are taken from the full-precision conv
    results, exactly like the kernel does."""
    f32, bf16 = jnp.float32, jnp.bfloat16
    x = jnp.transpose(x_nchw, (0, 2, 3, 1)).astype(bf16).astype(f32)
    dn = ("NHWC", "HWIO", "NHWC")
    pad = [(padding, padding), (padding, padding)]

    def bn(y, g, b):  # stats from f32 conv output; affine applied to bf16-stored copy
        yf = y.reshape(-1, y.shape[-1])
        m = jnp.mean(yf, 0)
        v = jnp.mean((yf - m) ** 2, 0)
        yq = y.astype(bf16).astype(f32)
        return (yq - m) * lax.rsqrt(v + EPS) * g.reshape(-1) + b.reshape(-1)

    w1 = params["w1"].astype(f32)
    w2 = params["w2"].astype(f32)
    ws = params["ws"].astype(f32)

    o = lax.conv_general_dilated(x, w1, (stride, stride), pad, dimension_numbers=dn)
    o = jnp.maximum(bn(o, params["g1"], params["b1"]), 0.0)
    o = o.astype(bf16).astype(f32)            # kernel stores out1 in bf16
    o = lax.conv_general_dilated(o, w2, (stride, stride), pad, dimension_numbers=dn)
    o = bn(o, params["g2"], params["b2"])
    s = lax.conv_general_dilated(x, ws, (stride, stride), [(0, 0), (0, 0)],
                                 dimension_numbers=dn)
    s = bn(s, params["gs"], params["bs"])
    o = jnp.maximum(o + s, 0.0)
    return jnp.transpose(o, (0, 3, 1, 2))


# ----------------------------- main ------------------------------
if __name__ == "__main__":
    # BasicBlock(in_channels=4, out_channels=8, kernel_size=3, padding=1, stride=1)
    N, CIN, H, W = 2, 4, 16, 16
    COUT, K, PAD, STRIDE = 8, 3, 1, 1

    key = jax.random.PRNGKey(0)
    kx, k1, k2, k3 = jax.random.split(key, 4)

    x = jax.random.normal(kx, (N, CIN, H, W), dtype=jnp.float32)   # NCHW like PyTorch

    params = {
        # conv weights HWIO, stored bf16 (the matmul operand dtype); BN params f32.
        "w1": (0.1 * jax.random.normal(k1, (K, K, CIN, COUT), jnp.float32)).astype(jnp.bfloat16),
        "g1": jnp.ones((1, COUT), jnp.float32),
        "b1": jnp.zeros((1, COUT), jnp.float32),
        "w2": (0.1 * jax.random.normal(k2, (K, K, COUT, COUT), jnp.float32)).astype(jnp.bfloat16),
        "g2": jnp.ones((1, COUT), jnp.float32),
        "b2": jnp.zeros((1, COUT), jnp.float32),
        "ws": (0.1 * jax.random.normal(k3, (1, 1, CIN, COUT), jnp.float32)).astype(jnp.bfloat16),
        "gs": jnp.ones((1, COUT), jnp.float32),
        "bs": jnp.zeros((1, COUT), jnp.float32),
    }

    out = basic_block_forward(x, params, kernel_size=K, padding=PAD, stride=STRIDE)
    out = jax.block_until_ready(out)
    assert out.shape == (N, COUT, H, W), out.shape

    ref = jax.block_until_ready(reference_forward(x, params, K, PAD, STRIDE))
    # Both paths share the same bf16 quantization points, so the remaining
    # differences are accumulation order / variance-formula level (~1e-5).
    np.testing.assert_allclose(np.asarray(out), np.asarray(ref), rtol=2e-2, atol=2e-2)

    print("KERNEL_OK")
</pallas_src>

<mosaic_0001>
module attributes {stable_mosaic.version = 11 : i64} {
  func.func @conv_partial_stats_kernel(%arg0: i32, %arg1: memref<512x36xbf16, #tpu.memory_space<vmem>>, %arg2: memref<36x128xbf16, #tpu.memory_space<vmem>>, %arg3: memref<512x128xbf16, #tpu.memory_space<vmem>>, %arg4: memref<1x2x128xf32, #tpu.memory_space<vmem>>) attributes {dimension_semantics = [#tpu.dimension_semantics<parallel>], iteration_bounds = array<i64: 1>, scalar_prefetch = 0 : i64, scratch_operands = 0 : i64, tpu.core_type = #tpu.core_type<tc>, window_params = [{transform_indices = @transform_0, window_bounds = array<i64: 512, 36>}, {pipeline_mode = #tpu.pipeline_mode<synchronous>, transform_indices = @transform_1, window_bounds = array<i64: 36, 128>}, {transform_indices = @transform_2, window_bounds = array<i64: 512, 128>}, {transform_indices = @transform_3, window_bounds = array<i64: 1, 2, 128>}]} {
    %c0 = arith.constant 0 : index
    %c0_0 = arith.constant 0 : index
    %0 = vector.load %arg1[%c0, %c0_0] : memref<512x36xbf16, #tpu.memory_space<vmem>>, vector<512x36xbf16>
    %c0_1 = arith.constant 0 : index
    %c0_2 = arith.constant 0 : index
    %1 = vector.load %arg2[%c0_1, %c0_2] : memref<36x128xbf16, #tpu.memory_space<vmem>>, vector<36x128xbf16>
    %cst = arith.constant dense<0.000000e+00> : vector<512x128xf32>
    %2 = tpu.matmul %0, %1, %cst {dimension_numbers = #tpu.dot_dimension_numbers<[1], [0], [0], [1], [0, 0, 1, 1], [], []>} : vector<512x36xbf16>, vector<36x128xbf16>, vector<512x128xf32> -> vector<512x128xf32>
    %3 = arith.truncf %2 : vector<512x128xf32> to vector<512x128xbf16>
    %c0_3 = arith.constant 0 : index
    %c0_4 = arith.constant 0 : index
    %4 = vector.load %arg3[%c0_3, %c0_4] : memref<512x128xbf16, #tpu.memory_space<vmem>>, vector<512x128xbf16>
    tpu.vector_store %arg3[%c0_3, %c0_4], %3 {strides = array<i32>} : memref<512x128xbf16, #tpu.memory_space<vmem>>, vector<512x128xbf16>,
    %cst_5 = arith.constant dense<0.000000e+00> : vector<128xf32>
    %5 = vector.multi_reduction <add>, %2, %cst_5 [0] : vector<512x128xf32> to vector<128xf32>
    %6 = vector.shape_cast %5 : vector<128xf32> to vector<1x128xf32>
    %7 = arith.mulf %2, %2 : vector<512x128xf32>
    %cst_6 = arith.constant dense<0.000000e+00> : vector<128xf32>
    %8 = vector.multi_reduction <add>, %7, %cst_6 [0] : vector<512x128xf32> to vector<128xf32>
    %9 = vector.shape_cast %8 : vector<128xf32> to vector<1x128xf32>
    %10 = tpu.concatenate %6, %9 in 0 : vector<1x128xf32>, vector<1x128xf32> -> vector<2x128xf32>
    %11 = vector.shape_cast %10 : vector<2x128xf32> to vector<1x2x128xf32>
    %c0_7 = arith.constant 0 : index
    %c0_8 = arith.constant 0 : index
    %c0_9 = arith.constant 0 : index
    %12 = vector.load %arg4[%c0_7, %c0_8, %c0_9] : memref<1x2x128xf32, #tpu.memory_space<vmem>>, vector<1x2x128xf32>
    tpu.vector_store %arg4[%c0_7, %c0_8, %c0_9], %11 {strides = array<i32>} : memref<1x2x128xf32, #tpu.memory_space<vmem>>, vector<1x2x128xf32>,
    return
  }
  func.func @transform_0(%arg0: i32) -> (i32, i32) {
    %c0_i32 = arith.constant 0 : i32
    %c0_i32_0 = arith.constant 0 : i32
    return %arg0, %c0_i32 : i32, i32
  }
  func.func @transform_1(%arg0: i32) -> (i32, i32) {
    %c0_i32 = arith.constant 0 : i32
    %c0_i32_0 = arith.constant 0 : i32
    %c0_i32_1 = arith.constant 0 : i32
    return %c0_i32, %c0_i32_0 : i32, i32
  }
  func.func @transform_2(%arg0: i32) -> (i32, i32) {
    %c0_i32 = arith.constant 0 : i32
    %c0_i32_0 = arith.constant 0 : i32
    return %arg0, %c0_i32 : i32, i32
  }
  func.func @transform_3(%arg0: i32) -> (i32, i32, i32) {
    %c0_i32 = arith.constant 0 : i32
    %c0_i32_0 = arith.constant 0 : i32
    %c0_i32_1 = arith.constant 0 : i32
    return %arg0, %c0_i32, %c0_i32_0 : i32, i32, i32
  }
}

module attributes {stable_mosaic.version = 11 : i64} {
  func.func @bn_relu_kernel(%arg0: i32, %arg1: memref<512x128xbf16, #tpu.memory_space<vmem>>, %arg2: memref<1x2x128xf32, #tpu.memory_space<vmem>>, %arg3: memref<2x128xf32, #tpu.memory_space<vmem>>, %arg4: memref<512x128xbf16, #tpu.memory_space<vmem>>) attributes {dimension_semantics = [#tpu.dimension_semantics<parallel>], iteration_bounds = array<i64: 1>, scalar_prefetch = 0 : i64, scratch_operands = 0 : i64, tpu.core_type = #tpu.core_type<tc>, window_params = [{transform_indices = @transform_0, window_bounds = array<i64: 512, 128>}, {pipeline_mode = #tpu.pipeline_mode<synchronous>, transform_indices = @transform_1, window_bounds = array<i64: 1, 2, 128>}, {pipeline_mode = #tpu.pipeline_mode<synchronous>, transform_indices = @transform_2, window_bounds = array<i64: 2, 128>}, {transform_indices = @transform_3, window_bounds = array<i64: 512, 128>}]} {
    %c0 = arith.constant 0 : index
    %c0_0 = arith.constant 0 : index
    %c0_1 = arith.constant 0 : index
    %0 = vector.load %arg2[%c0, %c0_0, %c0_1] : memref<1x2x128xf32, #tpu.memory_space<vmem>>, vector<1x2x128xf32>
    %c0_2 = arith.constant 0 : index
    %c0_3 = arith.constant 0 : index
    %1 = vector.load %arg3[%c0_2, %c0_3] : memref<2x128xf32, #tpu.memory_space<vmem>>, vector<2x128xf32>
    %cst = arith.constant dense<0.000000e+00> : vector<2x128xf32>
    %2 = vector.multi_reduction <add>, %0, %cst [0] : vector<1x2x128xf32> to vector<2x128xf32>
    %3 = vector.extract_strided_slice %2 {offsets = [0, 0], sizes = [1, 128], strides = [1, 1]} : vector<2x128xf32> to vector<1x128xf32>
    %cst_4 = arith.constant 0.001953125 : f32
    %4 = vector.broadcast %cst_4 : f32 to vector<1x128xf32>
    %5 = arith.mulf %3, %4 : vector<1x128xf32>
    %6 = vector.extract_strided_slice %2 {offsets = [1, 0], sizes = [1, 128], strides = [1, 1]} : vector<2x128xf32> to vector<1x128xf32>
    %cst_5 = arith.constant 0.001953125 : f32
    %7 = vector.broadcast %cst_5 : f32 to vector<1x128xf32>
    %8 = arith.mulf %6, %7 : vector<1x128xf32>
    %9 = arith.mulf %5, %5 : vector<1x128xf32>
    %10 = arith.subf %8, %9 : vector<1x128xf32>
    %11 = vector.extract_strided_slice %1 {offsets = [0, 0], sizes = [1, 128], strides = [1, 1]} : vector<2x128xf32> to vector<1x128xf32>
    %cst_6 = arith.constant 9.99999974E-6 : f32
    %12 = vector.broadcast %cst_6 : f32 to vector<1x128xf32>
    %13 = arith.addf %10, %12 : vector<1x128xf32>
    %14 = math.rsqrt %13 : vector<1x128xf32>
    %15 = arith.mulf %11, %14 : vector<1x128xf32>
    %16 = vector.extract_strided_slice %1 {offsets = [1, 0], sizes = [1, 128], strides = [1, 1]} : vector<2x128xf32> to vector<1x128xf32>
    %17 = arith.mulf %5, %15 : vector<1x128xf32>
    %18 = arith.subf %16, %17 : vector<1x128xf32>
    %c0_7 = arith.constant 0 : index
    %c0_8 = arith.constant 0 : index
    %19 = vector.load %arg1[%c0_7, %c0_8] : memref<512x128xbf16, #tpu.memory_space<vmem>>, vector<512x128xbf16>
    %20 = arith.extf %19 : vector<512x128xbf16> to vector<512x128xf32>
    %21 = vector.broadcast %15 : vector<1x128xf32> to vector<512x128xf32>
    %22 = arith.mulf %20, %21 : vector<512x128xf32>
    %23 = vector.broadcast %18 : vector<1x128xf32> to vector<512x128xf32>
    %24 = arith.addf %22, %23 : vector<512x128xf32>
    %cst_9 = arith.constant 0.000000e+00 : f32
    %25 = vector.broadcast %cst_9 : f32 to vector<512x128xf32>
    %26 = arith.maximumf %24, %25 : vector<512x128xf32>
    %27 = arith.truncf %26 : vector<512x128xf32> to vector<512x128xbf16>
    %c0_10 = arith.constant 0 : index
    %c0_11 = arith.constant 0 : index
    %28 = vector.load %arg4[%c0_10, %c0_11] : memref<512x128xbf16, #tpu.memory_space<vmem>>, vector<512x128xbf16>
    tpu.vector_store %arg4[%c0_10, %c0_11], %27 {strides = array<i32>} : memref<512x128xbf16, #tpu.memory_space<vmem>>, vector<512x128xbf16>,
    return
  }
  func.func @transform_0(%arg0: i32) -> (i32, i32) {
    %c0_i32 = arith.constant 0 : i32
    %c0_i32_0 = arith.constant 0 : i32
    return %arg0, %c0_i32 : i32, i32
  }
  func.func @transform_1(%arg0: i32) -> (i32, i32, i32) {
    %c0_i32 = arith.constant 0 : i32
    %c0_i32_0 = arith.constant 0 : i32
    %c0_i32_1 = arith.constant 0 : i32
    %c0_i32_2 = arith.constant 0 : i32
    return %c0_i32, %c0_i32_0, %c0_i32_1 : i32, i32, i32
  }
  func.func @transform_2(%arg0: i32) -> (i32, i32) {
    %c0_i32 = arith.constant 0 : i32
    %c0_i32_0 = arith.constant 0 : i32
    %c0_i32_1 = arith.constant 0 : i32
    return %c0_i32, %c0_i32_0 : i32, i32
  }
  func.func @transform_3(%arg0: i32) -> (i32, i32) {
    %c0_i32 = arith.constant 0 : i32
    %c0_i32_0 = arith.constant 0 : i32
    return %arg0, %c0_i32 : i32, i32
  }
}

module attributes {stable_mosaic.version = 11 : i64} {
  func.func @conv_partial_stats_kernel(%arg0: i32, %arg1: memref<512x76xbf16, #tpu.memory_space<vmem>>, %arg2: memref<76x128xbf16, #tpu.memory_space<vmem>>, %arg3: memref<512x128xbf16, #tpu.memory_space<vmem>>, %arg4: memref<1x2x128xf32, #tpu.memory_space<vmem>>) attributes {dimension_semantics = [#tpu.dimension_semantics<parallel>], iteration_bounds = array<i64: 1>, scalar_prefetch = 0 : i64, scratch_operands = 0 : i64, tpu.core_type = #tpu.core_type<tc>, window_params = [{transform_indices = @transform_0, window_bounds = array<i64: 512, 76>}, {pipeline_mode = #tpu.pipeline_mode<synchronous>, transform_indices = @transform_1, window_bounds = array<i64: 76, 128>}, {transform_indices = @transform_2, window_bounds = array<i64: 512, 128>}, {transform_indices = @transform_3, window_bounds = array<i64: 1, 2, 128>}]} {
    %c0 = arith.constant 0 : index
    %c0_0 = arith.constant 0 : index
    %0 = vector.load %arg1[%c0, %c0_0] : memref<512x76xbf16, #tpu.memory_space<vmem>>, vector<512x76xbf16>
    %c0_1 = arith.constant 0 : index
    %c0_2 = arith.constant 0 : index
    %1 = vector.load %arg2[%c0_1, %c0_2] : memref<76x128xbf16, #tpu.memory_space<vmem>>, vector<76x128xbf16>
    %cst = arith.constant dense<0.000000e+00> : vector<512x128xf32>
    %2 = tpu.matmul %0, %1, %cst {dimension_numbers = #tpu.dot_dimension_numbers<[1], [0], [0], [1], [0, 0, 1, 1], [], []>} : vector<512x76xbf16>, vector<76x128xbf16>, vector<512x128xf32> -> vector<512x128xf32>
    %3 = arith.truncf %2 : vector<512x128xf32> to vector<512x128xbf16>
    %c0_3 = arith.constant 0 : index
    %c0_4 = arith.constant 0 : index
    %4 = vector.load %arg3[%c0_3, %c0_4] : memref<512x128xbf16, #tpu.memory_space<vmem>>, vector<512x128xbf16>
    tpu.vector_store %arg3[%c0_3, %c0_4], %3 {strides = array<i32>} : memref<512x128xbf16, #tpu.memory_space<vmem>>, vector<512x128xbf16>,
    %cst_5 = arith.constant dense<0.000000e+00> : vector<128xf32>
    %5 = vector.multi_reduction <add>, %2, %cst_5 [0] : vector<512x128xf32> to vector<128xf32>
    %6 = vector.shape_cast %5 : vector<128xf32> to vector<1x128xf32>
    %7 = arith.mulf %2, %2 : vector<512x128xf32>
    %cst_6 = arith.constant dense<0.000000e+00> : vector<128xf32>
    %8 = vector.multi_reduction <add>, %7, %cst_6 [0] : vector<512x128xf32> to vector<128xf32>
    %9 = vector.shape_cast %8 : vector<128xf32> to vector<1x128xf32>
    %10 = tpu.concatenate %6, %9 in 0 : vector<1x128xf32>, vector<1x128xf32> -> vector<2x128xf32>
    %11 = vector.shape_cast %10 : vector<2x128xf32> to vector<1x2x128xf32>
    %c0_7 = arith.constant 0 : index
    %c0_8 = arith.constant 0 : index
    %c0_9 = arith.constant 0 : index
    %12 = vector.load %arg4[%c0_7, %c0_8, %c0_9] : memref<1x2x128xf32, #tpu.memory_space<vmem>>, vector<1x2x128xf32>
    tpu.vector_store %arg4[%c0_7, %c0_8, %c0_9], %11 {strides = array<i32>} : memref<1x2x128xf32, #tpu.memory_space<vmem>>, vector<1x2x128xf32>,
    return
  }
  func.func @transform_0(%arg0: i32) -> (i32, i32) {
    %c0_i32 = arith.constant 0 : i32
    %c0_i32_0 = arith.constant 0 : i32
    return %arg0, %c0_i32 : i32, i32
  }
  func.func @transform_1(%arg0: i32) -> (i32, i32) {
    %c0_i32 = arith.constant 0 : i32
    %c0_i32_0 = arith.constant 0 : i32
    %c0_i32_1 = arith.constant 0 : i32
    return %c0_i32, %c0_i32_0 : i32, i32
  }
  func.func @transform_2(%arg0: i32) -> (i32, i32) {
    %c0_i32 = arith.constant 0 : i32
    %c0_i32_0 = arith.constant 0 : i32
    return %arg0, %c0_i32 : i32, i32
  }
  func.func @transform_3(%arg0: i32) -> (i32, i32, i32) {
    %c0_i32 = arith.constant 0 : i32
    %c0_i32_0 = arith.constant 0 : i32
    %c0_i32_1 = arith.constant 0 : i32
    return %arg0, %c0_i32, %c0_i32_0 : i32, i32, i32
  }
}

module attributes {stable_mosaic.version = 11 : i64} {
  func.func @bn_add_relu_kernel(%arg0: i32, %arg1: memref<512x128xbf16, #tpu.memory_space<vmem>>, %arg2: memref<1x2x128xf32, #tpu.memory_space<vmem>>, %arg3: memref<2x128xf32, #tpu.memory_space<vmem>>, %arg4: memref<128x128xf32, #tpu.memory_space<vmem>>, %arg5: memref<512x128xf32, #tpu.memory_space<vmem>>) attributes {dimension_semantics = [#tpu.dimension_semantics<parallel>], iteration_bounds = array<i64: 1>, scalar_prefetch = 0 : i64, scratch_operands = 0 : i64, tpu.core_type = #tpu.core_type<tc>, window_params = [{transform_indices = @transform_0, window_bounds = array<i64: 512, 128>}, {pipeline_mode = #tpu.pipeline_mode<synchronous>, transform_indices = @transform_1, window_bounds = array<i64: 1, 2, 128>}, {pipeline_mode = #tpu.pipeline_mode<synchronous>, transform_indices = @transform_2, window_bounds = array<i64: 2, 128>}, {pipeline_mode = #tpu.pipeline_mode<synchronous>, transform_indices = @transform_3, window_bounds = array<i64: 128, 128>}, {transform_indices = @transform_4, window_bounds = array<i64: 512, 128>}]} {
    %c0 = arith.constant 0 : index
    %c0_0 = arith.constant 0 : index
    %c0_1 = arith.constant 0 : index
    %0 = vector.load %arg2[%c0, %c0_0, %c0_1] : memref<1x2x128xf32, #tpu.memory_space<vmem>>, vector<1x2x128xf32>
    %c0_2 = arith.constant 0 : index
    %c0_3 = arith.constant 0 : index
    %1 = vector.load %arg3[%c0_2, %c0_3] : memref<2x128xf32, #tpu.memory_space<vmem>>, vector<2x128xf32>
    %cst = arith.constant dense<0.000000e+00> : vector<2x128xf32>
    %2 = vector.multi_reduction <add>, %0, %cst [0] : vector<1x2x128xf32> to vector<2x128xf32>
    %3 = vector.extract_strided_slice %2 {offsets = [0, 0], sizes = [1, 128], strides = [1, 1]} : vector<2x128xf32> to vector<1x128xf32>
    %cst_4 = arith.constant 0.001953125 : f32
    %4 = vector.broadcast %cst_4 : f32 to vector<1x128xf32>
    %5 = arith.mulf %3, %4 : vector<1x128xf32>
    %6 = vector.extract_strided_slice %2 {offsets = [1, 0], sizes = [1, 128], strides = [1, 1]} : vector<2x128xf32> to vector<1x128xf32>
    %cst_5 = arith.constant 0.001953125 : f32
    %7 = vector.broadcast %cst_5 : f32 to vector<1x128xf32>
    %8 = arith.mulf %6, %7 : vector<1x128xf32>
    %9 = arith.mulf %5, %5 : vector<1x128xf32>
    %10 = arith.subf %8, %9 : vector<1x128xf32>
    %11 = vector.extract_strided_slice %1 {offsets = [0, 0], sizes = [1, 128], strides = [1, 1]} : vector<2x128xf32> to vector<1x128xf32>
    %cst_6 = arith.constant 9.99999974E-6 : f32
    %12 = vector.broadcast %cst_6 : f32 to vector<1x128xf32>
    %13 = arith.addf %10, %12 : vector<1x128xf32>
    %14 = math.rsqrt %13 : vector<1x128xf32>
    %15 = arith.mulf %11, %14 : vector<1x128xf32>
    %16 = vector.extract_strided_slice %1 {offsets = [1, 0], sizes = [1, 128], strides = [1, 1]} : vector<2x128xf32> to vector<1x128xf32>
    %17 = arith.mulf %5, %15 : vector<1x128xf32>
    %18 = arith.subf %16, %17 : vector<1x128xf32>
    %c0_7 = arith.constant 0 : index
    %c0_8 = arith.constant 0 : index
    %19 = vector.load %arg1[%c0_7, %c0_8] : memref<512x128xbf16, #tpu.memory_space<vmem>>, vector<512x128xbf16>
    %20 = arith.extf %19 : vector<512x128xbf16> to vector<512x128xf32>
    %21 = vector.broadcast %15 : vector<1x128xf32> to vector<512x128xf32>
    %22 = arith.mulf %20, %21 : vector<512x128xf32>
    %23 = vector.broadcast %18 : vector<1x128xf32> to vector<512x128xf32>
    %24 = arith.addf %22, %23 : vector<512x128xf32>
    %c0_9 = arith.constant 0 : index
    %c0_10 = arith.constant 0 : index
    %25 = vector.load %arg4[%c0_9, %c0_10] : memref<128x128xf32, #tpu.memory_space<vmem>>, vector<128x128xf32>
    %cst_11 = arith.constant dense<0.000000e+00> : vector<512x128xf32>
    %26 = tpu.matmul %24, %25, %cst_11 {dimension_numbers = #tpu.dot_dimension_numbers<[1], [0], [0], [1], [0, 0, 1, 1], [], []>} : vector<512x128xf32>, vector<128x128xf32>, vector<512x128xf32> -> vector<512x128xf32>
    %cst_12 = arith.constant 0.000000e+00 : f32
    %27 = vector.broadcast %cst_12 : f32 to vector<512x128xf32>
    %28 = arith.maximumf %26, %27 : vector<512x128xf32>
    %c0_13 = arith.constant 0 : index
    %c0_14 = arith.constant 0 : index
    %29 = vector.load %arg5[%c0_13, %c0_14] : memref<512x128xf32, #tpu.memory_space<vmem>>, vector<512x128xf32>
    tpu.vector_store %arg5[%c0_13, %c0_14], %28 {strides = array<i32>} : memref<512x128xf32, #tpu.memory_space<vmem>>, vector<512x128xf32>,
    return
  }
  func.func @transform_0(%arg0: i32) -> (i32, i32) {
    %c0_i32 = arith.constant 0 : i32
    %c0_i32_0 = arith.constant 0 : i32
    return %arg0, %c0_i32 : i32, i32
  }
  func.func @transform_1(%arg0: i32) -> (i32, i32, i32) {
    %c0_i32 = arith.constant 0 : i32
    %c0_i32_0 = arith.constant 0 : i32
    %c0_i32_1 = arith.constant 0 : i32
    %c0_i32_2 = arith.constant 0 : i32
    return %c0_i32, %c0_i32_0, %c0_i32_1 : i32, i32, i32
  }
  func.func @transform_2(%arg0: i32) -> (i32, i32) {
    %c0_i32 = arith.constant 0 : i32
    %c0_i32_0 = arith.constant 0 : i32
    %c0_i32_1 = arith.constant 0 : i32
    return %c0_i32, %c0_i32_0 : i32, i32
  }
  func.func @transform_3(%arg0: i32) -> (i32, i32) {
    %c0_i32 = arith.constant 0 : i32
    %c0_i32_0 = arith.constant 0 : i32
    %c0_i32_1 = arith.constant 0 : i32
    return %c0_i32, %c0_i32_0 : i32, i32
  }
  func.func @transform_4(%arg0: i32) -> (i32, i32) {
    %c0_i32 = arith.constant 0 : i32
    %c0_i32_0 = arith.constant 0 : i32
    return %arg0, %c0_i32 : i32, i32
  }
}

</mosaic_0001>

<bundles_post_ra>
// kernel: basic_block_forward.5
= control target key start
LH: loop header
LB: loop body
LE: loop exit
PB: predicated region body
PF: predicated region fallthrough
CT: control target
= control target key end

     0   :  { %v162_v3 = vlaneseq  ;;  %s1786_s1 = inlined_call_operand.vmem [shape: f32[1,2,128], index: 1, kind: input, shape index: {}]   ;;  %s1787_s0 = inlined_call_operand.vmem [shape: bf16[512,128], index: 0, kind: input, shape index: {}]   ;;  %s1788_s2 = inlined_call_operand.vmem [shape: f32[2,128], index: 2, kind: input, shape index: {}]   ;;  %s1789_s3 = inlined_call_operand.vmem [shape: bf16[512,128], index: 3, kind: output, shape index: {}]  }
   0x1   :  { %v14_v0 = vld [vmem:[%s1786_s1] sm:$0x3]  ;;  %v1202_v7 = vld [vmem:[%s1787_s0 + $0x8] sm:$0xff]   ;;  %v1209_v9 = vld [vmem:[%s1787_s0 + $0x10] sm:$0xff]  }
   0x2   :  { %v1189_v1 = vmul.f32 0.001953125, %v14_v0  ;;  %v1197_v6 = vld [vmem:[%s1787_s0] sm:$0xff]   ;;  %v1204_v8 = vshrl.u32 %v162_v3, 7  ;;  %v1214_v11 = vld [vmem:[%s1787_s0 + $0x18] sm:$0xff]   ;;  %v820_v14 = vunpack.c.l.bf16 %v1202_v7  ;;  %v1227_v16 = vld [vmem:[%s1787_s0 + $0x28] sm:$0xff]   ;;  %v821_v17 = vunpack.c.h.bf16 %v1202_v7 }
   0x3   :  { %v816_v12 = vunpack.c.l.bf16 %v1197_v6  ;;  %v817_v13 = vunpack.c.h.bf16 %v1197_v6  ;;  %v1222_v15 = vld [vmem:[%s1787_s0 + $0x20] sm:$0xff]   ;;  %v824_v18 = vunpack.c.l.bf16 %v1209_v9  ;;  %v825_v19 = vunpack.c.h.bf16 %v1209_v9  ;;  %v1235_v20 = vld [vmem:[%s1787_s0 + $0x30] sm:$0xff]   ;;  %v1240_v21 = vld [vmem:[%s1787_s0 + $0x38] sm:$0xff]  }
   0x4   :  { %v18_v2 = vmul.f32 %v1189_v1, %v1189_v1  ;;  %v164_v22 = vsub.s32 0, %v1204_v8  ;;  %v232_v23 = vsub.s32 1, %v1204_v8  ;;  %v828_v24 = vunpack.c.l.bf16 %v1214_v11  ;;  %v1249_v26 = vld [vmem:[%s1787_s0 + $0x40] sm:$0xff]   ;;  %v1254_v27 = vld [vmem:[%s1787_s0 + $0x48] sm:$0xff]   ;;  %v1263_v32 = vld [vmem:[%s1787_s0 + $0x50] sm:$0xff]  }
   0x5   :  { %v829_v25 = vunpack.c.h.bf16 %v1214_v11  ;;  %v832_v28 = vunpack.c.l.bf16 %v1222_v15  ;;  %v833_v29 = vunpack.c.h.bf16 %v1222_v15  ;;  %v836_v30 = vunpack.c.l.bf16 %v1227_v16  ;;  %v1268_v33 = vld [vmem:[%s1787_s0 + $0x58] sm:$0xff]   ;;  %v1277_v38 = vld [vmem:[%s1787_s0 + $0x60] sm:$0xff]   ;;  %v1282_v39 = vld [vmem:[%s1787_s0 + $0x68] sm:$0xff]  }
   0x6   :  { %v20_v4 = vrot.slane %v18_v2, 7  ;;  %v837_v31 = vunpack.c.h.bf16 %v1227_v16  ;;  %v840_v34 = vunpack.c.l.bf16 %v1235_v20  ;;  %v841_v35 = vunpack.c.h.bf16 %v1235_v20  ;;  %v1291_v44 = vld [vmem:[%s1787_s0 + $0x70] sm:$0xff]   ;;  %v1296_v45 = vld [vmem:[%s1787_s0 + $0x78] sm:$0xff]   ;;  %v1305_v50 = vld [vmem:[%s1787_s0 + $0x80] sm:$0xff]  }
   0x7   :  { %v844_v36 = vunpack.c.l.bf16 %v1240_v21  ;;  %v845_v37 = vunpack.c.h.bf16 %v1240_v21  ;;  %v1310_v51 = vld [vmem:[%s1787_s0 + $0x88] sm:$0xff]   ;;  %v1319_v56 = vld [vmem:[%s1787_s0 + $0x90] sm:$0xff]   ;;  %v1324_v57 = vld [vmem:[%s1787_s0 + $0x98] sm:$0xff]   ;;  %v1791_v20 = vunpack.c.h.bf16 %v1249_v26  ;;  %v1792_v8 = vunpack.c.l.bf16 %v1254_v27 }
   0x8   :  { %v22_v5 = vsub.f32 %v1189_v1, %v20_v4  ;;  %v1333_v62 = vld [vmem:[%s1787_s0 + $0xa0] sm:$0xff]   ;;  %v1338_v63 = vld [vmem:[%s1787_s0 + $0xa8] sm:$0xff]   ;;  %v1378_v55 = vld [vmem:[%s1787_s0 + $0xd0] sm:$0xff]   ;;  %v1794_v21 = vunpack.c.l.bf16 %v1263_v32 }
   0x9   :  { %v1361_v4 = vld [vmem:[%s1787_s0 + $0xc0] sm:$0xff]   ;;  %v1366_v60 = vld [vmem:[%s1787_s0 + $0xc8] sm:$0xff]   ;;  %v1386_v2 = vld [vmem:[%s1787_s0 + $0xd8] sm:$0xff]  }
   0xa   :  { %v23_v10 = vadd.f32 1e-05, %v22_v5  ;;  %v1347_v5 = vld [vmem:[%s1787_s0 + $0xb0] sm:$0xff]   ;;  %v15_v61 = vld [vmem:[%s1788_s2] sm:$0x3]  ;;  %v1400_v49 = vld [vmem:[%s1787_s0 + $0xe8] sm:$0xff]  }
   0xb   :  { %v1391_v58 = vld [vmem:[%s1787_s0 + $0xe0] sm:$0xff]   ;;  %v1413_v52 = vld [vmem:[%s1787_s0 + $0xf8] sm:$0xff]   ;;  %v932_v43 = vunpack.c.l.bf16 %v1400_v49  ;;  %v933_v42 = vunpack.c.h.bf16 %v1400_v49 }
   0xc   :  { %1164 = vrsqrt.f32 %v23_v10  ;;  %v1352_v10 = vld [vmem:[%s1787_s0 + $0xb8] sm:$0xff]   ;;  %v929_v47 = vunpack.c.h.bf16 %v1391_v58 }
  0x16   :  { %v1165_v59 = vpop.eup %1164 }
  0x17   :  { %v26_v54 = vrot.slane %v1165_v59, 1  ;;  %v1408_v59 = vld [vmem:[%s1787_s0 + $0xf0] sm:$0xff]  }
  0x19   :  { %v28_v0 = vmul.f32 %v26_v54, %v15_v61 }
  0x1b   :  { %v29_v46 = vmul.f32 %v28_v0, %v1189_v1  ;;  %v1422_v3 = vrot.slane %v28_v0, %v164_v22 }
  0x1d   :  { %v31_v40 = vrot.slane %v29_v46, 7  ;;  %v166_v1 = vmul.f32 %v816_v12, %v1422_v3  ;;  %v167_v22 = vmul.f32 %v817_v13, %v1422_v3  ;;  %v168_v0 = vmul.f32 %v820_v14, %v1422_v3 }
  0x1e   :  { %v169_v53 = vmul.f32 %v821_v17, %v1422_v3  ;;  %v170_v46 = vmul.f32 %v824_v18, %v1422_v3  ;;  %v171_v12 = vmul.f32 %v825_v19, %v1422_v3  ;;  %v172_v6 = vmul.f32 %v828_v24, %v1422_v3 }
  0x1f   :  { %v33_v13 = vsub.f32 %v15_v61, %v31_v40  ;;  %v173_v14 = vmul.f32 %v829_v25, %v1422_v3  ;;  %v174_v7 = vmul.f32 %v832_v28, %v1422_v3  ;;  %v175_v17 = vmul.f32 %v833_v29, %v1422_v3 }
  0x20   :  { %v176_v9 = vmul.f32 %v836_v30, %v1422_v3  ;;  %v177_v18 = vmul.f32 %v837_v31, %v1422_v3  ;;  %v178_v11 = vmul.f32 %v840_v34, %v1422_v3  ;;  %v179_v19 = vmul.f32 %v841_v35, %v1422_v3 }
  0x21   :  { %v1474_v15 = vrot.slane %v33_v13, %v232_v23  ;;  %v180_v24 = vmul.f32 %v844_v36, %v1422_v3  ;;  %v181_v16 = vmul.f32 %v845_v37, %v1422_v3  ;;  %v1790_v25 = vunpack.c.l.bf16 %v1249_v26 }
  0x22   :  { %v183_v29 = vmul.f32 %v1791_v20, %v1422_v3  ;;  %v184_v23 = vmul.f32 %v1792_v8, %v1422_v3  ;;  %v1793_v30 = vunpack.c.h.bf16 %v1254_v27  ;;  %v186_v34 = vmul.f32 %v1794_v21, %v1422_v3 }
  0x23   :  { %v182_v28 = vmul.f32 %v1790_v25, %v1422_v3  ;;  %v234_v35 = vadd.f32 %v1474_v15, %v166_v1  ;;  %v235_v36 = vadd.f32 %v1474_v15, %v167_v22  ;;  %v236_v37 = vadd.f32 %v1474_v15, %v168_v0 }
  0x24   :  { %v185_v31 = vmul.f32 %v1793_v30, %v1422_v3  ;;  %v237_v26 = vadd.f32 %v1474_v15, %v169_v53  ;;  %v238_v40 = vadd.f32 %v1474_v15, %v170_v46  ;;  %v239_v61 = vadd.f32 %v1474_v15, %v171_v12 }
  0x25   :  { %v240_v13 = vadd.f32 %v1474_v15, %v172_v6  ;;  %v241_v27 = vadd.f32 %v1474_v15, %v173_v14  ;;  %v298_v25 = vmax.f32 %v234_v35, 0.0  ;;  %v299_v20 = vmax.f32 %v235_v36, 0.0 }
  0x26   :  { %v300_v8 = vmax.f32 %v236_v37, 0.0  ;;  %v301_v30 = vmax.f32 %v237_v26, 0.0  ;;  %v302_v21 = vmax.f32 %v238_v40, 0.0  ;;  %v303_v1 = vmax.f32 %v239_v61, 0.0 }
  0x27   :  { %v304_v48 = vmax.f32 %v240_v13, 0.0  ;;  %v305_v22 = vmax.f32 %v241_v27, 0.0  ;;  %v945_v54 = vpack.c.bf16 %v299_v20, %v298_v25  ;;  %v242_v53 = vadd.f32 %v1474_v15, %v174_v7 }
  0x28   :  { %v950_v0 = vpack.c.bf16 %v301_v30, %v300_v8  ;;  %v243_v46 = vadd.f32 %v1474_v15, %v175_v17  ;;  %v955_v41 = vpack.c.bf16 %v303_v1, %v302_v21  ;;  %v244_v6 = vadd.f32 %v1474_v15, %v176_v9 }
  0x29   :  { %v960_v12 = vpack.c.bf16 %v305_v22, %v304_v48  ;;  %v245_v14 = vadd.f32 %v1474_v15, %v177_v18  ;;  %946 = vst [vmem:[%s1789_s3] sm:$0xff] %v945_v54   ;;  %v306_v35 = vmax.f32 %v242_v53, 0.0  ;;  %v246_v7 = vadd.f32 %v1474_v15, %v178_v11 }
  0x2a   :  { %1133 = vst [vmem:[%s1789_s3 + $0x8] sm:$0xff] %v950_v0   ;;  %v307_v36 = vmax.f32 %v243_v46, 0.0  ;;  %v247_v17 = vadd.f32 %v1474_v15, %v179_v19  ;;  %1134 = vst [vmem:[%s1789_s3 + $0x10] sm:$0xff] %v955_v41   ;;  %v308_v48 = vmax.f32 %v244_v6, 0.0  ;;  %v248_v9 = vadd.f32 %v1474_v15, %v180_v24 }
  0x2b   :  { %1135 = vst [vmem:[%s1789_s3 + $0x18] sm:$0xff] %v960_v12   ;;  %v309_v54 = vmax.f32 %v245_v14, 0.0  ;;  %v249_v18 = vadd.f32 %v1474_v15, %v181_v16  ;;  %v310_v26 = vmax.f32 %v246_v7, 0.0  ;;  %v250_v11 = vadd.f32 %v1474_v15, %v182_v28 }
  0x2c   :  { %v965_v37 = vpack.c.bf16 %v307_v36, %v306_v35  ;;  %v311_v40 = vmax.f32 %v247_v17, 0.0  ;;  %v312_v61 = vmax.f32 %v248_v9, 0.0  ;;  %v251_v41 = vadd.f32 %v1474_v15, %v183_v29 }
  0x2d   :  { %v970_v19 = vpack.c.bf16 %v309_v54, %v308_v48  ;;  %v313_v13 = vmax.f32 %v249_v18, 0.0  ;;  %v314_v25 = vmax.f32 %v250_v11, 0.0  ;;  %v252_v24 = vadd.f32 %v1474_v15, %v184_v23 }
  0x2e   :  { %1136 = vst [vmem:[%s1789_s3 + $0x20] sm:$0xff] %v965_v37   ;;  %v975_v27 = vpack.c.bf16 %v311_v40, %v310_v26  ;;  %v253_v16 = vadd.f32 %v1474_v15, %v185_v31  ;;  %v315_v20 = vmax.f32 %v251_v41, 0.0  ;;  %v1795_v8 = vunpack.c.h.bf16 %v1263_v32 }
  0x2f   :  { %1137 = vst [vmem:[%s1789_s3 + $0x28] sm:$0xff] %v970_v19   ;;  %v980_v28 = vpack.c.bf16 %v313_v13, %v312_v61  ;;  %v254_v30 = vadd.f32 %v1474_v15, %v186_v34  ;;  %v316_v21 = vmax.f32 %v252_v24, 0.0  ;;  %v1796_v31 = vunpack.c.l.bf16 %v1268_v33 }
  0x30   :  { %v187_v29 = vmul.f32 %v1795_v8, %v1422_v3  ;;  %1138 = vst [vmem:[%s1789_s3 + $0x30] sm:$0xff] %v975_v27   ;;  %v317_v23 = vmax.f32 %v253_v16, 0.0  ;;  %v1797_v22 = vunpack.c.h.bf16 %v1268_v33  ;;  %v985_v32 = vpack.c.bf16 %v315_v20, %v314_v25 }
  0x31   :  { %v188_v1 = vmul.f32 %v1796_v31, %v1422_v3  ;;  %1139 = vst [vmem:[%s1789_s3 + $0x38] sm:$0xff] %v980_v28   ;;  %v318_v53 = vmax.f32 %v254_v30, 0.0  ;;  %v1798_v46 = vunpack.c.l.bf16 %v1277_v38  ;;  %v1799_v33 = vunpack.c.h.bf16 %v1277_v38 }
  0x32   :  { %v189_v0 = vmul.f32 %v1797_v22, %v1422_v3  ;;  %v255_v34 = vadd.f32 %v1474_v15, %v187_v29  ;;  %v990_v6 = vpack.c.bf16 %v317_v23, %v316_v21  ;;  %1140 = vst [vmem:[%s1789_s3 + $0x40] sm:$0xff] %v985_v32   ;;  %v1800_v48 = vunpack.c.l.bf16 %v1282_v39 }
  0x33   :  { %v190_v12 = vmul.f32 %v1798_v46, %v1422_v3  ;;  %v256_v14 = vadd.f32 %v1474_v15, %v188_v1  ;;  %v191_v36 = vmul.f32 %v1799_v33, %v1422_v3  ;;  %v1801_v9 = vunpack.c.h.bf16 %v1282_v39 }
  0x34   :  { %v257_v35 = vadd.f32 %v1474_v15, %v189_v0  ;;  %v319_v7 = vmax.f32 %v255_v34, 0.0  ;;  %v192_v54 = vmul.f32 %v1800_v48, %v1422_v3  ;;  %1141 = vst [vmem:[%s1789_s3 + $0x48] sm:$0xff] %v990_v6   ;;  %v1802_v40 = vunpack.c.l.bf16 %v1291_v44 }
  0x35   :  { %v258_v17 = vadd.f32 %v1474_v15, %v190_v12  ;;  %v193_v18 = vmul.f32 %v1801_v9, %v1422_v3  ;;  %v320_v38 = vmax.f32 %v256_v14, 0.0  ;;  %v259_v26 = vadd.f32 %v1474_v15, %v191_v36 }
  0x36   :  { %v321_v37 = vmax.f32 %v257_v35, 0.0  ;;  %v194_v11 = vmul.f32 %v1802_v40, %v1422_v3  ;;  %v995_v19 = vpack.c.bf16 %v319_v7, %v318_v53  ;;  %v260_v13 = vadd.f32 %v1474_v15, %v192_v54 }
  0x37   :  { %v322_v61 = vmax.f32 %v258_v17, 0.0  ;;  %v261_v41 = vadd.f32 %v1474_v15, %v193_v18  ;;  %v323_v27 = vmax.f32 %v259_v26, 0.0  ;;  %v1803_v25 = vunpack.c.h.bf16 %v1291_v44 }
  0x38   :  { %v1000_v39 = vpack.c.bf16 %v321_v37, %v320_v38  ;;  %v262_v16 = vadd.f32 %v1474_v15, %v194_v11  ;;  %1142 = vst [vmem:[%s1789_s3 + $0x50] sm:$0xff] %v995_v19   ;;  %v324_v28 = vmax.f32 %v260_v13, 0.0  ;;  %v1804_v8 = vunpack.c.l.bf16 %v1296_v45 }
  0x39   :  { %v195_v24 = vmul.f32 %v1803_v25, %v1422_v3  ;;  %v325_v20 = vmax.f32 %v261_v41, 0.0  ;;  %v1805_v30 = vunpack.c.h.bf16 %v1296_v45  ;;  %v1005_v44 = vpack.c.bf16 %v323_v27, %v322_v61 }
  0x3a   :  { %v196_v29 = vmul.f32 %v1804_v8, %v1422_v3  ;;  %1143 = vst [vmem:[%s1789_s3 + $0x58] sm:$0xff] %v1000_v39   ;;  %v326_v31 = vmax.f32 %v262_v16, 0.0  ;;  %v1806_v1 = vunpack.c.l.bf16 %v1305_v50  ;;  %v1807_v45 = vunpack.c.h.bf16 %v1305_v50 }
  0x3b   :  { %v197_v21 = vmul.f32 %v1805_v30, %v1422_v3  ;;  %v263_v23 = vadd.f32 %v1474_v15, %v195_v24  ;;  %v1010_v0 = vpack.c.bf16 %v325_v20, %v324_v28  ;;  %1144 = vst [vmem:[%s1789_s3 + $0x60] sm:$0xff] %v1005_v44   ;;  %v1808_v6 = vunpack.c.l.bf16 %v1310_v51 }
  0x3c   :  { %v198_v22 = vmul.f32 %v1806_v1, %v1422_v3  ;;  %v264_v32 = vadd.f32 %v1474_v15, %v196_v29  ;;  %v199_v53 = vmul.f32 %v1807_v45, %v1422_v3  ;;  %v1809_v35 = vunpack.c.h.bf16 %v1310_v51 }
  0x3d   :  { %v265_v34 = vadd.f32 %v1474_v15, %v197_v21  ;;  %v327_v46 = vmax.f32 %v263_v23, 0.0  ;;  %v200_v14 = vmul.f32 %v1808_v6, %v1422_v3  ;;  %1145 = vst [vmem:[%s1789_s3 + $0x68] sm:$0xff] %v1010_v0   ;;  %v1810_v17 = vunpack.c.l.bf16 %v1319_v56 }
  0x3e   :  { %v266_v12 = vadd.f32 %v1474_v15, %v198_v22  ;;  %v201_v33 = vmul.f32 %v1809_v35, %v1422_v3  ;;  %v328_v50 = vmax.f32 %v264_v32, 0.0  ;;  %v267_v7 = vadd.f32 %v1474_v15, %v199_v53 }
  0x3f   :  { %v329_v36 = vmax.f32 %v265_v34, 0.0  ;;  %v202_v48 = vmul.f32 %v1810_v17, %v1422_v3  ;;  %v1015_v54 = vpack.c.bf16 %v327_v46, %v326_v31  ;;  %v268_v18 = vadd.f32 %v1474_v15, %v200_v14 }
  0x40   :  { %v330_v9 = vmax.f32 %v266_v12, 0.0  ;;  %v269_v38 = vadd.f32 %v1474_v15, %v201_v33  ;;  %v331_v37 = vmax.f32 %v267_v7, 0.0  ;;  %v1811_v26 = vunpack.c.h.bf16 %v1319_v56 }
  0x41   :  { %v1020_v51 = vpack.c.bf16 %v329_v36, %v328_v50  ;;  %v270_v11 = vadd.f32 %v1474_v15, %v202_v48  ;;  %1146 = vst [vmem:[%s1789_s3 + $0x70] sm:$0xff] %v1015_v54   ;;  %v332_v19 = vmax.f32 %v268_v18, 0.0  ;;  %v1812_v13 = vunpack.c.l.bf16 %v1324_v57 }
  0x42   :  { %v203_v40 = vmul.f32 %v1811_v26, %v1422_v3  ;;  %v333_v61 = vmax.f32 %v269_v38, 0.0  ;;  %v1813_v39 = vunpack.c.h.bf16 %v1324_v57  ;;  %v1025_v56 = vpack.c.bf16 %v331_v37, %v330_v9 }
  0x43   :  { %v204_v41 = vmul.f32 %v1812_v13, %v1422_v3  ;;  %1147 = vst [vmem:[%s1789_s3 + $0x78] sm:$0xff] %v1020_v51   ;;  %v334_v24 = vmax.f32 %v270_v11, 0.0  ;;  %v1814_v16 = vunpack.c.l.bf16 %v1333_v62  ;;  %v1815_v57 = vunpack.c.h.bf16 %v1333_v62 }
  0x44   :  { %v205_v27 = vmul.f32 %v1813_v39, %v1422_v3  ;;  %v271_v25 = vadd.f32 %v1474_v15, %v203_v40  ;;  %v1030_v20 = vpack.c.bf16 %v333_v61, %v332_v19  ;;  %1148 = vst [vmem:[%s1789_s3 + $0x80] sm:$0xff] %v1025_v56   ;;  %v1816_v23 = vunpack.c.l.bf16 %v1338_v63 }
  0x45   :  { %v206_v28 = vmul.f32 %v1814_v16, %v1422_v3  ;;  %v272_v8 = vadd.f32 %v1474_v15, %v204_v41  ;;  %v207_v30 = vmul.f32 %v1815_v57, %v1422_v3  ;;  %v1817_v1 = vunpack.c.h.bf16 %v1338_v63 }
  0x46   :  { %v273_v29 = vadd.f32 %v1474_v15, %v205_v27  ;;  %v335_v21 = vmax.f32 %v271_v25, 0.0  ;;  %v208_v31 = vmul.f32 %v1816_v23, %v1422_v3  ;;  %1149 = vst [vmem:[%s1789_s3 + $0x88] sm:$0xff] %v1030_v20   ;;  %v1818_v34 = vunpack.c.l.bf16 %v1347_v5 }
  0x47   :  { %v274_v44 = vadd.f32 %v1474_v15, %v206_v28  ;;  %v209_v22 = vmul.f32 %v1817_v1, %v1422_v3  ;;  %v336_v62 = vmax.f32 %v272_v8, 0.0  ;;  %v275_v32 = vadd.f32 %v1474_v15, %v207_v30 }
  0x48   :  { %v337_v0 = vmax.f32 %v273_v29, 0.0  ;;  %v210_v45 = vmul.f32 %v1818_v34, %v1422_v3  ;;  %v1035_v53 = vpack.c.bf16 %v335_v21, %v334_v24  ;;  %v276_v12 = vadd.f32 %v1474_v15, %v208_v31 }
  0x49   :  { %v338_v46 = vmax.f32 %v274_v44, 0.0  ;;  %v277_v6 = vadd.f32 %v1474_v15, %v209_v22  ;;  %v339_v14 = vmax.f32 %v275_v32, 0.0  ;;  %v1819_v35 = vunpack.c.h.bf16 %v1347_v5 }
  0x4a   :  { %v1040_v63 = vpack.c.bf16 %v337_v0, %v336_v62  ;;  %v278_v50 = vadd.f32 %v1474_v15, %v210_v45  ;;  %1150 = vst [vmem:[%s1789_s3 + $0x90] sm:$0xff] %v1035_v53   ;;  %v340_v36 = vmax.f32 %v276_v12, 0.0  ;;  %v1820_v17 = vunpack.c.l.bf16 %v1352_v10 }
  0x4b   :  { %v211_v33 = vmul.f32 %v1819_v35, %v1422_v3  ;;  %v341_v7 = vmax.f32 %v277_v6, 0.0  ;;  %v1821_v54 = vunpack.c.h.bf16 %v1352_v10  ;;  %v1045_v5 = vpack.c.bf16 %v339_v14, %v338_v46 }
  0x4c   :  { %v212_v48 = vmul.f32 %v1820_v17, %v1422_v3  ;;  %1151 = vst [vmem:[%s1789_s3 + $0x98] sm:$0xff] %v1040_v63   ;;  %v342_v38 = vmax.f32 %v278_v50, 0.0  ;;  %v1822_v51 = vunpack.c.l.bf16 %v1361_v4  ;;  %v1823_v10 = vunpack.c.h.bf16 %v1361_v4 }
  0x4d   :  { %v213_v9 = vmul.f32 %v1821_v54, %v1422_v3  ;;  %v279_v18 = vadd.f32 %v1474_v15, %v211_v33  ;;  %v1050_v26 = vpack.c.bf16 %v341_v7, %v340_v36  ;;  %1152 = vst [vmem:[%s1789_s3 + $0xa0] sm:$0xff] %v1045_v5   ;;  %v1824_v41 = vunpack.c.l.bf16 %v1366_v60 }
  0x4e   :  { %v214_v37 = vmul.f32 %v1822_v51, %v1422_v3  ;;  %v280_v40 = vadd.f32 %v1474_v15, %v212_v48  ;;  %v215_v19 = vmul.f32 %v1823_v10, %v1422_v3  ;;  %v1825_v27 = vunpack.c.h.bf16 %v1366_v60 }
  0x4f   :  { %v281_v11 = vadd.f32 %v1474_v15, %v213_v9  ;;  %v343_v61 = vmax.f32 %v279_v18, 0.0  ;;  %v216_v39 = vmul.f32 %v1824_v41, %v1422_v3  ;;  %1153 = vst [vmem:[%s1789_s3 + $0xa8] sm:$0xff] %v1050_v26   ;;  %v1826_v16 = vunpack.c.l.bf16 %v1378_v55 }
  0x50   :  { %v282_v13 = vadd.f32 %v1474_v15, %v214_v37  ;;  %v217_v56 = vmul.f32 %v1825_v27, %v1422_v3  ;;  %v344_v4 = vmax.f32 %v280_v40, 0.0  ;;  %v283_v24 = vadd.f32 %v1474_v15, %v215_v19 }
  0x51   :  { %v345_v25 = vmax.f32 %v281_v11, 0.0  ;;  %v218_v28 = vmul.f32 %v1826_v16, %v1422_v3  ;;  %v1055_v20 = vpack.c.bf16 %v343_v61, %v342_v38  ;;  %v284_v29 = vadd.f32 %v1474_v15, %v216_v39 }
  0x52   :  { %v346_v8 = vmax.f32 %v282_v13, 0.0  ;;  %v285_v57 = vadd.f32 %v1474_v15, %v217_v56  ;;  %v347_v30 = vmax.f32 %v283_v24, 0.0  ;;  %v1827_v21 = vunpack.c.h.bf16 %v1378_v55 }
  0x53   :  { %v1060_v60 = vpack.c.bf16 %v345_v25, %v344_v4  ;;  %v286_v23 = vadd.f32 %v1474_v15, %v218_v28  ;;  %1154 = vst [vmem:[%s1789_s3 + $0xb0] sm:$0xff] %v1055_v20   ;;  %v348_v31 = vmax.f32 %v284_v29, 0.0  ;;  %v1828_v22 = vunpack.c.l.bf16 %v1386_v2 }
  0x54   :  { %v219_v44 = vmul.f32 %v1827_v21, %v1422_v3  ;;  %v349_v1 = vmax.f32 %v285_v57, 0.0  ;;  %v1829_v0 = vunpack.c.h.bf16 %v1386_v2  ;;  %v1065_v55 = vpack.c.bf16 %v347_v30, %v346_v8 }
  0x55   :  { %v220_v62 = vmul.f32 %v1828_v22, %v1422_v3  ;;  %1155 = vst [vmem:[%s1789_s3 + $0xb8] sm:$0xff] %v1060_v60   ;;  %v350_v45 = vmax.f32 %v286_v23, 0.0  ;;  %v1830_v53 = vunpack.c.l.bf16 %v1391_v58  ;;  %v223_v2 = vmul.f32 %v929_v47, %v1422_v3 }
  0x56   :  { %v221_v32 = vmul.f32 %v1829_v0, %v1422_v3  ;;  %v287_v34 = vadd.f32 %v1474_v15, %v219_v44  ;;  %v1070_v12 = vpack.c.bf16 %v349_v1, %v348_v31  ;;  %1156 = vst [vmem:[%s1789_s3 + $0xc0] sm:$0xff] %v1065_v55   ;;  %v224_v33 = vmul.f32 %v932_v43, %v1422_v3 }
  0x57   :  { %v222_v46 = vmul.f32 %v1830_v53, %v1422_v3  ;;  %v288_v6 = vadd.f32 %v1474_v15, %v220_v62  ;;  %v225_v50 = vmul.f32 %v933_v42, %v1422_v3  ;;  %v291_v36 = vadd.f32 %v1474_v15, %v223_v2 }
  0x58   :  { %v289_v63 = vadd.f32 %v1474_v15, %v221_v32  ;;  %v351_v14 = vmax.f32 %v287_v34, 0.0  ;;  %1157 = vst [vmem:[%s1789_s3 + $0xc8] sm:$0xff] %v1070_v12   ;;  %v1831_v7 = vunpack.c.l.bf16 %v1408_v59  ;;  %v292_v43 = vadd.f32 %v1474_v15, %v224_v33 }
  0x59   :  { %v290_v35 = vadd.f32 %v1474_v15, %v222_v46  ;;  %v352_v47 = vmax.f32 %v288_v6, 0.0  ;;  %v293_v9 = vadd.f32 %v1474_v15, %v225_v50  ;;  %v355_v42 = vmax.f32 %v291_v36, 0.0 }
  0x5a   :  { %v353_v58 = vmax.f32 %v289_v63, 0.0  ;;  %v226_v17 = vmul.f32 %v1831_v7, %v1422_v3  ;;  %v1075_v48 = vpack.c.bf16 %v351_v14, %v350_v45  ;;  %v1832_v5 = vunpack.c.h.bf16 %v1408_v59 }
  0x5b   :  { %v354_v54 = vmax.f32 %v290_v35, 0.0  ;;  %v356_v51 = vmax.f32 %v292_v43, 0.0  ;;  %v357_v37 = vmax.f32 %v293_v9, 0.0  ;;  %v1833_v26 = vunpack.c.l.bf16 %v1413_v52 }
  0x5c   :  { %v1080_v49 = vpack.c.bf16 %v353_v58, %v352_v47  ;;  %v227_v18 = vmul.f32 %v1832_v5, %v1422_v3  ;;  %v294_v38 = vadd.f32 %v1474_v15, %v226_v17  ;;  %1158 = vst [vmem:[%s1789_s3 + $0xd0] sm:$0xff] %v1075_v48   ;;  %v1834_v11 = vunpack.c.h.bf16 %v1413_v52 }
  0x5d   :  { %v228_v40 = vmul.f32 %v1833_v26, %v1422_v3  ;;  %v1085_v59 = vpack.c.bf16 %v355_v42, %v354_v54  ;;  %v1090_v13 = vpack.c.bf16 %v357_v37, %v356_v51 }
  0x5e   :  { %v229_v10 = vmul.f32 %v1834_v11, %v1422_v3  ;;  %1159 = vst [vmem:[%s1789_s3 + $0xd8] sm:$0xff] %v1080_v49   ;;  %v295_v19 = vadd.f32 %v1474_v15, %v227_v18  ;;  %v358_v61 = vmax.f32 %v294_v38, 0.0 }
  0x5f   :  { %v296_v41 = vadd.f32 %v1474_v15, %v228_v40  ;;  %1160 = vst [vmem:[%s1789_s3 + $0xe0] sm:$0xff] %v1085_v59   ;;  %1161 = vst [vmem:[%s1789_s3 + $0xe8] sm:$0xff] %v1090_v13  }
  0x60   :  { %v297_v39 = vadd.f32 %v1474_v15, %v229_v10  ;;  %v359_v27 = vmax.f32 %v295_v19, 0.0 }
  0x61   :  { %v360_v52 = vmax.f32 %v296_v41, 0.0 }
  0x62   :  { %v361_v3 = vmax.f32 %v297_v39, 0.0  ;;  %v1095_v56 = vpack.c.bf16 %v359_v27, %v358_v61 }
  0x64   :  { %v1100_v4 = vpack.c.bf16 %v361_v3, %v360_v52  ;;  %1162 = vst [vmem:[%s1789_s3 + $0xf0] sm:$0xff] %v1095_v56  }
  0x66   :  { %1163 = vst [vmem:[%s1789_s3 + $0xf8] sm:$0xff] %v1100_v4  }

// kernel: basic_block_forward.4
= control target key start
LH: loop header
LB: loop body
LE: loop exit
PB: predicated region body
PF: predicated region fallthrough
CT: control target
= control target key end

     0   :  { %vm258_vm0 = vcmask 293888   ;;  %vm355_vm1 = vcmask 1041408   ;;  %vm1170_vm2 = vcmask 1040384   ;;  %s2163_s1 = inlined_call_operand.vmem [shape: bf16[36,128], index: 1, kind: input, shape index: {}]   ;;  %s2164_s0 = inlined_call_operand.vmem [shape: bf16[512,36], index: 0, kind: input, shape index: {}]   ;;  %s2165_s2 = inlined_call_operand.vmem [shape: bf16[512,128], index: 2, kind: output, shape index: {0}]   ;;  %s2166_s3 = inlined_call_operand.vmem [shape: f32[1,2,128], index: 3, kind: output, shape index: {1}]  }
   0x1   :  { %v1680_v0 = vld [vmem:[%s2163_s1] sm:$0xff]   ;;  %v1681_v1 = vld [vmem:[%s2163_s1 + $0x8] sm:$0xff]   ;;  %v1682_v2 = vld [vmem:[%s2163_s1 + $0x10] ss:$0 sps:$4 sm:$0x33]  }
   0x2   :  { %1602 = vmatprep.subr.bf16.mxu0 %v1680_v0  ;;  %v1683_v3 = vld [vmem:[%s2164_s0] sm:$0xff]   ;;  %1672 = vmatprep.subr.bf16.mxu1 %v1680_v0  ;;  %v357_v4 = vsel %vm355_vm1, %v1682_v2, 0  ;;  %v1684_v5 = vld [vmem:[%s2164_s0 + $0x8] sm:$0xff]   ;;  %v1685_v6 = vld [vmem:[%s2164_s0 + $0x10] sm:$0xff]  }
   0x3   :  { %1603 = vmatpush3.bf16.msra.mxu0 %v1680_v0  ;;  %1675 = vmatpush3.bf16.msra.mxu1 %v1680_v0  ;;  %v1686_v7 = vld [vmem:[%s2164_s0 + $0x18] sm:$0xff]   ;;  %v1687_v8 = vld [vmem:[%s2164_s0 + $0x20] sm:$0xff]   ;;  %v1700_v10 = vld [vmem:[%s2164_s0 + $0x88] sm:$0xff]  }
   0x4   :  { %1604 = vmatprep.subr.bf16.mxu0 %v1681_v1  ;;  %1608 = vmatprep.mubr.msk.bf16.mxu0 %vm258_vm0, %v1683_v3  ;;  %v1699_v9 = vld [vmem:[%s2164_s0 + $0x80] sm:$0xff]   ;;  %v1701_v11 = vld [vmem:[%s2164_s0 + $0x90] sm:$0xff]   ;;  %v1688_v12 = vld [vmem:[%s2164_s0 + $0x28] sm:$0xff]  }
   0x5   :  { %1673 = vmatprep.subr.bf16.mxu1 %v1681_v1  ;;  %1640 = vmatprep.mubr.msk.bf16.mxu1 %vm258_vm0, %v1699_v9  ;;  %v1689_v13 = vld [vmem:[%s2164_s0 + $0x30] sm:$0xff]   ;;  %v1702_v14 = vld [vmem:[%s2164_s0 + $0x98] sm:$0xff]   ;;  %v1703_v15 = vld [vmem:[%s2164_s0 + $0xa0] sm:$0xff]  }
   0x6   :  { %v1690_v16 = vld [vmem:[%s2164_s0 + $0x38] sm:$0xff]   ;;  %v1704_v17 = vld [vmem:[%s2164_s0 + $0xa8] sm:$0xff]   ;;  %v1691_v18 = vld [vmem:[%s2164_s0 + $0x40] sm:$0xff]  }
   0x7   :  { %1605 = vmatpush3.bf16.msra.mxu0 %v1681_v1  ;;  %1676 = vmatpush3.bf16.msra.mxu1 %v1681_v1  ;;  %v1705_v19 = vld [vmem:[%s2164_s0 + $0xb0] sm:$0xff]   ;;  %v1692_v20 = vld [vmem:[%s2164_s0 + $0x48] sm:$0xff]   ;;  %v1706_v21 = vld [vmem:[%s2164_s0 + $0xb8] sm:$0xff]  }
   0x8   :  { %1678 = vmatprep.subr.msk.bf16.mxu0 %vm355_vm1, %v1682_v2  ;;  %1679 = vmatprep.subr.msk.bf16.mxu1 %vm355_vm1, %v1682_v2  ;;  %v1693_v22 = vld [vmem:[%s2164_s0 + $0x50] sm:$0xff]   ;;  %v1707_v23 = vld [vmem:[%s2164_s0 + $0xc0] sm:$0xff]   ;;  %v1694_v24 = vld [vmem:[%s2164_s0 + $0x58] sm:$0xff]  }
   0x9   :  { %v1708_v25 = vld [vmem:[%s2164_s0 + $0xc8] sm:$0xff]   ;;  %v1695_v26 = vld [vmem:[%s2164_s0 + $0x60] sm:$0xff]   ;;  %v1709_v27 = vld [vmem:[%s2164_s0 + $0xd0] sm:$0xff]  }
   0xa   :  { %v1696_v28 = vld [vmem:[%s2164_s0 + $0x68] sm:$0xff]   ;;  %v1710_v29 = vld [vmem:[%s2164_s0 + $0xd8] sm:$0xff]   ;;  %v1697_v30 = vld [vmem:[%s2164_s0 + $0x70] sm:$0xff]  }
   0xb   :  { %1607 = vmatpush3.bf16.msra.mxu0 %v357_v4  ;;  %1677 = vmatpush3.bf16.msra.mxu1 %v357_v4  ;;  %v1711_v31 = vld [vmem:[%s2164_s0 + $0xe0] sm:$0xff]   ;;  %v1698_v32 = vld [vmem:[%s2164_s0 + $0x78] sm:$0xff]   ;;  %v1712_v33 = vld [vmem:[%s2164_s0 + $0xe8] sm:$0xff]  }
   0xc   :  { %v1713_v34 = vld [vmem:[%s2164_s0 + $0xf0] sm:$0xff]   ;;  %v1714_v35 = vld [vmem:[%s2164_s0 + $0xf8] sm:$0xff]  }
   0xe   :  { %1609 = vmatmul.mubr.msk.bf16.vlgmr.msra.gmra.mrb[0].mxu0 %vm258_vm0, %v1684_v5  ;;  %1641 = vmatmul.mubr.msk.bf16.vlgmr.msra.gmra.mrb[0].mxu1 %vm258_vm0, %v1700_v10 }
   0xf   :  { %1612 = vmatprep.mubr.msk.bf16.mxu0 %vm258_vm0, %v1685_v6  ;;  %1644 = vmatprep.mubr.msk.bf16.mxu1 %vm258_vm0, %v1701_v11 }
  0x16   :  { %1613 = vmatmul.mubr.msk.bf16.gmra.mrb[4].mxu0 %vm258_vm0, %v1686_v7  ;;  %1645 = vmatmul.mubr.msk.bf16.gmra.mrb[4].mxu1 %vm258_vm0, %v1702_v14 }
  0x17   :  { %1616 = vmatprep.mubr.msk.bf16.mxu0 %vm258_vm0, %v1687_v8  ;;  %1648 = vmatprep.mubr.msk.bf16.mxu1 %vm258_vm0, %v1703_v15 }
  0x1e   :  { %1617 = vmatmul.mubr.msk.bf16.gmra.mrb[8].mxu0 %vm258_vm0, %v1688_v12  ;;  %1649 = vmatmul.mubr.msk.bf16.gmra.mrb[8].mxu1 %vm258_vm0, %v1704_v17 }
  0x1f   :  { %1620 = vmatprep.mubr.msk.bf16.mxu0 %vm258_vm0, %v1689_v13  ;;  %1652 = vmatprep.mubr.msk.bf16.mxu1 %vm258_vm0, %v1705_v19 }
  0x26   :  { %1621 = vmatmul.mubr.msk.bf16.gmra.mrb[12].mxu0 %vm258_vm0, %v1690_v16  ;;  %1653 = vmatmul.mubr.msk.bf16.gmra.mrb[12].mxu1 %vm258_vm0, %v1706_v21 }
  0x27   :  { %1624 = vmatprep.mubr.msk.bf16.mxu0 %vm258_vm0, %v1691_v18  ;;  %1656 = vmatprep.mubr.msk.bf16.mxu1 %vm258_vm0, %v1707_v23 }
  0x2e   :  { %1625 = vmatmul.mubr.msk.bf16.gmra.mrb[16].mxu0 %vm258_vm0, %v1692_v20  ;;  %1657 = vmatmul.mubr.msk.bf16.gmra.mrb[16].mxu1 %vm258_vm0, %v1708_v25 }
  0x2f   :  { %1628 = vmatprep.mubr.msk.bf16.mxu0 %vm258_vm0, %v1693_v22  ;;  %1660 = vmatprep.mubr.msk.bf16.mxu1 %vm258_vm0, %v1709_v27 }
  0x36   :  { %1629 = vmatmul.mubr.msk.bf16.gmra.mrb[20].mxu0 %vm258_vm0, %v1694_v24  ;;  %1661 = vmatmul.mubr.msk.bf16.gmra.mrb[20].mxu1 %vm258_vm0, %v1710_v29 }
  0x37   :  { %1632 = vmatprep.mubr.msk.bf16.mxu0 %vm258_vm0, %v1695_v26  ;;  %1664 = vmatprep.mubr.msk.bf16.mxu1 %vm258_vm0, %v1711_v31 }
  0x3e   :  { %1633 = vmatmul.mubr.msk.bf16.gmra.mrb[24].mxu0 %vm258_vm0, %v1696_v28  ;;  %1665 = vmatmul.mubr.msk.bf16.gmra.mrb[24].mxu1 %vm258_vm0, %v1712_v33 }
  0x3f   :  { %1636 = vmatprep.mubr.msk.bf16.mxu0 %vm258_vm0, %v1697_v30  ;;  %1668 = vmatprep.mubr.msk.bf16.mxu1 %vm258_vm0, %v1713_v34 }
  0x46   :  { %1637 = vmatmul.mubr.msk.bf16.gmra.mrb[28].mxu0 %vm258_vm0, %v1698_v32  ;;  %1669 = vmatmul.mubr.msk.bf16.gmra.mrb[28].mxu1 %vm258_vm0, %v1714_v35 }
  0xe1   :  { %v1610_v36 = vpop.f32.mrb[0].mxu0  ;;  %v1878_v52 = vpop.f32.mrb[0].mxu1 }
  0xe2   :  { %v393_v37 = vpop.f32.mrb[1].mxu0  ;;  %v1039_v45 = vmul.f32 %v1610_v36, %v1610_v36  ;;  %v1880_v54 = vpop.f32.mrb[1].mxu1 }
  0xe3   :  { %v1611_v38 = vpop.f32.mrb[2].mxu0  ;;  %v1037_v41 = vmul.f32 %v393_v37, %v393_v37  ;;  %v1882_v59 = vpop.f32.mrb[2].mxu1 }
  0xe4   :  { %v1384_v39 = vpack.c.bf16 %v1611_v38, %v1610_v36  ;;  %v396_v40 = vpop.f32.mrb[3].mxu0  ;;  %v1040_v48 = vmul.f32 %v1611_v38, %v1611_v38  ;;  %v1464_v62 = vpack.c.bf16 %v1882_v59, %v1878_v52  ;;  %v1886_v63 = vpop.f32.mrb[3].mxu1 }
  0xe5   :  { %v1379_v42 = vpack.c.bf16 %v396_v40, %v393_v37  ;;  %v968_v43 = vadd.f32 %v396_v40, %v393_v37  ;;  %v1038_v44 = vmul.f32 %v396_v40, %v396_v40  ;;  %v1459_v4 = vpack.c.bf16 %v1886_v63, %v1880_v54 }
  0xe6   :  { %1536 = vst [vmem:[%s2165_s2 + $0x8] sm:$0xff] %v1384_v39   ;;  %1552 = vst [vmem:[%s2165_s2 + $0x88] sm:$0xff] %v1464_v62  }
  0xe7   :  { %1380 = vst [vmem:[%s2165_s2] sm:$0xff] %v1379_v42   ;;  %v969_v46 = vadd.f32 %v1610_v36, %v968_v43  ;;  %v1101_v47 = vadd.f32 %v1038_v44, %v1037_v41  ;;  %1551 = vst [vmem:[%s2165_s2 + $0x80] sm:$0xff] %v1459_v4  }
  0xe9   :  { %v1102_v49 = vadd.f32 %v1101_v47, %v1039_v45  ;;  %v1614_v50 = vpop.f32.mrb[4].mxu0  ;;  %v970_v51 = vadd.f32 %v1611_v38, %v969_v46  ;;  %v1902_v12 = vpop.f32.mrb[4].mxu1 }
  0xea   :  { %v409_v53 = vpop.f32.mrb[5].mxu0  ;;  %v1043_v5 = vmul.f32 %v1614_v50, %v1614_v50  ;;  %v1904_v14 = vpop.f32.mrb[5].mxu1 }
  0xeb   :  { %v971_v55 = vadd.f32 %v970_v51, %v409_v53  ;;  %v1041_v56 = vmul.f32 %v409_v53, %v409_v53  ;;  %v1103_v57 = vadd.f32 %v1102_v49, %v1040_v48  ;;  %v1615_v58 = vpop.f32.mrb[6].mxu0  ;;  %v1906_v19 = vpop.f32.mrb[6].mxu1 }
  0xec   :  { %v1394_v60 = vpack.c.bf16 %v1615_v58, %v1614_v50  ;;  %v412_v61 = vpop.f32.mrb[7].mxu0  ;;  %v1044_v8 = vmul.f32 %v1615_v58, %v1615_v58  ;;  %v1474_v22 = vpack.c.bf16 %v1906_v19, %v1902_v12  ;;  %v1910_v23 = vpop.f32.mrb[7].mxu1 }
  0xed   :  { %v1104_v0 = vadd.f32 %v1103_v57, %v1041_v56  ;;  %v1389_v1 = vpack.c.bf16 %v412_v61, %v409_v53  ;;  %v972_v2 = vadd.f32 %v971_v55, %v412_v61  ;;  %v1042_v3 = vmul.f32 %v412_v61, %v412_v61 }
  0xee   :  { %1538 = vst [vmem:[%s2165_s2 + $0x18] sm:$0xff] %v1394_v60   ;;  %1554 = vst [vmem:[%s2165_s2 + $0x98] sm:$0xff] %v1474_v22   ;;  %v1469_v28 = vpack.c.bf16 %v1910_v23, %v1904_v14 }
  0xef   :  { %1537 = vst [vmem:[%s2165_s2 + $0x10] sm:$0xff] %v1389_v1   ;;  %v973_v6 = vadd.f32 %v1614_v50, %v972_v2  ;;  %v1105_v7 = vadd.f32 %v1104_v0, %v1042_v3 }
  0xf0   :  { %1553 = vst [vmem:[%s2165_s2 + $0x90] sm:$0xff] %v1469_v28  }
  0xf1   :  { %v1106_v9 = vadd.f32 %v1105_v7, %v1043_v5  ;;  %v1618_v10 = vpop.f32.mrb[8].mxu0  ;;  %v974_v11 = vadd.f32 %v1615_v58, %v973_v6  ;;  %v1926_v36 = vpop.f32.mrb[8].mxu1 }
  0xf2   :  { %v425_v13 = vpop.f32.mrb[9].mxu0  ;;  %v1047_v29 = vmul.f32 %v1618_v10, %v1618_v10  ;;  %v1928_v38 = vpop.f32.mrb[9].mxu1 }
  0xf3   :  { %v975_v15 = vadd.f32 %v974_v11, %v425_v13  ;;  %v1045_v16 = vmul.f32 %v425_v13, %v425_v13  ;;  %v1107_v17 = vadd.f32 %v1106_v9, %v1044_v8  ;;  %v1619_v18 = vpop.f32.mrb[10].mxu0  ;;  %v1930_v43 = vpop.f32.mrb[10].mxu1 }
  0xf4   :  { %v1404_v20 = vpack.c.bf16 %v1619_v18, %v1618_v10  ;;  %v428_v21 = vpop.f32.mrb[11].mxu0  ;;  %v1048_v32 = vmul.f32 %v1619_v18, %v1619_v18  ;;  %v1484_v46 = vpack.c.bf16 %v1930_v43, %v1926_v36  ;;  %v1934_v47 = vpop.f32.mrb[11].mxu1 }
  0xf5   :  { %v1108_v24 = vadd.f32 %v1107_v17, %v1045_v16  ;;  %v1399_v25 = vpack.c.bf16 %v428_v21, %v425_v13  ;;  %v976_v26 = vadd.f32 %v975_v15, %v428_v21  ;;  %v1046_v27 = vmul.f32 %v428_v21, %v428_v21 }
  0xf6   :  { %1540 = vst [vmem:[%s2165_s2 + $0x28] sm:$0xff] %v1404_v20   ;;  %1556 = vst [vmem:[%s2165_s2 + $0xa8] sm:$0xff] %v1484_v46   ;;  %v1479_v53 = vpack.c.bf16 %v1934_v47, %v1928_v38 }
  0xf7   :  { %1539 = vst [vmem:[%s2165_s2 + $0x20] sm:$0xff] %v1399_v25   ;;  %v977_v30 = vadd.f32 %v1618_v10, %v976_v26  ;;  %v1109_v31 = vadd.f32 %v1108_v24, %v1046_v27 }
  0xf8   :  { %1555 = vst [vmem:[%s2165_s2 + $0xa0] sm:$0xff] %v1479_v53  }
  0xf9   :  { %v1110_v33 = vadd.f32 %v1109_v31, %v1047_v29  ;;  %v1622_v34 = vpop.f32.mrb[12].mxu0  ;;  %v978_v35 = vadd.f32 %v1619_v18, %v977_v30  ;;  %v1950_v0 = vpop.f32.mrb[12].mxu1 }
  0xfa   :  { %v441_v37 = vpop.f32.mrb[13].mxu0  ;;  %v1051_v55 = vmul.f32 %v1622_v34, %v1622_v34  ;;  %v1952_v2 = vpop.f32.mrb[13].mxu1 }
  0xfb   :  { %v979_v39 = vadd.f32 %v978_v35, %v441_v37  ;;  %v1049_v40 = vmul.f32 %v441_v37, %v441_v37  ;;  %v1111_v41 = vadd.f32 %v1110_v33, %v1048_v32  ;;  %v1623_v42 = vpop.f32.mrb[14].mxu0  ;;  %v1954_v7 = vpop.f32.mrb[14].mxu1 }
  0xfc   :  { %v1414_v44 = vpack.c.bf16 %v1623_v42, %v1622_v34  ;;  %v444_v45 = vpop.f32.mrb[15].mxu0  ;;  %v1052_v58 = vmul.f32 %v1623_v42, %v1623_v42  ;;  %v1494_v10 = vpack.c.bf16 %v1954_v7, %v1950_v0  ;;  %v1958_v11 = vpop.f32.mrb[15].mxu1 }
  0xfd   :  { %v1112_v48 = vadd.f32 %v1111_v41, %v1049_v40  ;;  %v1409_v49 = vpack.c.bf16 %v444_v45, %v441_v37  ;;  %v980_v50 = vadd.f32 %v979_v39, %v444_v45  ;;  %v1050_v51 = vmul.f32 %v444_v45, %v444_v45 }
  0xfe   :  { %1542 = vst [vmem:[%s2165_s2 + $0x38] sm:$0xff] %v1414_v44   ;;  %1558 = vst [vmem:[%s2165_s2 + $0xb8] sm:$0xff] %v1494_v10   ;;  %v1489_v18 = vpack.c.bf16 %v1958_v11, %v1952_v2 }
  0xff   :  { %1541 = vst [vmem:[%s2165_s2 + $0x30] sm:$0xff] %v1409_v49   ;;  %v981_v56 = vadd.f32 %v1622_v34, %v980_v50  ;;  %v1113_v57 = vadd.f32 %v1112_v48, %v1050_v51 }
 0x100   :  { %1557 = vst [vmem:[%s2165_s2 + $0xb0] sm:$0xff] %v1489_v18  }
 0x101   :  { %v1114_v60 = vadd.f32 %v1113_v57, %v1051_v55  ;;  %v1626_v61 = vpop.f32.mrb[16].mxu0  ;;  %v982_v62 = vadd.f32 %v1623_v42, %v981_v56  ;;  %v1974_v28 = vpop.f32.mrb[16].mxu1 }
 0x102   :  { %v457_v1 = vpop.f32.mrb[17].mxu0  ;;  %v1055_v20 = vmul.f32 %v1626_v61, %v1626_v61  ;;  %v1976_v30 = vpop.f32.mrb[17].mxu1 }
 0x103   :  { %v983_v3 = vadd.f32 %v982_v62, %v457_v1  ;;  %v1053_v4 = vmul.f32 %v457_v1, %v457_v1  ;;  %v1115_v5 = vadd.f32 %v1114_v60, %v1052_v58  ;;  %v1627_v6 = vpop.f32.mrb[18].mxu0  ;;  %v1978_v35 = vpop.f32.mrb[18].mxu1 }
 0x104   :  { %v1424_v8 = vpack.c.bf16 %v1627_v6, %v1626_v61  ;;  %v460_v9 = vpop.f32.mrb[19].mxu0  ;;  %v1056_v24 = vmul.f32 %v1627_v6, %v1627_v6  ;;  %v1504_v40 = vpack.c.bf16 %v1978_v35, %v1974_v28  ;;  %v1982_v41 = vpop.f32.mrb[19].mxu1 }
 0x105   :  { %v1116_v13 = vadd.f32 %v1115_v5, %v1053_v4  ;;  %v1419_v15 = vpack.c.bf16 %v460_v9, %v457_v1  ;;  %v984_v16 = vadd.f32 %v983_v3, %v460_v9  ;;  %v1054_v17 = vmul.f32 %v460_v9, %v460_v9 }
 0x106   :  { %1544 = vst [vmem:[%s2165_s2 + $0x48] sm:$0xff] %v1424_v8   ;;  %1560 = vst [vmem:[%s2165_s2 + $0xc8] sm:$0xff] %v1504_v40   ;;  %v1499_v48 = vpack.c.bf16 %v1982_v41, %v1976_v30 }
 0x107   :  { %1543 = vst [vmem:[%s2165_s2 + $0x40] sm:$0xff] %v1419_v15   ;;  %v985_v21 = vadd.f32 %v1626_v61, %v984_v16  ;;  %v1117_v22 = vadd.f32 %v1116_v13, %v1054_v17 }
 0x108   :  { %1559 = vst [vmem:[%s2165_s2 + $0xc0] sm:$0xff] %v1499_v48  }
 0x109   :  { %v1118_v25 = vadd.f32 %v1117_v22, %v1055_v20  ;;  %v1630_v26 = vpop.f32.mrb[20].mxu0  ;;  %v986_v27 = vadd.f32 %v1627_v6, %v985_v21  ;;  %v1998_v58 = vpop.f32.mrb[20].mxu1 }
 0x10a   :  { %v473_v29 = vpop.f32.mrb[21].mxu0  ;;  %v1059_v49 = vmul.f32 %v1630_v26, %v1630_v26  ;;  %v2000_v61 = vpop.f32.mrb[21].mxu1 }
 0x10b   :  { %v987_v31 = vadd.f32 %v986_v27, %v473_v29  ;;  %v1057_v32 = vmul.f32 %v473_v29, %v473_v29  ;;  %v1119_v33 = vadd.f32 %v1118_v25, %v1056_v24  ;;  %v1631_v34 = vpop.f32.mrb[22].mxu0  ;;  %v2002_v5 = vpop.f32.mrb[22].mxu1 }
 0x10c   :  { %v1434_v37 = vpack.c.bf16 %v1631_v34, %v1630_v26  ;;  %v476_v39 = vpop.f32.mrb[23].mxu0  ;;  %v1060_v53 = vmul.f32 %v1631_v34, %v1631_v34  ;;  %v1514_v9 = vpack.c.bf16 %v2002_v5, %v1998_v58  ;;  %v2006_v10 = vpop.f32.mrb[23].mxu1 }
 0x10d   :  { %v1120_v42 = vadd.f32 %v1119_v33, %v1057_v32  ;;  %v1429_v44 = vpack.c.bf16 %v476_v39, %v473_v29  ;;  %v988_v45 = vadd.f32 %v987_v31, %v476_v39  ;;  %v1058_v46 = vmul.f32 %v476_v39, %v476_v39 }
 0x10e   :  { %1546 = vst [vmem:[%s2165_s2 + $0x58] sm:$0xff] %v1434_v37   ;;  %1562 = vst [vmem:[%s2165_s2 + $0xd8] sm:$0xff] %v1514_v9   ;;  %v1509_v18 = vpack.c.bf16 %v2006_v10, %v2000_v61 }
 0x10f   :  { %1545 = vst [vmem:[%s2165_s2 + $0x50] sm:$0xff] %v1429_v44   ;;  %v989_v50 = vadd.f32 %v1630_v26, %v988_v45  ;;  %v1121_v51 = vadd.f32 %v1120_v42, %v1058_v46 }
 0x110   :  { %1561 = vst [vmem:[%s2165_s2 + $0xd0] sm:$0xff] %v1509_v18  }
 0x111   :  { %v1122_v55 = vadd.f32 %v1121_v51, %v1059_v49  ;;  %v1634_v56 = vpop.f32.mrb[24].mxu0  ;;  %v990_v57 = vadd.f32 %v1631_v34, %v989_v50  ;;  %v2022_v29 = vpop.f32.mrb[24].mxu1 }
 0x112   :  { %v489_v60 = vpop.f32.mrb[25].mxu0  ;;  %v1063_v20 = vmul.f32 %v1634_v56, %v1634_v56  ;;  %v2024_v32 = vpop.f32.mrb[25].mxu1 }
 0x113   :  { %v991_v62 = vadd.f32 %v990_v57, %v489_v60  ;;  %v1061_v1 = vmul.f32 %v489_v60, %v489_v60  ;;  %v1123_v3 = vadd.f32 %v1122_v55, %v1060_v53  ;;  %v1635_v4 = vpop.f32.mrb[26].mxu0  ;;  %v2026_v40 = vpop.f32.mrb[26].mxu1 }
 0x114   :  { %v1444_v6 = vpack.c.bf16 %v1635_v4, %v1634_v56  ;;  %v492_v8 = vpop.f32.mrb[27].mxu0  ;;  %v1064_v24 = vmul.f32 %v1635_v4, %v1635_v4  ;;  %v1524_v45 = vpack.c.bf16 %v2026_v40, %v2022_v29  ;;  %v2030_v46 = vpop.f32.mrb[27].mxu1 }
 0x115   :  { %v1124_v13 = vadd.f32 %v1123_v3, %v1061_v1  ;;  %v1439_v15 = vpack.c.bf16 %v492_v8, %v489_v60  ;;  %v992_v16 = vadd.f32 %v991_v62, %v492_v8  ;;  %v1062_v17 = vmul.f32 %v492_v8, %v492_v8 }
 0x116   :  { %1548 = vst [vmem:[%s2165_s2 + $0x68] sm:$0xff] %v1444_v6   ;;  %1564 = vst [vmem:[%s2165_s2 + $0xe8] sm:$0xff] %v1524_v45   ;;  %v1519_v53 = vpack.c.bf16 %v2030_v46, %v2024_v32  ;;  %v1069_v3 = vmul.f32 %v1880_v54, %v1880_v54 }
 0x117   :  { %1547 = vst [vmem:[%s2165_s2 + $0x60] sm:$0xff] %v1439_v15   ;;  %v993_v21 = vadd.f32 %v1634_v56, %v992_v16  ;;  %v1125_v22 = vadd.f32 %v1124_v13, %v1062_v17 }
 0x118   :  { %1563 = vst [vmem:[%s2165_s2 + $0xe0] sm:$0xff] %v1519_v53   ;;  %v1078_v53 = vmul.f32 %v1934_v47, %v1934_v47 }
 0x119   :  { %v1126_v25 = vadd.f32 %v1125_v22, %v1063_v20  ;;  %v1638_v26 = vpop.f32.mrb[28].mxu0  ;;  %v994_v27 = vadd.f32 %v1635_v4, %v993_v21  ;;  %v2048_v4 = vpop.f32.mrb[28].mxu1  ;;  %v1070_v20 = vmul.f32 %v1886_v63, %v1886_v63 }
 0x11a   :  { %v505_v31 = vpop.f32.mrb[29].mxu0  ;;  %v1067_v55 = vmul.f32 %v1638_v26, %v1638_v26  ;;  %v2050_v6 = vpop.f32.mrb[29].mxu1 }
 0x11b   :  { %v995_v33 = vadd.f32 %v994_v27, %v505_v31  ;;  %v1065_v34 = vmul.f32 %v505_v31, %v505_v31  ;;  %v1127_v37 = vadd.f32 %v1126_v25, %v1064_v24  ;;  %v1639_v39 = vpop.f32.mrb[30].mxu0  ;;  %v2053_v13 = vpop.f32.mrb[30].mxu1  ;;  %v1073_v27 = vmul.f32 %v1904_v14, %v1904_v14 }
 0x11c   :  { %v1454_v42 = vpack.c.bf16 %v1639_v39, %v1638_v26  ;;  %v508_v44 = vpop.f32.mrb[31].mxu0  ;;  %v1068_v60 = vmul.f32 %v1639_v39, %v1639_v39  ;;  %v1534_v15 = vpack.c.bf16 %v2053_v13, %v2048_v4  ;;  %v2057_v16 = vpop.f32.mrb[31].mxu1 }
 0x11d   :  { %v1128_v48 = vadd.f32 %v1127_v37, %v1065_v34  ;;  %v1449_v49 = vpack.c.bf16 %v508_v44, %v505_v31  ;;  %v996_v50 = vadd.f32 %v995_v33, %v508_v44  ;;  %v1066_v51 = vmul.f32 %v508_v44, %v508_v44 }
 0x11e   :  { %1550 = vst [vmem:[%s2165_s2 + $0x78] sm:$0xff] %v1454_v42   ;;  %v1529_v21 = vpack.c.bf16 %v2057_v16, %v2050_v6  ;;  %1566 = vst [vmem:[%s2165_s2 + $0xf8] sm:$0xff] %v1534_v15   ;;  %v1074_v37 = vmul.f32 %v1910_v23, %v1910_v23 }
 0x11f   :  { %1549 = vst [vmem:[%s2165_s2 + $0x70] sm:$0xff] %v1449_v49   ;;  %v997_v56 = vadd.f32 %v1638_v26, %v996_v50  ;;  %v1129_v57 = vadd.f32 %v1128_v48, %v1066_v51 }
 0x120   :  { %1565 = vst [vmem:[%s2165_s2 + $0xf0] sm:$0xff] %v1529_v21  }
 0x121   :  { %v1130_v62 = vadd.f32 %v1129_v57, %v1067_v55  ;;  %v998_v1 = vadd.f32 %v1639_v39, %v997_v56  ;;  %v1075_v39 = vmul.f32 %v1902_v12, %v1902_v12 }
 0x123   :  { %v999_v8 = vadd.f32 %v998_v1, %v1880_v54  ;;  %v1131_v9 = vadd.f32 %v1130_v62, %v1068_v60  ;;  %v1071_v54 = vmul.f32 %v1878_v52, %v1878_v52 }
 0x125   :  { %v1132_v17 = vadd.f32 %v1131_v9, %v1069_v3  ;;  %v1000_v18 = vadd.f32 %v999_v8, %v1886_v63  ;;  %v1072_v63 = vmul.f32 %v1882_v59, %v1882_v59  ;;  %v1082_v8 = vmul.f32 %v1958_v11, %v1958_v11 }
 0x127   :  { %v1001_v22 = vadd.f32 %v1878_v52, %v1000_v18  ;;  %v1133_v24 = vadd.f32 %v1132_v17, %v1070_v20 }
 0x129   :  { %v1134_v25 = vadd.f32 %v1133_v24, %v1071_v54  ;;  %v1002_v26 = vadd.f32 %v1882_v59, %v1001_v22  ;;  %v1076_v59 = vmul.f32 %v1906_v19, %v1906_v19  ;;  %v1086_v22 = vmul.f32 %v1982_v41, %v1982_v41 }
 0x12b   :  { %v1003_v31 = vadd.f32 %v1002_v26, %v1904_v14  ;;  %v1135_v33 = vadd.f32 %v1134_v25, %v1072_v63  ;;  %v1077_v14 = vmul.f32 %v1928_v38, %v1928_v38 }
 0x12d   :  { %v1136_v34 = vadd.f32 %v1135_v33, %v1073_v27  ;;  %v1004_v52 = vadd.f32 %v1003_v31, %v1910_v23 }
 0x12f   :  { %v1005_v42 = vadd.f32 %v1902_v12, %v1004_v52  ;;  %v1137_v44 = vadd.f32 %v1136_v34, %v1074_v37  ;;  %v1079_v12 = vmul.f32 %v1926_v36, %v1926_v36  ;;  %v1090_v34 = vmul.f32 %v2006_v10, %v2006_v10 }
 0x131   :  { %v1138_v45 = vadd.f32 %v1137_v44, %v1075_v39  ;;  %v1006_v48 = vadd.f32 %v1906_v19, %v1005_v42  ;;  %v1080_v19 = vmul.f32 %v1930_v43, %v1930_v43 }
 0x133   :  { %v1007_v49 = vadd.f32 %v1006_v48, %v1928_v38  ;;  %v1139_v50 = vadd.f32 %v1138_v45, %v1076_v59  ;;  %v1081_v38 = vmul.f32 %v1952_v2, %v1952_v2  ;;  %v1094_v48 = vmul.f32 %v2030_v46, %v2030_v46 }
 0x135   :  { %v1140_v51 = vadd.f32 %v1139_v50, %v1077_v14  ;;  %v1008_v23 = vadd.f32 %v1007_v49, %v1934_v47 }
 0x137   :  { %v1009_v55 = vadd.f32 %v1926_v36, %v1008_v23  ;;  %v1141_v56 = vadd.f32 %v1140_v51, %v1078_v53  ;;  %v1083_v36 = vmul.f32 %v1950_v0, %v1950_v0 }
 0x139   :  { %v1142_v57 = vadd.f32 %v1141_v56, %v1079_v12  ;;  %v1010_v60 = vadd.f32 %v1930_v43, %v1009_v55  ;;  %v1084_v43 = vmul.f32 %v1954_v7, %v1954_v7  ;;  %v1098_v55 = vmul.f32 %v2057_v16, %v2057_v16 }
 0x13b   :  { %v1011_v62 = vadd.f32 %v1010_v60, %v1952_v2  ;;  %v1143_v1 = vadd.f32 %v1142_v57, %v1080_v19  ;;  %v1085_v2 = vmul.f32 %v1976_v30, %v1976_v30 }
 0x13d   :  { %v1144_v3 = vadd.f32 %v1143_v1, %v1081_v38  ;;  %v1012_v47 = vadd.f32 %v1011_v62, %v1958_v11 }
 0x13f   :  { %v1013_v9 = vadd.f32 %v1950_v0, %v1012_v47  ;;  %v1145_v15 = vadd.f32 %v1144_v3, %v1082_v8  ;;  %v1087_v0 = vmul.f32 %v1974_v28, %v1974_v28 }
 0x141   :  { %v1146_v17 = vadd.f32 %v1145_v15, %v1083_v36  ;;  %v1014_v18 = vadd.f32 %v1954_v7, %v1013_v9  ;;  %v1088_v7 = vmul.f32 %v1978_v35, %v1978_v35 }
 0x143   :  { %v1015_v20 = vadd.f32 %v1014_v18, %v1976_v30  ;;  %v1147_v21 = vadd.f32 %v1146_v17, %v1084_v43  ;;  %v1089_v30 = vmul.f32 %v2000_v61, %v2000_v61 }
 0x145   :  { %v1148_v54 = vadd.f32 %v1147_v21, %v1085_v2  ;;  %v1016_v11 = vadd.f32 %v1015_v20, %v1982_v41 }
 0x147   :  { %v1017_v24 = vadd.f32 %v1974_v28, %v1016_v11  ;;  %v1149_v63 = vadd.f32 %v1148_v54, %v1086_v22  ;;  %v1091_v28 = vmul.f32 %v1998_v58, %v1998_v58 }
 0x149   :  { %v1150_v25 = vadd.f32 %v1149_v63, %v1087_v0  ;;  %v1018_v26 = vadd.f32 %v1978_v35, %v1017_v24  ;;  %v1092_v35 = vmul.f32 %v2002_v5, %v2002_v5 }
 0x14b   :  { %v1019_v27 = vadd.f32 %v1018_v26, %v2000_v61  ;;  %v1151_v31 = vadd.f32 %v1150_v25, %v1088_v7  ;;  %v1093_v61 = vmul.f32 %v2024_v32, %v2024_v32 }
 0x14d   :  { %v1152_v33 = vadd.f32 %v1151_v31, %v1089_v30  ;;  %v1020_v41 = vadd.f32 %v1019_v27, %v2006_v10 }
 0x14f   :  { %v1021_v52 = vadd.f32 %v1998_v58, %v1020_v41  ;;  %v1153_v37 = vadd.f32 %v1152_v33, %v1090_v34  ;;  %v1095_v58 = vmul.f32 %v2022_v29, %v2022_v29 }
 0x151   :  { %v1154_v39 = vadd.f32 %v1153_v37, %v1091_v28  ;;  %v1022_v42 = vadd.f32 %v2002_v5, %v1021_v52  ;;  %v1096_v5 = vmul.f32 %v2026_v40, %v2026_v40 }
 0x153   :  { %v1023_v44 = vadd.f32 %v1022_v42, %v2024_v32  ;;  %v1155_v59 = vadd.f32 %v1154_v39, %v1092_v35  ;;  %v1097_v32 = vmul.f32 %v2050_v6, %v2050_v6 }
 0x155   :  { %v1156_v45 = vadd.f32 %v1155_v59, %v1093_v61  ;;  %v1024_v10 = vadd.f32 %v1023_v44, %v2030_v46 }
 0x157   :  { %v1025_v14 = vadd.f32 %v2022_v29, %v1024_v10  ;;  %v1157_v49 = vadd.f32 %v1156_v45, %v1094_v48  ;;  %v1099_v29 = vmul.f32 %v2048_v4, %v2048_v4 }
 0x159   :  { %v1158_v50 = vadd.f32 %v1157_v49, %v1095_v58  ;;  %v1026_v51 = vadd.f32 %v2026_v40, %v1025_v14  ;;  %v1100_v40 = vmul.f32 %v2053_v13, %v2053_v13 }
 0x15b   :  { %v1027_v23 = vadd.f32 %v1026_v51, %v2050_v6  ;;  %v1159_v53 = vadd.f32 %v1158_v50, %v1096_v5 }
 0x15d   :  { %v1160_v12 = vadd.f32 %v1159_v53, %v1097_v32  ;;  %v1028_v46 = vadd.f32 %v1027_v23, %v2057_v16 }
 0x15f   :  { %v1029_v56 = vadd.f32 %v2048_v4, %v1028_v46  ;;  %v1161_v19 = vadd.f32 %v1160_v12, %v1098_v55 }
 0x161   :  { %v1030_v57 = vadd.f32 %v2053_v13, %v1029_v56  ;;  %v1162_v60 = vadd.f32 %v1161_v19, %v1099_v29 }
 0x163   :  { %v1031_v6 = vrot.slane %v1030_v57, 4  ;;  %v1163_v38 = vadd.f32 %v1162_v60, %v1100_v40 }
 0x165   :  { %v1032_v62 = vadd.f32 %v1031_v6, %v1030_v57  ;;  %v1164_v1 = vrot.slane %v1163_v38, 4 }
 0x167   :  { %v1033_v3 = vrot.slane %v1032_v62, 2  ;;  %v1165_v47 = vadd.f32 %v1164_v1, %v1163_v38 }
 0x169   :  { %v1034_v8 = vadd.f32 %v1033_v3, %v1032_v62  ;;  %v1166_v16 = vrot.slane %v1165_v47, 2 }
 0x16b   :  { %v1035_v36 = vrot.slane %v1034_v8, 1  ;;  %v1167_v9 = vadd.f32 %v1166_v16, %v1165_v47 }
 0x16d   :  { %v1168_v15 = vrot.slane %v1167_v9, 1  ;;  %v1036_v4 = vadd.f32 %v1035_v36, %v1034_v8 }
 0x16f   :  { %v1169_v43 = vadd.f32 %v1168_v15, %v1167_v9 }
 0x171   :  { %v1171_v17 = vsel %vm1170_vm2, %v1036_v4, %v1169_v43 }
 0x172   :  { %1172 = vst [vmem:[%s2166_s3] sm:$0x3] %v1171_v17 }

// kernel: basic_block_forward.7
= control target key start
LH: loop header
LB: loop body
LE: loop exit
PB: predicated region body
PF: predicated region fallthrough
CT: control target
= control target key end

     0   :  { %v165_v26 = vlaneseq  ;;  %s1750_s3 = inlined_call_operand.vmem [shape: f32[128,128], index: 3, kind: input, shape index: {}]   ;;  %s1751_s1 = inlined_call_operand.vmem [shape: f32[1,2,128], index: 1, kind: input, shape index: {}]   ;;  %s1752_s2 = inlined_call_operand.vmem [shape: f32[2,128], index: 2, kind: input, shape index: {}]   ;;  %s1753_s0 = inlined_call_operand.vmem [shape: bf16[512,128], index: 0, kind: input, shape index: {}]   ;;  %s1754_s4 = inlined_call_operand.vmem [shape: f32[512,128], index: 4, kind: output, shape index: {}]  }
   0x1   :  { %v301_v0 = vld [vmem:[%s1750_s3] sm:$0xff]  ;;  %v302_v1 = vld [vmem:[%s1750_s3 + $0x8] sm:$0xff]  ;;  %v303_v2 = vld [vmem:[%s1750_s3 + $0x10] sm:$0xff] }
   0x2   :  { %v1201_v3 = vpack.c.bf16 %v302_v1, %v301_v0  ;;  %v304_v4 = vld [vmem:[%s1750_s3 + $0x18] sm:$0xff]  ;;  %v305_v6 = vld [vmem:[%s1750_s3 + $0x20] sm:$0xff]  ;;  %v306_v7 = vld [vmem:[%s1750_s3 + $0x28] sm:$0xff]  ;;  %v166_v30 = vshrl.u32 %v165_v26, 7 }
   0x3   :  { %v1205_v5 = vpack.c.bf16 %v304_v4, %v303_v2  ;;  %v1209_v8 = vpack.c.bf16 %v306_v7, %v305_v6  ;;  %v17_v9 = vld [vmem:[%s1751_s1] sm:$0x3]  ;;  %v307_v10 = vld [vmem:[%s1750_s3 + $0x30] sm:$0xff]  ;;  %v308_v11 = vld [vmem:[%s1750_s3 + $0x38] sm:$0xff] }
   0x4   :  { %1202 = vmatprep.subr.bf16.mxu0 %v1201_v3  ;;  %1233 = vmatprep.subr.bf16.mxu1 %v1201_v3  ;;  %v20_v12 = vmul.f32 0.001953125, %v17_v9  ;;  %v1213_v14 = vpack.c.bf16 %v308_v11, %v307_v10  ;;  %v309_v15 = vld [vmem:[%s1750_s3 + $0x40] sm:$0xff]  ;;  %v310_v16 = vld [vmem:[%s1750_s3 + $0x48] sm:$0xff]  ;;  %v311_v20 = vld [vmem:[%s1750_s3 + $0x50] sm:$0xff]  ;;  %v167_v36 = vsub.s32 0, %v166_v30  ;;  %v235_v52 = vsub.s32 1, %v166_v30 }
   0x5   :  { %1204 = vmatpush3.bf16.msra.mxu0 %v1201_v3  ;;  %1241 = vmatpush3.bf16.msra.mxu1 %v1201_v3  ;;  %v1217_v19 = vpack.c.bf16 %v310_v16, %v309_v15  ;;  %v312_v21 = vld [vmem:[%s1750_s3 + $0x58] sm:$0xff]  ;;  %v313_v24 = vld [vmem:[%s1750_s3 + $0x60] sm:$0xff]  ;;  %v314_v25 = vld [vmem:[%s1750_s3 + $0x68] sm:$0xff] }
   0x6   :  { %1206 = vmatprep.subr.bf16.mxu0 %v1205_v5  ;;  %1234 = vmatprep.subr.bf16.mxu1 %v1205_v5  ;;  %v21_v13 = vmul.f32 %v20_v12, %v20_v12  ;;  %v1221_v23 = vpack.c.bf16 %v312_v21, %v311_v20  ;;  %v1225_v27 = vpack.c.bf16 %v314_v25, %v313_v24  ;;  %v315_v28 = vld [vmem:[%s1750_s3 + $0x70] sm:$0xff]  ;;  %v316_v29 = vld [vmem:[%s1750_s3 + $0x78] sm:$0xff]  ;;  %v18_v33 = vld [vmem:[%s1752_s2] sm:$0x3] }
   0x7   :  { %v1229_v31 = vpack.c.bf16 %v316_v29, %v315_v28  ;;  %v835_v35 = vld [vmem:[%s1753_s0] sm:$0xff]   ;;  %v962_v39 = vld [vmem:[%s1753_s0 + $0x8] sm:$0xff]   ;;  %v963_v47 = vld [vmem:[%s1753_s0 + $0x10] sm:$0xff]  }
   0x8   :  { %v23_v17 = vrot.slane %v21_v13, 7  ;;  %v977_v37 = vld [vmem:[%s1753_s0 + $0x80] sm:$0xff]   ;;  %v978_v40 = vld [vmem:[%s1753_s0 + $0x88] sm:$0xff]   ;;  %v836_v41 = vunpack.c.l.bf16 %v835_v35  ;;  %v837_v42 = vunpack.c.h.bf16 %v835_v35  ;;  %v979_v48 = vld [vmem:[%s1753_s0 + $0x90] sm:$0xff]   ;;  %v840_v49 = vunpack.c.l.bf16 %v962_v39 }
   0x9   :  { %1208 = vmatpush3.bf16.msra.mxu0 %v1205_v5  ;;  %1242 = vmatpush3.bf16.msra.mxu1 %v1205_v5  ;;  %v900_v45 = vunpack.c.l.bf16 %v977_v37  ;;  %v901_v46 = vunpack.c.h.bf16 %v977_v37  ;;  %v904_v50 = vunpack.c.l.bf16 %v978_v40  ;;  %v841_v53 = vunpack.c.h.bf16 %v962_v39  ;;  %v964_v58 = vld [vmem:[%s1753_s0 + $0x18] sm:$0xff]   ;;  %v965_v15 = vld [vmem:[%s1753_s0 + $0x20] sm:$0xff]  }
   0xa   :  { %1210 = vmatprep.subr.bf16.mxu0 %v1209_v8  ;;  %1235 = vmatprep.subr.bf16.mxu1 %v1209_v8  ;;  %v25_v18 = vsub.f32 %v20_v12, %v23_v17  ;;  %v905_v55 = vunpack.c.h.bf16 %v978_v40  ;;  %v844_v56 = vunpack.c.l.bf16 %v963_v47  ;;  %v908_v57 = vunpack.c.l.bf16 %v979_v48  ;;  %v980_v59 = vld [vmem:[%s1753_s0 + $0x98] sm:$0xff]  }
   0xb   :  { %v845_v2 = vunpack.c.h.bf16 %v963_v47  ;;  %v909_v4 = vunpack.c.h.bf16 %v979_v48  ;;  %v848_v5 = vunpack.c.l.bf16 %v964_v58  ;;  %v912_v6 = vunpack.c.l.bf16 %v980_v59  ;;  %v983_v47 = vld [vmem:[%s1753_s0 + $0xb0] sm:$0xff]  }
   0xc   :  { %v26_v22 = vadd.f32 1e-05, %v25_v18  ;;  %v981_v18 = vld [vmem:[%s1753_s0 + $0xa0] sm:$0xff]   ;;  %v849_v21 = vunpack.c.h.bf16 %v964_v58  ;;  %v852_v26 = vunpack.c.l.bf16 %v965_v15  ;;  %v853_v35 = vunpack.c.h.bf16 %v965_v15 }
   0xd   :  { %1212 = vmatpush3.bf16.msra.mxu0 %v1209_v8  ;;  %1243 = vmatpush3.bf16.msra.mxu1 %v1209_v8  ;;  %v916_v30 = vunpack.c.l.bf16 %v981_v18 }
   0xe   :  { %1214 = vmatprep.subr.bf16.mxu0 %v1213_v14  ;;  %1236 = vmatprep.subr.bf16.mxu1 %v1213_v14  ;;  %1249 = vrsqrt.f32 %v26_v22  ;;  %v913_v22 = vunpack.c.h.bf16 %v980_v59  ;;  %v924_v59 = vunpack.c.l.bf16 %v983_v47 }
  0x11   :  { %1216 = vmatpush3.bf16.msra.mxu0 %v1213_v14  ;;  %1244 = vmatpush3.bf16.msra.mxu1 %v1213_v14 }
  0x12   :  { %1218 = vmatprep.subr.bf16.mxu0 %v1217_v19  ;;  %1237 = vmatprep.subr.bf16.mxu1 %v1217_v19 }
  0x15   :  { %1220 = vmatpush3.bf16.msra.mxu0 %v1217_v19  ;;  %1245 = vmatpush3.bf16.msra.mxu1 %v1217_v19 }
  0x16   :  { %1222 = vmatprep.subr.bf16.mxu0 %v1221_v23  ;;  %1238 = vmatprep.subr.bf16.mxu1 %v1221_v23 }
  0x18   :  { %v1250_v32 = vpop.eup %1249 }
  0x19   :  { %1224 = vmatpush3.bf16.msra.mxu0 %v1221_v23  ;;  %1246 = vmatpush3.bf16.msra.mxu1 %v1221_v23  ;;  %v29_v34 = vrot.slane %v1250_v32, 1  ;;  %v982_v32 = vld [vmem:[%s1753_s0 + $0xa8] sm:$0xff]  }
  0x1a   :  { %1226 = vmatprep.subr.bf16.mxu0 %v1225_v27  ;;  %1239 = vmatprep.subr.bf16.mxu1 %v1225_v27 }
  0x1b   :  { %v31_v38 = vmul.f32 %v29_v34, %v18_v33 }
  0x1d   :  { %1228 = vmatpush3.bf16.msra.mxu0 %v1225_v27  ;;  %1247 = vmatpush3.bf16.msra.mxu1 %v1225_v27  ;;  %v32_v43 = vmul.f32 %v31_v38, %v20_v12  ;;  %v1342_v44 = vrot.slane %v31_v38, %v167_v36  ;;  %v917_v36 = vunpack.c.h.bf16 %v981_v18 }
  0x1e   :  { %1230 = vmatprep.subr.bf16.mxu0 %v1229_v31  ;;  %1240 = vmatprep.subr.bf16.mxu1 %v1229_v31 }
  0x1f   :  { %v34_v51 = vrot.slane %v32_v43, 7  ;;  %v169_v54 = vmul.f32 %v836_v41, %v1342_v44  ;;  %v201_v61 = vmul.f32 %v900_v45, %v1342_v44  ;;  %v170_v62 = vmul.f32 %v837_v42, %v1342_v44 }
  0x20   :  { %v202_v63 = vmul.f32 %v901_v46, %v1342_v44  ;;  %v171_v0 = vmul.f32 %v840_v49, %v1342_v44  ;;  %v203_v1 = vmul.f32 %v904_v50, %v1342_v44  ;;  %v172_v7 = vmul.f32 %v841_v53, %v1342_v44  ;;  %v967_v46 = vld [vmem:[%s1753_s0 + $0x30] sm:$0xff]  }
  0x21   :  { %1232 = vmatpush3.bf16.msra.mxu0 %v1229_v31  ;;  %1248 = vmatpush3.bf16.msra.mxu1 %v1229_v31  ;;  %v36_v60 = vsub.f32 %v18_v33, %v34_v51  ;;  %v204_v8 = vmul.f32 %v905_v55, %v1342_v44  ;;  %v173_v9 = vmul.f32 %v844_v56, %v1342_v44  ;;  %v966_v31 = vld [vmem:[%s1753_s0 + $0x28] sm:$0xff]   ;;  %v920_v45 = vunpack.c.l.bf16 %v982_v32 }
  0x22   :  { %v205_v10 = vmul.f32 %v908_v57, %v1342_v44  ;;  %v174_v19 = vmul.f32 %v845_v2, %v1342_v44  ;;  %v206_v20 = vmul.f32 %v909_v4, %v1342_v44  ;;  %v175_v25 = vmul.f32 %v848_v5, %v1342_v44 }
  0x23   :  { %v1362_v3 = vrot.slane %v36_v60, %v235_v52  ;;  %v207_v29 = vmul.f32 %v912_v6, %v1342_v44  ;;  %v176_v33 = vmul.f32 %v849_v21, %v1342_v44  ;;  %v208_v34 = vmul.f32 %v913_v22, %v1342_v44  ;;  %v968_v60 = vld [vmem:[%s1753_s0 + $0x38] sm:$0xff]  }
  0x24   :  { %v177_v39 = vmul.f32 %v852_v26, %v1342_v44  ;;  %v856_v40 = vunpack.c.l.bf16 %v966_v31  ;;  %v209_v43 = vmul.f32 %v916_v30, %v1342_v44  ;;  %v178_v48 = vmul.f32 %v853_v35, %v1342_v44  ;;  %v986_v26 = vld [vmem:[%s1753_s0 + $0xc8] sm:$0xff]  }
  0x25   :  { %v237_v11 = vadd.f32 %v1362_v3, %v169_v54  ;;  %v269_v12 = vadd.f32 %v1362_v3, %v201_v61  ;;  %v238_v13 = vadd.f32 %v1362_v3, %v170_v62  ;;  %v270_v14 = vadd.f32 %v1362_v3, %v202_v63  ;;  %v984_v61 = vld [vmem:[%s1753_s0 + $0xb8] sm:$0xff]  }
  0x26   :  { %v239_v16 = vadd.f32 %v1362_v3, %v171_v0  ;;  %v271_v17 = vadd.f32 %v1362_v3, %v203_v1  ;;  %v240_v23 = vadd.f32 %v1362_v3, %v172_v7  ;;  %v272_v24 = vadd.f32 %v1362_v3, %v204_v8 }
  0x27   :  { %1105 = vmatprep.mubr.f32.mxu0 %v237_v11  ;;  %1153 = vmatprep.mubr.f32.mxu1 %v269_v12  ;;  %v241_v27 = vadd.f32 %v1362_v3, %v173_v9  ;;  %v273_v28 = vadd.f32 %v1362_v3, %v205_v10  ;;  %v242_v37 = vadd.f32 %v1362_v3, %v174_v19  ;;  %v857_v50 = vunpack.c.h.bf16 %v966_v31  ;;  %v969_v11 = vld [vmem:[%s1753_s0 + $0x40] sm:$0xff]  }
  0x28   :  { %1106 = vmatmul.mubr.f32.vlgmr.msra.gmra.mrb[0].mxu0 %v238_v13  ;;  %1154 = vmatmul.mubr.f32.vlgmr.msra.gmra.mrb[0].mxu1 %v270_v14  ;;  %v274_v38 = vadd.f32 %v1362_v3, %v206_v20  ;;  %v243_v41 = vadd.f32 %v1362_v3, %v175_v25  ;;  %v275_v42 = vadd.f32 %v1362_v3, %v207_v29  ;;  %v921_v51 = vunpack.c.h.bf16 %v982_v32  ;;  %v985_v12 = vld [vmem:[%s1753_s0 + $0xc0] sm:$0xff]   ;;  %v970_v25 = vld [vmem:[%s1753_s0 + $0x48] sm:$0xff]  }
  0x29   :  { %1108 = vmatprep.mubr.f32.mxu0 %v239_v16  ;;  %1156 = vmatprep.mubr.f32.mxu1 %v271_v17  ;;  %v210_v49 = vmul.f32 %v917_v36, %v1342_v44  ;;  %v244_v52 = vadd.f32 %v1362_v3, %v176_v33  ;;  %v276_v53 = vadd.f32 %v1362_v3, %v208_v34  ;;  %v860_v55 = vunpack.c.l.bf16 %v967_v46 }
  0x2a   :  { %v179_v54 = vmul.f32 %v856_v40, %v1342_v44  ;;  %v245_v56 = vadd.f32 %v1362_v3, %v177_v39  ;;  %v277_v57 = vadd.f32 %v1362_v3, %v209_v43  ;;  %v211_v58 = vmul.f32 %v920_v45, %v1342_v44  ;;  %v971_v39 = vld [vmem:[%s1753_s0 + $0x50] sm:$0xff]  }
  0x2b   :  { %v246_v62 = vadd.f32 %v1362_v3, %v178_v48  ;;  %v278_v63 = vadd.f32 %v1362_v3, %v210_v49  ;;  %v861_v0 = vunpack.c.h.bf16 %v967_v46  ;;  %v925_v1 = vunpack.c.h.bf16 %v983_v47  ;;  %v987_v40 = vld [vmem:[%s1753_s0 + $0xd0] sm:$0xff]  }
  0x2c   :  { %1109 = vmatmul.mubr.f32.gmra.mrb[2].mxu0 %v240_v23  ;;  %1157 = vmatmul.mubr.f32.gmra.mrb[2].mxu1 %v272_v24  ;;  %v180_v2 = vmul.f32 %v857_v50, %v1342_v44  ;;  %v212_v4 = vmul.f32 %v921_v51, %v1342_v44  ;;  %v181_v5 = vmul.f32 %v860_v55, %v1342_v44  ;;  %v864_v6 = vunpack.c.l.bf16 %v968_v60  ;;  %v988_v55 = vld [vmem:[%s1753_s0 + $0xd8] sm:$0xff]  }
  0x2d   :  { %1111 = vmatprep.mubr.f32.mxu0 %v241_v27  ;;  %1159 = vmatprep.mubr.f32.mxu1 %v273_v28  ;;  %v247_v7 = vadd.f32 %v1362_v3, %v179_v54  ;;  %v279_v8 = vadd.f32 %v1362_v3, %v211_v58  ;;  %v213_v9 = vmul.f32 %v924_v59, %v1342_v44  ;;  %v928_v10 = vunpack.c.l.bf16 %v984_v61  ;;  %v972_v54 = vld [vmem:[%s1753_s0 + $0x58] sm:$0xff]  }
  0x2e   :  { %v182_v13 = vmul.f32 %v861_v0, %v1342_v44  ;;  %v214_v14 = vmul.f32 %v925_v1, %v1342_v44  ;;  %v865_v15 = vunpack.c.h.bf16 %v968_v60  ;;  %v929_v16 = vunpack.c.h.bf16 %v984_v61 }
  0x2f   :  { %v248_v17 = vadd.f32 %v1362_v3, %v180_v2  ;;  %v280_v18 = vadd.f32 %v1362_v3, %v212_v4  ;;  %v249_v19 = vadd.f32 %v1362_v3, %v181_v5  ;;  %v868_v20 = vunpack.c.l.bf16 %v969_v11  ;;  %v973_v5 = vld [vmem:[%s1753_s0 + $0x60] sm:$0xff]  }
  0x30   :  { %1112 = vmatmul.mubr.f32.gmra.mrb[4].mxu0 %v242_v37  ;;  %1160 = vmatmul.mubr.f32.gmra.mrb[4].mxu1 %v274_v38  ;;  %v281_v21 = vadd.f32 %v1362_v3, %v213_v9  ;;  %v183_v22 = vmul.f32 %v864_v6, %v1342_v44  ;;  %v215_v23 = vmul.f32 %v928_v10, %v1342_v44  ;;  %v932_v24 = vunpack.c.l.bf16 %v985_v12  ;;  %v989_v6 = vld [vmem:[%s1753_s0 + $0xe0] sm:$0xff]  }
  0x31   :  { %1114 = vmatprep.mubr.f32.mxu0 %v243_v41  ;;  %1162 = vmatprep.mubr.f32.mxu1 %v275_v42  ;;  %v250_v27 = vadd.f32 %v1362_v3, %v182_v13  ;;  %v184_v28 = vmul.f32 %v865_v15, %v1342_v44  ;;  %v869_v29 = vunpack.c.h.bf16 %v969_v11  ;;  %v933_v30 = vunpack.c.h.bf16 %v985_v12 }
  0x32   :  { %v282_v31 = vadd.f32 %v1362_v3, %v214_v14  ;;  %v216_v32 = vmul.f32 %v929_v16, %v1342_v44  ;;  %v185_v33 = vmul.f32 %v868_v20, %v1342_v44  ;;  %v872_v34 = vunpack.c.l.bf16 %v970_v25  ;;  %v990_v20 = vld [vmem:[%s1753_s0 + $0xe8] sm:$0xff]  }
  0x33   :  { %v251_v35 = vadd.f32 %v1362_v3, %v183_v22  ;;  %v283_v36 = vadd.f32 %v1362_v3, %v215_v23  ;;  %v217_v37 = vmul.f32 %v932_v24, %v1342_v44  ;;  %v936_v38 = vunpack.c.l.bf16 %v986_v26 }
  0x34   :  { %1115 = vmatmul.mubr.f32.gmra.mrb[6].mxu0 %v244_v52  ;;  %1163 = vmatmul.mubr.f32.gmra.mrb[6].mxu1 %v276_v53  ;;  %v252_v41 = vadd.f32 %v1362_v3, %v184_v28  ;;  %v186_v42 = vmul.f32 %v869_v29, %v1342_v44  ;;  %v873_v43 = vunpack.c.h.bf16 %v970_v25  ;;  %v937_v45 = vunpack.c.h.bf16 %v986_v26 }
  0x35   :  { %1117 = vmatprep.mubr.f32.mxu0 %v245_v56  ;;  %1165 = vmatprep.mubr.f32.mxu1 %v277_v57  ;;  %v284_v46 = vadd.f32 %v1362_v3, %v216_v32  ;;  %v253_v47 = vadd.f32 %v1362_v3, %v185_v33  ;;  %v218_v48 = vmul.f32 %v933_v30, %v1342_v44  ;;  %v876_v49 = vunpack.c.l.bf16 %v971_v39  ;;  %v975_v33 = vld [vmem:[%s1753_s0 + $0x70] sm:$0xff]  }
  0x36   :  { %v285_v50 = vadd.f32 %v1362_v3, %v217_v37  ;;  %v187_v51 = vmul.f32 %v872_v34, %v1342_v44  ;;  %v219_v52 = vmul.f32 %v936_v38, %v1342_v44  ;;  %v940_v53 = vunpack.c.l.bf16 %v987_v40  ;;  %v991_v34 = vld [vmem:[%s1753_s0 + $0xf0] sm:$0xff]  }
  0x37   :  { %v188_v56 = vmul.f32 %v873_v43, %v1342_v44  ;;  %v220_v57 = vmul.f32 %v937_v45, %v1342_v44  ;;  %v877_v58 = vunpack.c.h.bf16 %v971_v39  ;;  %v941_v59 = vunpack.c.h.bf16 %v987_v40 }
  0x38   :  { %1118 = vmatmul.mubr.f32.gmra.mrb[8].mxu0 %v246_v62  ;;  %1166 = vmatmul.mubr.f32.gmra.mrb[8].mxu1 %v278_v63  ;;  %v254_v60 = vadd.f32 %v1362_v3, %v186_v42  ;;  %v286_v61 = vadd.f32 %v1362_v3, %v218_v48  ;;  %v189_v62 = vmul.f32 %v876_v49, %v1342_v44  ;;  %v880_v63 = vunpack.c.l.bf16 %v972_v54  ;;  %v976_v48 = vld [vmem:[%s1753_s0 + $0x78] sm:$0xff]  }
  0x39   :  { %1120 = vmatprep.mubr.f32.mxu0 %v247_v7  ;;  %1168 = vmatprep.mubr.f32.mxu1 %v279_v8  ;;  %v255_v0 = vadd.f32 %v1362_v3, %v187_v51  ;;  %v287_v1 = vadd.f32 %v1362_v3, %v219_v52  ;;  %v221_v2 = vmul.f32 %v940_v53, %v1342_v44  ;;  %v944_v4 = vunpack.c.l.bf16 %v988_v55  ;;  %v992_v49 = vld [vmem:[%s1753_s0 + $0xf8] sm:$0xff]  }
  0x3a   :  { %v256_v7 = vadd.f32 %v1362_v3, %v188_v56  ;;  %v288_v8 = vadd.f32 %v1362_v3, %v220_v57  ;;  %v881_v9 = vunpack.c.h.bf16 %v972_v54  ;;  %v945_v10 = vunpack.c.h.bf16 %v988_v55 }
  0x3b   :  { %v257_v11 = vadd.f32 %v1362_v3, %v189_v62  ;;  %v190_v12 = vmul.f32 %v877_v58, %v1342_v44  ;;  %v222_v13 = vmul.f32 %v941_v59, %v1342_v44  ;;  %v884_v14 = vunpack.c.l.bf16 %v973_v5 }
  0x3c   :  { %1121 = vmatmul.mubr.f32.gmra.mrb[10].mxu0 %v248_v17  ;;  %1169 = vmatmul.mubr.f32.gmra.mrb[10].mxu1 %v280_v18  ;;  %v289_v15 = vadd.f32 %v1362_v3, %v221_v2  ;;  %v191_v16 = vmul.f32 %v880_v63, %v1342_v44  ;;  %v223_v17 = vmul.f32 %v944_v4, %v1342_v44  ;;  %v948_v18 = vunpack.c.l.bf16 %v989_v6 }
  0x3d   :  { %1123 = vmatprep.mubr.f32.mxu0 %v249_v19  ;;  %1171 = vmatprep.mubr.f32.mxu1 %v281_v21  ;;  %v974_v19 = vld [vmem:[%s1753_s0 + $0x68] sm:$0xff]   ;;  %v192_v21 = vmul.f32 %v881_v9, %v1342_v44  ;;  %v224_v22 = vmul.f32 %v945_v10, %v1342_v44  ;;  %v885_v23 = vunpack.c.h.bf16 %v973_v5  ;;  %v949_v24 = vunpack.c.h.bf16 %v989_v6 }
  0x3e   :  { %v258_v25 = vadd.f32 %v1362_v3, %v190_v12  ;;  %v290_v26 = vadd.f32 %v1362_v3, %v222_v13  ;;  %v888_v28 = vunpack.c.l.bf16 %v974_v19  ;;  %v259_v29 = vadd.f32 %v1362_v3, %v191_v16 }
  0x3f   :  { %v291_v30 = vadd.f32 %v1362_v3, %v223_v17  ;;  %v952_v32 = vunpack.c.l.bf16 %v990_v20  ;;  %v889_v37 = vunpack.c.h.bf16 %v974_v19  ;;  %v953_v38 = vunpack.c.h.bf16 %v990_v20 }
  0x40   :  { %1124 = vmatmul.mubr.f32.gmra.mrb[12].mxu0 %v250_v27  ;;  %1172 = vmatmul.mubr.f32.gmra.mrb[12].mxu1 %v282_v31  ;;  %v193_v27 = vmul.f32 %v884_v14, %v1342_v44  ;;  %v225_v31 = vmul.f32 %v948_v18, %v1342_v44  ;;  %v194_v39 = vmul.f32 %v885_v23, %v1342_v44  ;;  %v892_v42 = vunpack.c.l.bf16 %v975_v33 }
  0x41   :  { %1126 = vmatprep.mubr.f32.mxu0 %v251_v35  ;;  %1174 = vmatprep.mubr.f32.mxu1 %v283_v36  ;;  %v260_v35 = vadd.f32 %v1362_v3, %v192_v21  ;;  %v292_v36 = vadd.f32 %v1362_v3, %v224_v22  ;;  %v226_v40 = vmul.f32 %v949_v24, %v1342_v44  ;;  %v893_v52 = vunpack.c.h.bf16 %v975_v33 }
  0x42   :  { %v261_v43 = vadd.f32 %v1362_v3, %v193_v27  ;;  %v293_v45 = vadd.f32 %v1362_v3, %v225_v31  ;;  %v228_v51 = vmul.f32 %v953_v38, %v1342_v44  ;;  %v957_v53 = vunpack.c.h.bf16 %v991_v34 }
  0x43   :  { %v262_v54 = vadd.f32 %v1362_v3, %v194_v39  ;;  %v294_v55 = vadd.f32 %v1362_v3, %v226_v40  ;;  %v896_v57 = vunpack.c.l.bf16 %v976_v48  ;;  %v197_v59 = vmul.f32 %v892_v42, %v1342_v44 }
  0x44   :  { %1127 = vmatmul.mubr.f32.gmra.mrb[14].mxu0 %v252_v41  ;;  %1175 = vmatmul.mubr.f32.gmra.mrb[14].mxu1 %v284_v46  ;;  %v195_v41 = vmul.f32 %v888_v28, %v1342_v44  ;;  %v227_v46 = vmul.f32 %v952_v32, %v1342_v44  ;;  %v296_v63 = vadd.f32 %v1362_v3, %v228_v51  ;;  %v961_v5 = vunpack.c.h.bf16 %v992_v49 }
  0x45   :  { %1129 = vmatprep.mubr.f32.mxu0 %v253_v47  ;;  %1177 = vmatprep.mubr.f32.mxu1 %v285_v50  ;;  %v956_v47 = vunpack.c.l.bf16 %v991_v34  ;;  %v196_v50 = vmul.f32 %v889_v37, %v1342_v44  ;;  %v230_v2 = vmul.f32 %v957_v53, %v1342_v44  ;;  %v199_v4 = vmul.f32 %v896_v57, %v1342_v44 }
  0x46   :  { %v263_v56 = vadd.f32 %v1362_v3, %v195_v41  ;;  %v295_v58 = vadd.f32 %v1362_v3, %v227_v46  ;;  %v265_v6 = vadd.f32 %v1362_v3, %v197_v59  ;;  %v232_v12 = vmul.f32 %v961_v5, %v1342_v44 }
  0x47   :  { %v264_v62 = vadd.f32 %v1362_v3, %v196_v50  ;;  %v267_v13 = vadd.f32 %v1362_v3, %v199_v4 }
  0x48   :  { %1130 = vmatmul.mubr.f32.gmra.mrb[16].mxu0 %v254_v60  ;;  %1178 = vmatmul.mubr.f32.gmra.mrb[16].mxu1 %v286_v61  ;;  %v229_v60 = vmul.f32 %v956_v47, %v1342_v44  ;;  %v960_v61 = vunpack.c.l.bf16 %v992_v49  ;;  %v300_v16 = vadd.f32 %v1362_v3, %v232_v12 }
  0x49   :  { %1132 = vmatprep.mubr.f32.mxu0 %v255_v0  ;;  %1180 = vmatprep.mubr.f32.mxu1 %v287_v1  ;;  %v897_v0 = vunpack.c.h.bf16 %v976_v48  ;;  %v198_v1 = vmul.f32 %v893_v52, %v1342_v44 }
  0x4b   :  { %v200_v9 = vmul.f32 %v897_v0, %v1342_v44  ;;  %v266_v10 = vadd.f32 %v1362_v3, %v198_v1 }
  0x4c   :  { %1133 = vmatmul.mubr.f32.gmra.mrb[18].mxu0 %v256_v7  ;;  %1181 = vmatmul.mubr.f32.gmra.mrb[18].mxu1 %v288_v8  ;;  %v297_v7 = vadd.f32 %v1362_v3, %v229_v60  ;;  %v231_v8 = vmul.f32 %v960_v61, %v1342_v44 }
  0x4d   :  { %1135 = vmatprep.mubr.f32.mxu0 %v257_v11  ;;  %1183 = vmatprep.mubr.f32.mxu1 %v289_v15  ;;  %v298_v11 = vadd.f32 %v1362_v3, %v230_v2  ;;  %v268_v15 = vadd.f32 %v1362_v3, %v200_v9 }
  0x4e   :  { %v299_v14 = vadd.f32 %v1362_v3, %v231_v8 }
  0x50   :  { %1136 = vmatmul.mubr.f32.gmra.mrb[20].mxu0 %v258_v25  ;;  %1184 = vmatmul.mubr.f32.gmra.mrb[20].mxu1 %v290_v26 }
  0x51   :  { %1138 = vmatprep.mubr.f32.mxu0 %v259_v29  ;;  %1186 = vmatprep.mubr.f32.mxu1 %v291_v30 }
  0x54   :  { %1139 = vmatmul.mubr.f32.gmra.mrb[22].mxu0 %v260_v35  ;;  %1187 = vmatmul.mubr.f32.gmra.mrb[22].mxu1 %v292_v36 }
  0x55   :  { %1141 = vmatprep.mubr.f32.mxu0 %v261_v43  ;;  %1189 = vmatprep.mubr.f32.mxu1 %v293_v45 }
  0x58   :  { %1142 = vmatmul.mubr.f32.gmra.mrb[24].mxu0 %v262_v54  ;;  %1190 = vmatmul.mubr.f32.gmra.mrb[24].mxu1 %v294_v55 }
  0x59   :  { %1144 = vmatprep.mubr.f32.mxu0 %v263_v56  ;;  %1192 = vmatprep.mubr.f32.mxu1 %v295_v58 }
  0x5c   :  { %1145 = vmatmul.mubr.f32.gmra.mrb[26].mxu0 %v264_v62  ;;  %1193 = vmatmul.mubr.f32.gmra.mrb[26].mxu1 %v296_v63 }
  0x5d   :  { %1147 = vmatprep.mubr.f32.mxu0 %v265_v6  ;;  %1195 = vmatprep.mubr.f32.mxu1 %v297_v7 }
  0x60   :  { %1148 = vmatmul.mubr.f32.gmra.mrb[28].mxu0 %v266_v10  ;;  %1196 = vmatmul.mubr.f32.gmra.mrb[28].mxu1 %v298_v11 }
  0x61   :  { %1150 = vmatprep.mubr.f32.mxu0 %v267_v13  ;;  %1198 = vmatprep.mubr.f32.mxu1 %v299_v14 }
  0x64   :  { %1151 = vmatmul.mubr.f32.gmra.mrb[30].mxu0 %v268_v15  ;;  %1199 = vmatmul.mubr.f32.gmra.mrb[30].mxu1 %v300_v16 }
  0xfb   :  { %v1107_v17 = vpop.f32.mrb[0].mxu0  ;;  %v1155_v18 = vpop.f32.mrb[0].mxu1 }
  0xfc   :  { %v703_v19 = vmax.f32 %v1107_v17, 0.0  ;;  %v735_v44 = vmax.f32 %v1155_v18, 0.0  ;;  %v383_v20 = vpop.f32.mrb[1].mxu0  ;;  %v543_v21 = vpop.f32.mrb[1].mxu1 }
  0xfd   :  { %v702_v22 = vmax.f32 %v383_v20, 0.0  ;;  %v734_v23 = vmax.f32 %v543_v21, 0.0 }
  0xfe   :  { %767 = vst [vmem:[%s1754_s4 + $0x8] sm:$0xff] %v703_v19  ;;  %799 = vst [vmem:[%s1754_s4 + $0x108] sm:$0xff] %v735_v44 }
  0xff   :  { %766 = vst [vmem:[%s1754_s4] sm:$0xff] %v702_v22  ;;  %798 = vst [vmem:[%s1754_s4 + $0x100] sm:$0xff] %v734_v23  ;;  %v1110_v3 = vpop.f32.mrb[2].mxu0  ;;  %v1158_v24 = vpop.f32.mrb[2].mxu1 }
 0x100   :  { %v705_v25 = vmax.f32 %v1110_v3, 0.0  ;;  %v737_v26 = vmax.f32 %v1158_v24, 0.0  ;;  %v393_v27 = vpop.f32.mrb[3].mxu0  ;;  %v553_v28 = vpop.f32.mrb[3].mxu1 }
 0x101   :  { %v704_v29 = vmax.f32 %v393_v27, 0.0  ;;  %v736_v30 = vmax.f32 %v553_v28, 0.0 }
 0x102   :  { %769 = vst [vmem:[%s1754_s4 + $0x18] sm:$0xff] %v705_v25  ;;  %801 = vst [vmem:[%s1754_s4 + $0x118] sm:$0xff] %v737_v26 }
 0x103   :  { %768 = vst [vmem:[%s1754_s4 + $0x10] sm:$0xff] %v704_v29  ;;  %800 = vst [vmem:[%s1754_s4 + $0x110] sm:$0xff] %v736_v30  ;;  %v1113_v31 = vpop.f32.mrb[4].mxu0  ;;  %v1161_v32 = vpop.f32.mrb[4].mxu1 }
 0x104   :  { %v707_v33 = vmax.f32 %v1113_v31, 0.0  ;;  %v739_v34 = vmax.f32 %v1161_v32, 0.0  ;;  %v403_v35 = vpop.f32.mrb[5].mxu0  ;;  %v563_v36 = vpop.f32.mrb[5].mxu1 }
 0x105   :  { %v706_v37 = vmax.f32 %v403_v35, 0.0  ;;  %v738_v38 = vmax.f32 %v563_v36, 0.0 }
 0x106   :  { %771 = vst [vmem:[%s1754_s4 + $0x28] sm:$0xff] %v707_v33  ;;  %803 = vst [vmem:[%s1754_s4 + $0x128] sm:$0xff] %v739_v34 }
 0x107   :  { %770 = vst [vmem:[%s1754_s4 + $0x20] sm:$0xff] %v706_v37  ;;  %802 = vst [vmem:[%s1754_s4 + $0x120] sm:$0xff] %v738_v38  ;;  %v1116_v39 = vpop.f32.mrb[6].mxu0  ;;  %v1164_v40 = vpop.f32.mrb[6].mxu1 }
 0x108   :  { %v709_v41 = vmax.f32 %v1116_v39, 0.0  ;;  %v741_v42 = vmax.f32 %v1164_v40, 0.0  ;;  %v413_v43 = vpop.f32.mrb[7].mxu0  ;;  %v573_v45 = vpop.f32.mrb[7].mxu1 }
 0x109   :  { %v708_v46 = vmax.f32 %v413_v43, 0.0  ;;  %v740_v47 = vmax.f32 %v573_v45, 0.0 }
 0x10a   :  { %773 = vst [vmem:[%s1754_s4 + $0x38] sm:$0xff] %v709_v41  ;;  %805 = vst [vmem:[%s1754_s4 + $0x138] sm:$0xff] %v741_v42 }
 0x10b   :  { %772 = vst [vmem:[%s1754_s4 + $0x30] sm:$0xff] %v708_v46  ;;  %804 = vst [vmem:[%s1754_s4 + $0x130] sm:$0xff] %v740_v47  ;;  %v1119_v48 = vpop.f32.mrb[8].mxu0  ;;  %v1167_v49 = vpop.f32.mrb[8].mxu1 }
 0x10c   :  { %v711_v50 = vmax.f32 %v1119_v48, 0.0  ;;  %v743_v51 = vmax.f32 %v1167_v49, 0.0  ;;  %v423_v52 = vpop.f32.mrb[9].mxu0  ;;  %v583_v53 = vpop.f32.mrb[9].mxu1 }
 0x10d   :  { %v710_v54 = vmax.f32 %v423_v52, 0.0  ;;  %v742_v55 = vmax.f32 %v583_v53, 0.0 }
 0x10e   :  { %775 = vst [vmem:[%s1754_s4 + $0x48] sm:$0xff] %v711_v50  ;;  %807 = vst [vmem:[%s1754_s4 + $0x148] sm:$0xff] %v743_v51 }
 0x10f   :  { %774 = vst [vmem:[%s1754_s4 + $0x40] sm:$0xff] %v710_v54  ;;  %806 = vst [vmem:[%s1754_s4 + $0x140] sm:$0xff] %v742_v55  ;;  %v1122_v56 = vpop.f32.mrb[10].mxu0  ;;  %v1170_v57 = vpop.f32.mrb[10].mxu1 }
 0x110   :  { %v713_v58 = vmax.f32 %v1122_v56, 0.0  ;;  %v745_v59 = vmax.f32 %v1170_v57, 0.0  ;;  %v433_v60 = vpop.f32.mrb[11].mxu0  ;;  %v593_v61 = vpop.f32.mrb[11].mxu1 }
 0x111   :  { %v712_v62 = vmax.f32 %v433_v60, 0.0  ;;  %v744_v63 = vmax.f32 %v593_v61, 0.0 }
 0x112   :  { %777 = vst [vmem:[%s1754_s4 + $0x58] sm:$0xff] %v713_v58  ;;  %809 = vst [vmem:[%s1754_s4 + $0x158] sm:$0xff] %v745_v59 }
 0x113   :  { %776 = vst [vmem:[%s1754_s4 + $0x50] sm:$0xff] %v712_v62  ;;  %808 = vst [vmem:[%s1754_s4 + $0x150] sm:$0xff] %v744_v63  ;;  %v1125_v0 = vpop.f32.mrb[12].mxu0  ;;  %v1173_v1 = vpop.f32.mrb[12].mxu1 }
 0x114   :  { %v715_v2 = vmax.f32 %v1125_v0, 0.0  ;;  %v747_v4 = vmax.f32 %v1173_v1, 0.0  ;;  %v443_v5 = vpop.f32.mrb[13].mxu0  ;;  %v603_v6 = vpop.f32.mrb[13].mxu1 }
 0x115   :  { %v714_v7 = vmax.f32 %v443_v5, 0.0  ;;  %v746_v8 = vmax.f32 %v603_v6, 0.0 }
 0x116   :  { %779 = vst [vmem:[%s1754_s4 + $0x68] sm:$0xff] %v715_v2  ;;  %811 = vst [vmem:[%s1754_s4 + $0x168] sm:$0xff] %v747_v4 }
 0x117   :  { %778 = vst [vmem:[%s1754_s4 + $0x60] sm:$0xff] %v714_v7  ;;  %810 = vst [vmem:[%s1754_s4 + $0x160] sm:$0xff] %v746_v8  ;;  %v1128_v9 = vpop.f32.mrb[14].mxu0  ;;  %v1176_v10 = vpop.f32.mrb[14].mxu1 }
 0x118   :  { %v717_v11 = vmax.f32 %v1128_v9, 0.0  ;;  %v749_v12 = vmax.f32 %v1176_v10, 0.0  ;;  %v453_v13 = vpop.f32.mrb[15].mxu0  ;;  %v613_v14 = vpop.f32.mrb[15].mxu1 }
 0x119   :  { %v716_v15 = vmax.f32 %v453_v13, 0.0  ;;  %v748_v16 = vmax.f32 %v613_v14, 0.0 }
 0x11a   :  { %781 = vst [vmem:[%s1754_s4 + $0x78] sm:$0xff] %v717_v11  ;;  %813 = vst [vmem:[%s1754_s4 + $0x178] sm:$0xff] %v749_v12 }
 0x11b   :  { %780 = vst [vmem:[%s1754_s4 + $0x70] sm:$0xff] %v716_v15  ;;  %812 = vst [vmem:[%s1754_s4 + $0x170] sm:$0xff] %v748_v16  ;;  %v1131_v17 = vpop.f32.mrb[16].mxu0  ;;  %v1179_v18 = vpop.f32.mrb[16].mxu1 }
 0x11c   :  { %v719_v19 = vmax.f32 %v1131_v17, 0.0  ;;  %v751_v44 = vmax.f32 %v1179_v18, 0.0  ;;  %v463_v20 = vpop.f32.mrb[17].mxu0  ;;  %v623_v21 = vpop.f32.mrb[17].mxu1 }
 0x11d   :  { %v718_v22 = vmax.f32 %v463_v20, 0.0  ;;  %v750_v23 = vmax.f32 %v623_v21, 0.0 }
 0x11e   :  { %783 = vst [vmem:[%s1754_s4 + $0x88] sm:$0xff] %v719_v19  ;;  %815 = vst [vmem:[%s1754_s4 + $0x188] sm:$0xff] %v751_v44 }
 0x11f   :  { %782 = vst [vmem:[%s1754_s4 + $0x80] sm:$0xff] %v718_v22  ;;  %814 = vst [vmem:[%s1754_s4 + $0x180] sm:$0xff] %v750_v23  ;;  %v1134_v3 = vpop.f32.mrb[18].mxu0  ;;  %v1182_v24 = vpop.f32.mrb[18].mxu1 }
 0x120   :  { %v721_v25 = vmax.f32 %v1134_v3, 0.0  ;;  %v753_v26 = vmax.f32 %v1182_v24, 0.0  ;;  %v473_v27 = vpop.f32.mrb[19].mxu0  ;;  %v633_v28 = vpop.f32.mrb[19].mxu1 }
 0x121   :  { %v720_v29 = vmax.f32 %v473_v27, 0.0  ;;  %v752_v30 = vmax.f32 %v633_v28, 0.0 }
 0x122   :  { %785 = vst [vmem:[%s1754_s4 + $0x98] sm:$0xff] %v721_v25  ;;  %817 = vst [vmem:[%s1754_s4 + $0x198] sm:$0xff] %v753_v26 }
 0x123   :  { %784 = vst [vmem:[%s1754_s4 + $0x90] sm:$0xff] %v720_v29  ;;  %816 = vst [vmem:[%s1754_s4 + $0x190] sm:$0xff] %v752_v30  ;;  %v1137_v31 = vpop.f32.mrb[20].mxu0  ;;  %v1185_v32 = vpop.f32.mrb[20].mxu1 }
 0x124   :  { %v723_v33 = vmax.f32 %v1137_v31, 0.0  ;;  %v755_v34 = vmax.f32 %v1185_v32, 0.0  ;;  %v483_v35 = vpop.f32.mrb[21].mxu0  ;;  %v643_v36 = vpop.f32.mrb[21].mxu1 }
 0x125   :  { %v722_v37 = vmax.f32 %v483_v35, 0.0  ;;  %v754_v38 = vmax.f32 %v643_v36, 0.0 }
 0x126   :  { %787 = vst [vmem:[%s1754_s4 + $0xa8] sm:$0xff] %v723_v33  ;;  %819 = vst [vmem:[%s1754_s4 + $0x1a8] sm:$0xff] %v755_v34 }
 0x127   :  { %786 = vst [vmem:[%s1754_s4 + $0xa0] sm:$0xff] %v722_v37  ;;  %818 = vst [vmem:[%s1754_s4 + $0x1a0] sm:$0xff] %v754_v38  ;;  %v1140_v39 = vpop.f32.mrb[22].mxu0  ;;  %v1188_v40 = vpop.f32.mrb[22].mxu1 }
 0x128   :  { %v725_v41 = vmax.f32 %v1140_v39, 0.0  ;;  %v757_v42 = vmax.f32 %v1188_v40, 0.0  ;;  %v493_v43 = vpop.f32.mrb[23].mxu0  ;;  %v653_v45 = vpop.f32.mrb[23].mxu1 }
 0x129   :  { %v724_v46 = vmax.f32 %v493_v43, 0.0  ;;  %v756_v47 = vmax.f32 %v653_v45, 0.0 }
 0x12a   :  { %789 = vst [vmem:[%s1754_s4 + $0xb8] sm:$0xff] %v725_v41  ;;  %821 = vst [vmem:[%s1754_s4 + $0x1b8] sm:$0xff] %v757_v42 }
 0x12b   :  { %788 = vst [vmem:[%s1754_s4 + $0xb0] sm:$0xff] %v724_v46  ;;  %820 = vst [vmem:[%s1754_s4 + $0x1b0] sm:$0xff] %v756_v47  ;;  %v1143_v48 = vpop.f32.mrb[24].mxu0  ;;  %v1191_v49 = vpop.f32.mrb[24].mxu1 }
 0x12c   :  { %v727_v50 = vmax.f32 %v1143_v48, 0.0  ;;  %v759_v51 = vmax.f32 %v1191_v49, 0.0  ;;  %v503_v52 = vpop.f32.mrb[25].mxu0  ;;  %v663_v53 = vpop.f32.mrb[25].mxu1 }
 0x12d   :  { %v726_v54 = vmax.f32 %v503_v52, 0.0  ;;  %v758_v55 = vmax.f32 %v663_v53, 0.0 }
 0x12e   :  { %791 = vst [vmem:[%s1754_s4 + $0xc8] sm:$0xff] %v727_v50  ;;  %823 = vst [vmem:[%s1754_s4 + $0x1c8] sm:$0xff] %v759_v51 }
 0x12f   :  { %790 = vst [vmem:[%s1754_s4 + $0xc0] sm:$0xff] %v726_v54  ;;  %822 = vst [vmem:[%s1754_s4 + $0x1c0] sm:$0xff] %v758_v55  ;;  %v1146_v56 = vpop.f32.mrb[26].mxu0  ;;  %v1194_v57 = vpop.f32.mrb[26].mxu1 }
 0x130   :  { %v729_v58 = vmax.f32 %v1146_v56, 0.0  ;;  %v761_v59 = vmax.f32 %v1194_v57, 0.0  ;;  %v513_v60 = vpop.f32.mrb[27].mxu0  ;;  %v673_v61 = vpop.f32.mrb[27].mxu1 }
 0x131   :  { %v728_v62 = vmax.f32 %v513_v60, 0.0  ;;  %v760_v63 = vmax.f32 %v673_v61, 0.0 }
 0x132   :  { %793 = vst [vmem:[%s1754_s4 + $0xd8] sm:$0xff] %v729_v58  ;;  %825 = vst [vmem:[%s1754_s4 + $0x1d8] sm:$0xff] %v761_v59 }
 0x133   :  { %792 = vst [vmem:[%s1754_s4 + $0xd0] sm:$0xff] %v728_v62  ;;  %824 = vst [vmem:[%s1754_s4 + $0x1d0] sm:$0xff] %v760_v63  ;;  %v1149_v0 = vpop.f32.mrb[28].mxu0  ;;  %v1197_v1 = vpop.f32.mrb[28].mxu1 }
 0x134   :  { %v731_v2 = vmax.f32 %v1149_v0, 0.0  ;;  %v763_v4 = vmax.f32 %v1197_v1, 0.0  ;;  %v523_v5 = vpop.f32.mrb[29].mxu0  ;;  %v683_v6 = vpop.f32.mrb[29].mxu1 }
 0x135   :  { %v730_v7 = vmax.f32 %v523_v5, 0.0  ;;  %v762_v8 = vmax.f32 %v683_v6, 0.0 }
 0x136   :  { %795 = vst [vmem:[%s1754_s4 + $0xe8] sm:$0xff] %v731_v2  ;;  %827 = vst [vmem:[%s1754_s4 + $0x1e8] sm:$0xff] %v763_v4 }
 0x137   :  { %794 = vst [vmem:[%s1754_s4 + $0xe0] sm:$0xff] %v730_v7  ;;  %826 = vst [vmem:[%s1754_s4 + $0x1e0] sm:$0xff] %v762_v8  ;;  %v1152_v9 = vpop.f32.mrb[30].mxu0  ;;  %v1200_v10 = vpop.f32.mrb[30].mxu1 }
 0x138   :  { %v733_v11 = vmax.f32 %v1152_v9, 0.0  ;;  %v765_v12 = vmax.f32 %v1200_v10, 0.0  ;;  %v533_v13 = vpop.f32.mrb[31].mxu0  ;;  %v693_v14 = vpop.f32.mrb[31].mxu1 }
 0x139   :  { %v732_v15 = vmax.f32 %v533_v13, 0.0  ;;  %v764_v16 = vmax.f32 %v693_v14, 0.0 }
 0x13a   :  { %797 = vst [vmem:[%s1754_s4 + $0xf8] sm:$0xff] %v733_v11  ;;  %829 = vst [vmem:[%s1754_s4 + $0x1f8] sm:$0xff] %v765_v12 }
 0x13b   :  { %796 = vst [vmem:[%s1754_s4 + $0xf0] sm:$0xff] %v732_v15  ;;  %828 = vst [vmem:[%s1754_s4 + $0x1f0] sm:$0xff] %v764_v16 }

// kernel: basic_block_forward.6
= control target key start
LH: loop header
LB: loop body
LE: loop exit
PB: predicated region body
PF: predicated region fallthrough
CT: control target
= control target key end

     0   :  { %vm277_vm0 = vcmask 621568   ;;  %vm374_vm1 = vcmask 1045504   ;;  %vm1189_vm2 = vcmask 1040384   ;;  %s2202_s1 = inlined_call_operand.vmem [shape: bf16[76,128], index: 1, kind: input, shape index: {}]   ;;  %s2203_s0 = inlined_call_operand.vmem [shape: bf16[512,76], index: 0, kind: input, shape index: {}]   ;;  %s2204_s2 = inlined_call_operand.vmem [shape: bf16[512,128], index: 2, kind: output, shape index: {0}]   ;;  %s2205_s3 = inlined_call_operand.vmem [shape: f32[1,2,128], index: 3, kind: output, shape index: {1}]  }
   0x1   :  { %v1711_v0 = vld [vmem:[%s2202_s1] sm:$0xff]   ;;  %v1712_v1 = vld [vmem:[%s2202_s1 + $0x8] sm:$0xff]   ;;  %v1713_v2 = vld [vmem:[%s2202_s1 + $0x10] sm:$0xff]  }
   0x2   :  { %1625 = vmatprep.subr.bf16.mxu0 %v1711_v0  ;;  %1699 = vmatprep.subr.bf16.mxu1 %v1711_v0  ;;  %v1716_v3 = vld [vmem:[%s2203_s0] sm:$0xff]   ;;  %v1714_v4 = vld [vmem:[%s2202_s1 + $0x18] sm:$0xff]   ;;  %v1717_v7 = vld [vmem:[%s2203_s0 + $0x8] sm:$0xff]  }
   0x3   :  { %1626 = vmatpush3.bf16.msra.mxu0 %v1711_v0  ;;  %1704 = vmatpush3.bf16.msra.mxu1 %v1711_v0  ;;  %v1715_v5 = vld [vmem:[%s2202_s1 + $0x20] sm:$0x3f]   ;;  %v1718_v8 = vld [vmem:[%s2203_s0 + $0x10] sm:$0xff]   ;;  %v1733_v10 = vld [vmem:[%s2203_s0 + $0x88] sm:$0xff]  }
   0x4   :  { %1627 = vmatprep.subr.bf16.mxu0 %v1712_v1  ;;  %1700 = vmatprep.subr.bf16.mxu1 %v1712_v1  ;;  %v376_v6 = vsel %vm374_vm1, %v1715_v5, 0  ;;  %v1732_v9 = vld [vmem:[%s2203_s0 + $0x80] sm:$0xff]   ;;  %v1734_v11 = vld [vmem:[%s2203_s0 + $0x90] sm:$0xff]   ;;  %v1719_v12 = vld [vmem:[%s2203_s0 + $0x18] sm:$0xff]  }
   0x5   :  { %1635 = vmatprep.mubr.msk.bf16.mxu0 %vm277_vm0, %v1716_v3  ;;  %1667 = vmatprep.mubr.msk.bf16.mxu1 %vm277_vm0, %v1732_v9  ;;  %v1720_v13 = vld [vmem:[%s2203_s0 + $0x20] sm:$0xff]   ;;  %v1735_v14 = vld [vmem:[%s2203_s0 + $0x98] sm:$0xff]   ;;  %v1721_v16 = vld [vmem:[%s2203_s0 + $0x28] sm:$0xff]  }
   0x6   :  { %v1736_v15 = vld [vmem:[%s2203_s0 + $0xa0] sm:$0xff]   ;;  %v1722_v17 = vld [vmem:[%s2203_s0 + $0x30] sm:$0xff]   ;;  %v1737_v18 = vld [vmem:[%s2203_s0 + $0xa8] sm:$0xff]  }
   0x7   :  { %1628 = vmatpush3.bf16.msra.mxu0 %v1712_v1  ;;  %1705 = vmatpush3.bf16.msra.mxu1 %v1712_v1  ;;  %v1738_v19 = vld [vmem:[%s2203_s0 + $0xb0] sm:$0xff]   ;;  %v1723_v20 = vld [vmem:[%s2203_s0 + $0x38] sm:$0xff]   ;;  %v1724_v21 = vld [vmem:[%s2203_s0 + $0x40] sm:$0xff]  }
   0x8   :  { %1629 = vmatprep.subr.bf16.mxu0 %v1713_v2  ;;  %1701 = vmatprep.subr.bf16.mxu1 %v1713_v2  ;;  %v1739_v22 = vld [vmem:[%s2203_s0 + $0xb8] sm:$0xff]   ;;  %v1740_v23 = vld [vmem:[%s2203_s0 + $0xc0] sm:$0xff]   ;;  %v1725_v24 = vld [vmem:[%s2203_s0 + $0x48] sm:$0xff]  }
   0x9   :  { %v1726_v25 = vld [vmem:[%s2203_s0 + $0x50] sm:$0xff]   ;;  %v1741_v26 = vld [vmem:[%s2203_s0 + $0xc8] sm:$0xff]   ;;  %v1727_v28 = vld [vmem:[%s2203_s0 + $0x58] sm:$0xff]  }
   0xa   :  { %v1742_v27 = vld [vmem:[%s2203_s0 + $0xd0] sm:$0xff]   ;;  %v1728_v29 = vld [vmem:[%s2203_s0 + $0x60] sm:$0xff]   ;;  %v1743_v30 = vld [vmem:[%s2203_s0 + $0xd8] sm:$0xff]  }
   0xb   :  { %1630 = vmatpush3.bf16.msra.mxu0 %v1713_v2  ;;  %1706 = vmatpush3.bf16.msra.mxu1 %v1713_v2  ;;  %v1744_v31 = vld [vmem:[%s2203_s0 + $0xe0] sm:$0xff]   ;;  %v1729_v32 = vld [vmem:[%s2203_s0 + $0x68] sm:$0xff]   ;;  %v1730_v33 = vld [vmem:[%s2203_s0 + $0x70] sm:$0xff]  }
   0xc   :  { %1631 = vmatprep.subr.bf16.mxu0 %v1714_v4  ;;  %1702 = vmatprep.subr.bf16.mxu1 %v1714_v4  ;;  %v1745_v34 = vld [vmem:[%s2203_s0 + $0xe8] sm:$0xff]   ;;  %v1746_v35 = vld [vmem:[%s2203_s0 + $0xf0] sm:$0xff]   ;;  %v1731_v36 = vld [vmem:[%s2203_s0 + $0x78] sm:$0xff]  }
   0xd   :  { %v1747_v37 = vld [vmem:[%s2203_s0 + $0xf8] sm:$0xff]  }
   0xf   :  { %1632 = vmatpush3.bf16.msra.mxu0 %v1714_v4  ;;  %1707 = vmatpush3.bf16.msra.mxu1 %v1714_v4 }
  0x10   :  { %1709 = vmatprep.subr.msk.bf16.mxu0 %vm374_vm1, %v1715_v5  ;;  %1710 = vmatprep.subr.msk.bf16.mxu1 %vm374_vm1, %v1715_v5 }
  0x13   :  { %1634 = vmatpush3.bf16.msra.mxu0 %v376_v6  ;;  %1708 = vmatpush3.bf16.msra.mxu1 %v376_v6 }
  0x16   :  { %1636 = vmatmul.mubr.msk.bf16.vlgmr.msra.gmra.mrb[0].mxu0 %vm277_vm0, %v1717_v7  ;;  %1668 = vmatmul.mubr.msk.bf16.vlgmr.msra.gmra.mrb[0].mxu1 %vm277_vm0, %v1733_v10 }
  0x17   :  { %1639 = vmatprep.mubr.msk.bf16.mxu0 %vm277_vm0, %v1718_v8  ;;  %1671 = vmatprep.mubr.msk.bf16.mxu1 %vm277_vm0, %v1734_v11 }
  0x1e   :  { %1640 = vmatmul.mubr.msk.bf16.gmra.mrb[4].mxu0 %vm277_vm0, %v1719_v12  ;;  %1672 = vmatmul.mubr.msk.bf16.gmra.mrb[4].mxu1 %vm277_vm0, %v1735_v14 }
  0x1f   :  { %1643 = vmatprep.mubr.msk.bf16.mxu0 %vm277_vm0, %v1720_v13  ;;  %1675 = vmatprep.mubr.msk.bf16.mxu1 %vm277_vm0, %v1736_v15 }
  0x26   :  { %1644 = vmatmul.mubr.msk.bf16.gmra.mrb[8].mxu0 %vm277_vm0, %v1721_v16  ;;  %1676 = vmatmul.mubr.msk.bf16.gmra.mrb[8].mxu1 %vm277_vm0, %v1737_v18 }
  0x27   :  { %1647 = vmatprep.mubr.msk.bf16.mxu0 %vm277_vm0, %v1722_v17  ;;  %1679 = vmatprep.mubr.msk.bf16.mxu1 %vm277_vm0, %v1738_v19 }
  0x2e   :  { %1648 = vmatmul.mubr.msk.bf16.gmra.mrb[12].mxu0 %vm277_vm0, %v1723_v20  ;;  %1680 = vmatmul.mubr.msk.bf16.gmra.mrb[12].mxu1 %vm277_vm0, %v1739_v22 }
  0x2f   :  { %1651 = vmatprep.mubr.msk.bf16.mxu0 %vm277_vm0, %v1724_v21  ;;  %1683 = vmatprep.mubr.msk.bf16.mxu1 %vm277_vm0, %v1740_v23 }
  0x36   :  { %1652 = vmatmul.mubr.msk.bf16.gmra.mrb[16].mxu0 %vm277_vm0, %v1725_v24  ;;  %1684 = vmatmul.mubr.msk.bf16.gmra.mrb[16].mxu1 %vm277_vm0, %v1741_v26 }
  0x37   :  { %1655 = vmatprep.mubr.msk.bf16.mxu0 %vm277_vm0, %v1726_v25  ;;  %1687 = vmatprep.mubr.msk.bf16.mxu1 %vm277_vm0, %v1742_v27 }
  0x3e   :  { %1656 = vmatmul.mubr.msk.bf16.gmra.mrb[20].mxu0 %vm277_vm0, %v1727_v28  ;;  %1688 = vmatmul.mubr.msk.bf16.gmra.mrb[20].mxu1 %vm277_vm0, %v1743_v30 }
  0x3f   :  { %1659 = vmatprep.mubr.msk.bf16.mxu0 %vm277_vm0, %v1728_v29  ;;  %1691 = vmatprep.mubr.msk.bf16.mxu1 %vm277_vm0, %v1744_v31 }
  0x46   :  { %1660 = vmatmul.mubr.msk.bf16.gmra.mrb[24].mxu0 %vm277_vm0, %v1729_v32  ;;  %1692 = vmatmul.mubr.msk.bf16.gmra.mrb[24].mxu1 %vm277_vm0, %v1745_v34 }
  0x47   :  { %1663 = vmatprep.mubr.msk.bf16.mxu0 %vm277_vm0, %v1730_v33  ;;  %1695 = vmatprep.mubr.msk.bf16.mxu1 %vm277_vm0, %v1746_v35 }
  0x4e   :  { %1664 = vmatmul.mubr.msk.bf16.gmra.mrb[28].mxu0 %vm277_vm0, %v1731_v36  ;;  %1696 = vmatmul.mubr.msk.bf16.gmra.mrb[28].mxu1 %vm277_vm0, %v1747_v37 }
  0xe9   :  { %v1637_v38 = vpop.f32.mrb[0].mxu0  ;;  %v1911_v41 = vpop.f32.mrb[0].mxu1 }
  0xea   :  { %v412_v39 = vpop.f32.mrb[1].mxu0  ;;  %v1913_v44 = vpop.f32.mrb[1].mxu1  ;;  %v1058_v52 = vmul.f32 %v1637_v38, %v1637_v38 }
  0xeb   :  { %v1638_v40 = vpop.f32.mrb[2].mxu0  ;;  %v1056_v45 = vmul.f32 %v412_v39, %v412_v39  ;;  %v1915_v49 = vpop.f32.mrb[2].mxu1 }
  0xec   :  { %v1405_v42 = vpack.c.bf16 %v1638_v40, %v1637_v38  ;;  %v415_v43 = vpop.f32.mrb[3].mxu0  ;;  %v1485_v50 = vpack.c.bf16 %v1915_v49, %v1911_v41  ;;  %v1922_v51 = vpop.f32.mrb[3].mxu1  ;;  %v1059_v56 = vmul.f32 %v1638_v40, %v1638_v40 }
  0xed   :  { %v1400_v46 = vpack.c.bf16 %v415_v43, %v412_v39  ;;  %v987_v47 = vadd.f32 %v415_v43, %v412_v39  ;;  %v1057_v48 = vmul.f32 %v415_v43, %v415_v43  ;;  %v1480_v55 = vpack.c.bf16 %v1922_v51, %v1913_v44 }
  0xee   :  { %1557 = vst [vmem:[%s2204_s2 + $0x8] sm:$0xff] %v1405_v42   ;;  %1573 = vst [vmem:[%s2204_s2 + $0x88] sm:$0xff] %v1485_v50  }
  0xef   :  { %1401 = vst [vmem:[%s2204_s2] sm:$0xff] %v1400_v46   ;;  %v988_v53 = vadd.f32 %v1637_v38, %v987_v47  ;;  %v1120_v54 = vadd.f32 %v1057_v48, %v1056_v45  ;;  %1572 = vst [vmem:[%s2204_s2 + $0x80] sm:$0xff] %v1480_v55  }
  0xf1   :  { %v1121_v57 = vadd.f32 %v1120_v54, %v1058_v52  ;;  %v1641_v58 = vpop.f32.mrb[4].mxu0  ;;  %v989_v59 = vadd.f32 %v1638_v40, %v988_v53  ;;  %v1935_v1 = vpop.f32.mrb[4].mxu1 }
  0xf2   :  { %v428_v60 = vpop.f32.mrb[5].mxu0  ;;  %v1937_v4 = vpop.f32.mrb[5].mxu1  ;;  %v1062_v12 = vmul.f32 %v1641_v58, %v1641_v58 }
  0xf3   :  { %v990_v61 = vadd.f32 %v989_v59, %v428_v60  ;;  %v1060_v62 = vmul.f32 %v428_v60, %v428_v60  ;;  %v1122_v63 = vadd.f32 %v1121_v57, %v1059_v56  ;;  %v1642_v0 = vpop.f32.mrb[6].mxu0  ;;  %v1939_v9 = vpop.f32.mrb[6].mxu1 }
  0xf4   :  { %v1415_v2 = vpack.c.bf16 %v1642_v0, %v1641_v58  ;;  %v431_v3 = vpop.f32.mrb[7].mxu0  ;;  %v1495_v10 = vpack.c.bf16 %v1939_v9, %v1935_v1  ;;  %v1946_v11 = vpop.f32.mrb[7].mxu1  ;;  %v1063_v16 = vmul.f32 %v1642_v0, %v1642_v0 }
  0xf5   :  { %v1123_v5 = vadd.f32 %v1122_v63, %v1060_v62  ;;  %v1410_v6 = vpack.c.bf16 %v431_v3, %v428_v60  ;;  %v991_v7 = vadd.f32 %v990_v61, %v431_v3  ;;  %v1061_v8 = vmul.f32 %v431_v3, %v431_v3 }
  0xf6   :  { %1559 = vst [vmem:[%s2204_s2 + $0x18] sm:$0xff] %v1415_v2   ;;  %v1490_v15 = vpack.c.bf16 %v1946_v11, %v1937_v4  ;;  %1575 = vst [vmem:[%s2204_s2 + $0x98] sm:$0xff] %v1495_v10  }
  0xf7   :  { %1558 = vst [vmem:[%s2204_s2 + $0x10] sm:$0xff] %v1410_v6   ;;  %v992_v13 = vadd.f32 %v1641_v58, %v991_v7  ;;  %v1124_v14 = vadd.f32 %v1123_v5, %v1061_v8 }
  0xf8   :  { %1574 = vst [vmem:[%s2204_s2 + $0x90] sm:$0xff] %v1490_v15  }
  0xf9   :  { %v1125_v17 = vadd.f32 %v1124_v14, %v1062_v12  ;;  %v1645_v18 = vpop.f32.mrb[8].mxu0  ;;  %v993_v19 = vadd.f32 %v1642_v0, %v992_v13  ;;  %v1959_v25 = vpop.f32.mrb[8].mxu1 }
  0xfa   :  { %v444_v20 = vpop.f32.mrb[9].mxu0  ;;  %v1961_v28 = vpop.f32.mrb[9].mxu1  ;;  %v1066_v36 = vmul.f32 %v1645_v18, %v1645_v18 }
  0xfb   :  { %v994_v21 = vadd.f32 %v993_v19, %v444_v20  ;;  %v1064_v22 = vmul.f32 %v444_v20, %v444_v20  ;;  %v1126_v23 = vadd.f32 %v1125_v17, %v1063_v16  ;;  %v1646_v24 = vpop.f32.mrb[10].mxu0  ;;  %v1963_v33 = vpop.f32.mrb[10].mxu1 }
  0xfc   :  { %v1425_v26 = vpack.c.bf16 %v1646_v24, %v1645_v18  ;;  %v447_v27 = vpop.f32.mrb[11].mxu0  ;;  %v1505_v34 = vpack.c.bf16 %v1963_v33, %v1959_v25  ;;  %v1970_v35 = vpop.f32.mrb[11].mxu1  ;;  %v1067_v40 = vmul.f32 %v1646_v24, %v1646_v24 }
  0xfd   :  { %v1127_v29 = vadd.f32 %v1126_v23, %v1064_v22  ;;  %v1420_v30 = vpack.c.bf16 %v447_v27, %v444_v20  ;;  %v995_v31 = vadd.f32 %v994_v21, %v447_v27  ;;  %v1065_v32 = vmul.f32 %v447_v27, %v447_v27 }
  0xfe   :  { %1561 = vst [vmem:[%s2204_s2 + $0x28] sm:$0xff] %v1425_v26   ;;  %v1500_v39 = vpack.c.bf16 %v1970_v35, %v1961_v28  ;;  %1577 = vst [vmem:[%s2204_s2 + $0xa8] sm:$0xff] %v1505_v34  }
  0xff   :  { %1560 = vst [vmem:[%s2204_s2 + $0x20] sm:$0xff] %v1420_v30   ;;  %v996_v37 = vadd.f32 %v1645_v18, %v995_v31  ;;  %v1128_v38 = vadd.f32 %v1127_v29, %v1065_v32 }
 0x100   :  { %1576 = vst [vmem:[%s2204_s2 + $0xa0] sm:$0xff] %v1500_v39  }
 0x101   :  { %v1129_v42 = vadd.f32 %v1128_v38, %v1066_v36  ;;  %v1649_v43 = vpop.f32.mrb[12].mxu0  ;;  %v997_v45 = vadd.f32 %v1646_v24, %v996_v37  ;;  %v1983_v53 = vpop.f32.mrb[12].mxu1 }
 0x102   :  { %v460_v46 = vpop.f32.mrb[13].mxu0  ;;  %v1985_v56 = vpop.f32.mrb[13].mxu1  ;;  %v1070_v0 = vmul.f32 %v1649_v43, %v1649_v43 }
 0x103   :  { %v998_v47 = vadd.f32 %v997_v45, %v460_v46  ;;  %v1068_v48 = vmul.f32 %v460_v46, %v460_v46  ;;  %v1130_v50 = vadd.f32 %v1129_v42, %v1067_v40  ;;  %v1650_v52 = vpop.f32.mrb[14].mxu0  ;;  %v1987_v61 = vpop.f32.mrb[14].mxu1 }
 0x104   :  { %v1435_v54 = vpack.c.bf16 %v1650_v52, %v1649_v43  ;;  %v463_v55 = vpop.f32.mrb[15].mxu0  ;;  %v1515_v62 = vpack.c.bf16 %v1987_v61, %v1983_v53  ;;  %v1994_v63 = vpop.f32.mrb[15].mxu1  ;;  %v1071_v6 = vmul.f32 %v1650_v52, %v1650_v52 }
 0x105   :  { %v1131_v57 = vadd.f32 %v1130_v50, %v1068_v48  ;;  %v1430_v58 = vpack.c.bf16 %v463_v55, %v460_v46  ;;  %v999_v59 = vadd.f32 %v998_v47, %v463_v55  ;;  %v1069_v60 = vmul.f32 %v463_v55, %v463_v55 }
 0x106   :  { %1563 = vst [vmem:[%s2204_s2 + $0x38] sm:$0xff] %v1435_v54   ;;  %v1510_v5 = vpack.c.bf16 %v1994_v63, %v1985_v56  ;;  %1579 = vst [vmem:[%s2204_s2 + $0xb8] sm:$0xff] %v1515_v62  }
 0x107   :  { %1562 = vst [vmem:[%s2204_s2 + $0x30] sm:$0xff] %v1430_v58   ;;  %v1000_v2 = vadd.f32 %v1649_v43, %v999_v59  ;;  %v1132_v3 = vadd.f32 %v1131_v57, %v1069_v60 }
 0x108   :  { %1578 = vst [vmem:[%s2204_s2 + $0xb0] sm:$0xff] %v1510_v5  }
 0x109   :  { %v1133_v7 = vadd.f32 %v1132_v3, %v1070_v0  ;;  %v1653_v8 = vpop.f32.mrb[16].mxu0  ;;  %v1001_v10 = vadd.f32 %v1650_v52, %v1000_v2  ;;  %v2007_v17 = vpop.f32.mrb[16].mxu1 }
 0x10a   :  { %v476_v12 = vpop.f32.mrb[17].mxu0  ;;  %v2009_v20 = vpop.f32.mrb[17].mxu1  ;;  %v1074_v30 = vmul.f32 %v1653_v8, %v1653_v8 }
 0x10b   :  { %v1002_v13 = vadd.f32 %v1001_v10, %v476_v12  ;;  %v1072_v14 = vmul.f32 %v476_v12, %v476_v12  ;;  %v1134_v15 = vadd.f32 %v1133_v7, %v1071_v6  ;;  %v1654_v16 = vpop.f32.mrb[18].mxu0  ;;  %v2011_v26 = vpop.f32.mrb[18].mxu1 }
 0x10c   :  { %v1445_v18 = vpack.c.bf16 %v1654_v16, %v1653_v8  ;;  %v479_v19 = vpop.f32.mrb[19].mxu0  ;;  %v1525_v27 = vpack.c.bf16 %v2011_v26, %v2007_v17  ;;  %v2018_v29 = vpop.f32.mrb[19].mxu1  ;;  %v1075_v36 = vmul.f32 %v1654_v16, %v1654_v16 }
 0x10d   :  { %v1135_v21 = vadd.f32 %v1134_v15, %v1072_v14  ;;  %v1440_v22 = vpack.c.bf16 %v479_v19, %v476_v12  ;;  %v1003_v23 = vadd.f32 %v1002_v13, %v479_v19  ;;  %v1073_v24 = vmul.f32 %v479_v19, %v479_v19 }
 0x10e   :  { %1565 = vst [vmem:[%s2204_s2 + $0x48] sm:$0xff] %v1445_v18   ;;  %v1520_v34 = vpack.c.bf16 %v2018_v29, %v2009_v20  ;;  %1581 = vst [vmem:[%s2204_s2 + $0xc8] sm:$0xff] %v1525_v27  }
 0x10f   :  { %1564 = vst [vmem:[%s2204_s2 + $0x40] sm:$0xff] %v1440_v22   ;;  %v1004_v31 = vadd.f32 %v1653_v8, %v1003_v23  ;;  %v1136_v32 = vadd.f32 %v1135_v21, %v1073_v24 }
 0x110   :  { %1580 = vst [vmem:[%s2204_s2 + $0xc0] sm:$0xff] %v1520_v34  }
 0x111   :  { %v1137_v37 = vadd.f32 %v1136_v32, %v1074_v30  ;;  %v1657_v38 = vpop.f32.mrb[20].mxu0  ;;  %v1005_v39 = vadd.f32 %v1654_v16, %v1004_v31  ;;  %v2031_v47 = vpop.f32.mrb[20].mxu1 }
 0x112   :  { %v492_v40 = vpop.f32.mrb[21].mxu0  ;;  %v2033_v52 = vpop.f32.mrb[21].mxu1  ;;  %v1078_v0 = vmul.f32 %v1657_v38, %v1657_v38 }
 0x113   :  { %v1006_v42 = vadd.f32 %v1005_v39, %v492_v40  ;;  %v1076_v43 = vmul.f32 %v492_v40, %v492_v40  ;;  %v1138_v45 = vadd.f32 %v1137_v37, %v1075_v36  ;;  %v1658_v46 = vpop.f32.mrb[22].mxu0  ;;  %v2035_v59 = vpop.f32.mrb[22].mxu1 }
 0x114   :  { %v1455_v48 = vpack.c.bf16 %v1658_v46, %v1657_v38  ;;  %v495_v50 = vpop.f32.mrb[23].mxu0  ;;  %v1535_v60 = vpack.c.bf16 %v2035_v59, %v2031_v47  ;;  %v2042_v62 = vpop.f32.mrb[23].mxu1  ;;  %v1079_v6 = vmul.f32 %v1658_v46, %v1658_v46 }
 0x115   :  { %v1139_v54 = vadd.f32 %v1138_v45, %v1076_v43  ;;  %v1450_v55 = vpack.c.bf16 %v495_v50, %v492_v40  ;;  %v1007_v57 = vadd.f32 %v1006_v42, %v495_v50  ;;  %v1077_v58 = vmul.f32 %v495_v50, %v495_v50 }
 0x116   :  { %1567 = vst [vmem:[%s2204_s2 + $0x58] sm:$0xff] %v1455_v48   ;;  %v1530_v5 = vpack.c.bf16 %v2042_v62, %v2033_v52  ;;  %1583 = vst [vmem:[%s2204_s2 + $0xd8] sm:$0xff] %v1535_v60  }
 0x117   :  { %1566 = vst [vmem:[%s2204_s2 + $0x50] sm:$0xff] %v1450_v55   ;;  %v1008_v2 = vadd.f32 %v1657_v38, %v1007_v57  ;;  %v1140_v3 = vadd.f32 %v1139_v54, %v1077_v58 }
 0x118   :  { %1582 = vst [vmem:[%s2204_s2 + $0xd0] sm:$0xff] %v1530_v5  }
 0x119   :  { %v1141_v7 = vadd.f32 %v1140_v3, %v1078_v0  ;;  %v1661_v8 = vpop.f32.mrb[24].mxu0  ;;  %v1009_v10 = vadd.f32 %v1658_v46, %v1008_v2  ;;  %v2055_v18 = vpop.f32.mrb[24].mxu1 }
 0x11a   :  { %v508_v12 = vpop.f32.mrb[25].mxu0  ;;  %v2057_v22 = vpop.f32.mrb[25].mxu1  ;;  %v1082_v36 = vmul.f32 %v1661_v8, %v1661_v8 }
 0x11b   :  { %v1010_v13 = vadd.f32 %v1009_v10, %v508_v12  ;;  %v1080_v14 = vmul.f32 %v508_v12, %v508_v12  ;;  %v1142_v15 = vadd.f32 %v1141_v7, %v1079_v6  ;;  %v1662_v16 = vpop.f32.mrb[26].mxu0  ;;  %v2059_v31 = vpop.f32.mrb[26].mxu1 }
 0x11c   :  { %v1465_v19 = vpack.c.bf16 %v1662_v16, %v1661_v8  ;;  %v511_v21 = vpop.f32.mrb[27].mxu0  ;;  %v1545_v32 = vpack.c.bf16 %v2059_v31, %v2055_v18  ;;  %v2066_v34 = vpop.f32.mrb[27].mxu1  ;;  %v1083_v40 = vmul.f32 %v1662_v16, %v1662_v16 }
 0x11d   :  { %v1143_v23 = vadd.f32 %v1142_v15, %v1080_v14  ;;  %v1460_v24 = vpack.c.bf16 %v511_v21, %v508_v12  ;;  %v1011_v27 = vadd.f32 %v1010_v13, %v511_v21  ;;  %v1081_v30 = vmul.f32 %v511_v21, %v511_v21 }
 0x11e   :  { %1569 = vst [vmem:[%s2204_s2 + $0x68] sm:$0xff] %v1465_v19   ;;  %v1540_v39 = vpack.c.bf16 %v2066_v34, %v2057_v22  ;;  %1585 = vst [vmem:[%s2204_s2 + $0xe8] sm:$0xff] %v1545_v32  }
 0x11f   :  { %1568 = vst [vmem:[%s2204_s2 + $0x60] sm:$0xff] %v1460_v24   ;;  %v1012_v37 = vadd.f32 %v1661_v8, %v1011_v27  ;;  %v1144_v38 = vadd.f32 %v1143_v23, %v1081_v30  ;;  %v1088_v23 = vmul.f32 %v1913_v44, %v1913_v44 }
 0x120   :  { %1584 = vst [vmem:[%s2204_s2 + $0xe0] sm:$0xff] %v1540_v39  }
 0x121   :  { %v1145_v42 = vadd.f32 %v1144_v38, %v1082_v36  ;;  %v1665_v43 = vpop.f32.mrb[28].mxu0  ;;  %v1013_v45 = vadd.f32 %v1662_v16, %v1012_v37  ;;  %v2079_v57 = vpop.f32.mrb[28].mxu1  ;;  %v1089_v36 = vmul.f32 %v1922_v51, %v1922_v51  ;;  %v1090_v37 = vmul.f32 %v1911_v41, %v1911_v41 }
 0x122   :  { %v524_v46 = vpop.f32.mrb[29].mxu0  ;;  %v2081_v0 = vpop.f32.mrb[29].mxu1  ;;  %v1086_v12 = vmul.f32 %v1665_v43, %v1665_v43 }
 0x123   :  { %v1014_v48 = vadd.f32 %v1013_v45, %v524_v46  ;;  %v1084_v50 = vmul.f32 %v524_v46, %v524_v46  ;;  %v1146_v54 = vadd.f32 %v1145_v42, %v1083_v40  ;;  %v1666_v55 = vpop.f32.mrb[30].mxu0  ;;  %v2083_v7 = vpop.f32.mrb[30].mxu1  ;;  %v1091_v40 = vmul.f32 %v1915_v49, %v1915_v49 }
 0x124   :  { %v1475_v58 = vpack.c.bf16 %v1666_v55, %v1665_v43  ;;  %v527_v60 = vpop.f32.mrb[31].mxu0  ;;  %v1555_v8 = vpack.c.bf16 %v2083_v7, %v2079_v57  ;;  %v2090_v10 = vpop.f32.mrb[31].mxu1  ;;  %v1087_v16 = vmul.f32 %v1666_v55, %v1666_v55 }
 0x125   :  { %v1147_v2 = vadd.f32 %v1146_v54, %v1084_v50  ;;  %v1470_v3 = vpack.c.bf16 %v527_v60, %v524_v46  ;;  %v1015_v5 = vadd.f32 %v1014_v48, %v527_v60  ;;  %v1085_v6 = vmul.f32 %v527_v60, %v527_v60 }
 0x126   :  { %1571 = vst [vmem:[%s2204_s2 + $0x78] sm:$0xff] %v1475_v58   ;;  %v1550_v15 = vpack.c.bf16 %v2090_v10, %v2081_v0  ;;  %1587 = vst [vmem:[%s2204_s2 + $0xf8] sm:$0xff] %v1555_v8   ;;  %v1093_v50 = vmul.f32 %v1946_v11, %v1946_v11 }
 0x127   :  { %1570 = vst [vmem:[%s2204_s2 + $0x70] sm:$0xff] %v1470_v3   ;;  %v1016_v13 = vadd.f32 %v1665_v43, %v1015_v5  ;;  %v1148_v14 = vadd.f32 %v1147_v2, %v1085_v6  ;;  %v1097_v6 = vmul.f32 %v1970_v35, %v1970_v35 }
 0x128   :  { %1586 = vst [vmem:[%s2204_s2 + $0xf0] sm:$0xff] %v1550_v15  }
 0x129   :  { %v1149_v19 = vadd.f32 %v1148_v14, %v1086_v12  ;;  %v1017_v21 = vadd.f32 %v1666_v55, %v1016_v13 }
 0x12b   :  { %v1018_v24 = vadd.f32 %v1017_v21, %v1913_v44  ;;  %v1150_v27 = vadd.f32 %v1149_v19, %v1087_v16  ;;  %v1092_v44 = vmul.f32 %v1937_v4, %v1937_v4  ;;  %v1101_v21 = vmul.f32 %v1994_v63, %v1994_v63 }
 0x12d   :  { %v1151_v30 = vadd.f32 %v1150_v27, %v1088_v23  ;;  %v1019_v32 = vadd.f32 %v1018_v24, %v1922_v51 }
 0x12f   :  { %v1020_v38 = vadd.f32 %v1911_v41, %v1019_v32  ;;  %v1152_v39 = vadd.f32 %v1151_v30, %v1089_v36  ;;  %v1094_v41 = vmul.f32 %v1935_v1, %v1935_v1 }
 0x131   :  { %v1153_v42 = vadd.f32 %v1152_v39, %v1090_v37  ;;  %v1021_v43 = vadd.f32 %v1915_v49, %v1020_v38  ;;  %v1095_v49 = vmul.f32 %v1939_v9, %v1939_v9  ;;  %v1105_v38 = vmul.f32 %v2018_v29, %v2018_v29 }
 0x133   :  { %v1022_v45 = vadd.f32 %v1021_v43, %v1937_v4  ;;  %v1154_v46 = vadd.f32 %v1153_v42, %v1091_v40  ;;  %v1096_v4 = vmul.f32 %v1961_v28, %v1961_v28 }
 0x135   :  { %v1155_v48 = vadd.f32 %v1154_v46, %v1092_v44  ;;  %v1023_v51 = vadd.f32 %v1022_v45, %v1946_v11 }
 0x137   :  { %v1024_v54 = vadd.f32 %v1935_v1, %v1023_v51  ;;  %v1156_v55 = vadd.f32 %v1155_v48, %v1093_v50  ;;  %v1098_v1 = vmul.f32 %v1959_v25, %v1959_v25  ;;  %v1109_v48 = vmul.f32 %v2042_v62, %v2042_v62 }
 0x139   :  { %v1157_v58 = vadd.f32 %v1156_v55, %v1094_v41  ;;  %v1025_v60 = vadd.f32 %v1939_v9, %v1024_v54  ;;  %v1099_v9 = vmul.f32 %v1963_v33, %v1963_v33 }
 0x13b   :  { %v1026_v2 = vadd.f32 %v1025_v60, %v1961_v28  ;;  %v1158_v3 = vadd.f32 %v1157_v58, %v1095_v49  ;;  %v1100_v28 = vmul.f32 %v1985_v56, %v1985_v56  ;;  %v1113_v60 = vmul.f32 %v2066_v34, %v2066_v34 }
 0x13d   :  { %v1159_v5 = vadd.f32 %v1158_v3, %v1096_v4  ;;  %v1027_v11 = vadd.f32 %v1026_v2, %v1970_v35 }
 0x13f   :  { %v1028_v8 = vadd.f32 %v1959_v25, %v1027_v11  ;;  %v1160_v12 = vadd.f32 %v1159_v5, %v1097_v6  ;;  %v1102_v25 = vmul.f32 %v1983_v53, %v1983_v53 }
 0x141   :  { %v1161_v13 = vadd.f32 %v1160_v12, %v1098_v1  ;;  %v1029_v14 = vadd.f32 %v1963_v33, %v1028_v8  ;;  %v1103_v33 = vmul.f32 %v1987_v61, %v1987_v61  ;;  %v1117_v8 = vmul.f32 %v2090_v10, %v2090_v10 }
 0x143   :  { %v1030_v15 = vadd.f32 %v1029_v14, %v1985_v56  ;;  %v1162_v16 = vadd.f32 %v1161_v13, %v1099_v9  ;;  %v1104_v56 = vmul.f32 %v2009_v20, %v2009_v20 }
 0x145   :  { %v1163_v19 = vadd.f32 %v1162_v16, %v1100_v28  ;;  %v1031_v35 = vadd.f32 %v1030_v15, %v1994_v63 }
 0x147   :  { %v1032_v23 = vadd.f32 %v1983_v53, %v1031_v35  ;;  %v1164_v24 = vadd.f32 %v1163_v19, %v1101_v21  ;;  %v1106_v53 = vmul.f32 %v2007_v17, %v2007_v17 }
 0x149   :  { %v1165_v27 = vadd.f32 %v1164_v24, %v1102_v25  ;;  %v1033_v30 = vadd.f32 %v1987_v61, %v1032_v23  ;;  %v1107_v61 = vmul.f32 %v2011_v26, %v2011_v26 }
 0x14b   :  { %v1034_v32 = vadd.f32 %v1033_v30, %v2009_v20  ;;  %v1166_v36 = vadd.f32 %v1165_v27, %v1103_v33  ;;  %v1108_v20 = vmul.f32 %v2033_v52, %v2033_v52 }
 0x14d   :  { %v1167_v37 = vadd.f32 %v1166_v36, %v1104_v56  ;;  %v1035_v63 = vadd.f32 %v1034_v32, %v2018_v29 }
 0x14f   :  { %v1036_v39 = vadd.f32 %v2007_v17, %v1035_v63  ;;  %v1168_v40 = vadd.f32 %v1167_v37, %v1105_v38  ;;  %v1110_v17 = vmul.f32 %v2031_v47, %v2031_v47 }
 0x151   :  { %v1169_v42 = vadd.f32 %v1168_v40, %v1106_v53  ;;  %v1037_v43 = vadd.f32 %v2011_v26, %v1036_v39  ;;  %v1111_v26 = vmul.f32 %v2035_v59, %v2035_v59 }
 0x153   :  { %v1038_v44 = vadd.f32 %v1037_v43, %v2033_v52  ;;  %v1170_v45 = vadd.f32 %v1169_v42, %v1107_v61  ;;  %v1112_v52 = vmul.f32 %v2057_v22, %v2057_v22 }
 0x155   :  { %v1171_v46 = vadd.f32 %v1170_v45, %v1108_v20  ;;  %v1039_v29 = vadd.f32 %v1038_v44, %v2042_v62 }
 0x157   :  { %v1040_v51 = vadd.f32 %v2031_v47, %v1039_v29  ;;  %v1172_v50 = vadd.f32 %v1171_v46, %v1109_v48  ;;  %v1114_v47 = vmul.f32 %v2055_v18, %v2055_v18 }
 0x159   :  { %v1173_v41 = vadd.f32 %v1172_v50, %v1110_v17  ;;  %v1041_v54 = vadd.f32 %v2035_v59, %v1040_v51  ;;  %v1115_v59 = vmul.f32 %v2059_v31, %v2059_v31 }
 0x15b   :  { %v1042_v55 = vadd.f32 %v1041_v54, %v2057_v22  ;;  %v1174_v49 = vadd.f32 %v1173_v41, %v1111_v26  ;;  %v1116_v22 = vmul.f32 %v2081_v0, %v2081_v0 }
 0x15d   :  { %v1175_v58 = vadd.f32 %v1174_v49, %v1112_v52  ;;  %v1043_v62 = vadd.f32 %v1042_v55, %v2066_v34 }
 0x15f   :  { %v1044_v4 = vadd.f32 %v2055_v18, %v1043_v62  ;;  %v1176_v2 = vadd.f32 %v1175_v58, %v1113_v60  ;;  %v1118_v18 = vmul.f32 %v2079_v57, %v2079_v57 }
 0x161   :  { %v1177_v3 = vadd.f32 %v1176_v2, %v1114_v47  ;;  %v1045_v5 = vadd.f32 %v2059_v31, %v1044_v4  ;;  %v1119_v31 = vmul.f32 %v2083_v7, %v2083_v7 }
 0x163   :  { %v1046_v11 = vadd.f32 %v1045_v5, %v2081_v0  ;;  %v1178_v6 = vadd.f32 %v1177_v3, %v1115_v59 }
 0x165   :  { %v1179_v1 = vadd.f32 %v1178_v6, %v1116_v22  ;;  %v1047_v34 = vadd.f32 %v1046_v11, %v2090_v10 }
 0x167   :  { %v1048_v12 = vadd.f32 %v2079_v57, %v1047_v34  ;;  %v1180_v9 = vadd.f32 %v1179_v1, %v1117_v8 }
 0x169   :  { %v1049_v13 = vadd.f32 %v2083_v7, %v1048_v12  ;;  %v1181_v14 = vadd.f32 %v1180_v9, %v1118_v18 }
 0x16b   :  { %v1050_v0 = vrot.slane %v1049_v13, 4  ;;  %v1182_v28 = vadd.f32 %v1181_v14, %v1119_v31 }
 0x16d   :  { %v1051_v15 = vadd.f32 %v1050_v0, %v1049_v13  ;;  %v1183_v16 = vrot.slane %v1182_v28, 4 }
 0x16f   :  { %v1052_v19 = vrot.slane %v1051_v15, 2  ;;  %v1184_v35 = vadd.f32 %v1183_v16, %v1182_v28 }
 0x171   :  { %v1053_v21 = vadd.f32 %v1052_v19, %v1051_v15  ;;  %v1185_v10 = vrot.slane %v1184_v35, 2 }
 0x173   :  { %v1054_v25 = vrot.slane %v1053_v21, 1  ;;  %v1186_v23 = vadd.f32 %v1185_v10, %v1184_v35 }
 0x175   :  { %v1187_v24 = vrot.slane %v1186_v23, 1  ;;  %v1055_v57 = vadd.f32 %v1054_v25, %v1053_v21 }
 0x177   :  { %v1188_v33 = vadd.f32 %v1187_v24, %v1186_v23 }
 0x179   :  { %v1190_v27 = vsel %vm1189_vm2, %v1055_v57, %v1188_v33 }
 0x17a   :  { %1191 = vst [vmem:[%s2205_s3] sm:$0x3] %v1190_v27 }

</bundles_post_ra>
